<compile_context>
chip_gen: v6e
topology: v6e:2x2x1
jax: 0.10.0
libtpu: 0.0.40
codegen_flags: <defaults>
</compile_context>

<pallas_src>
import functools

import jax
import jax.numpy as jnp
from jax.experimental import pallas as pl
from jax.experimental.pallas import tpu as pltpu

KT = 3            # temporal kernel size
N_ST_WEIGHTS = 10
N_OUT_WEIGHTS = 8


def _lane_pad(n):
    return max(128, ((n + 127) // 128) * 128)


# --------------------------------------------------------------------------
# In-kernel building blocks (operate on values / weight refs, fully fused)
# --------------------------------------------------------------------------

def _tconv_glu(x, w_ref, b_ref):
    """Causal temporal conv (Kt taps) + GLU, Kt-tap loop fused via channel im2col.

    x: (BB, T, V, Cin) f32.
    w_ref: (Kt*Cin, 2*Cout) bf16 — [P || Q] weights (reshaped host-side).
    b_ref: (1, 2*Cout) f32.
    Returns (BB, T-Kt+1, V, Cout) f32: (conv_p(x)+align(x)) * sigmoid(conv_q(x)).
    """
    bb, t, v, c_in = x.shape
    kc, c2 = w_ref.shape
    kt = kc // c_in
    c_out = c2 // 2
    t_out = t - kt + 1
    rows = bb * t_out * v

    # im2col over the Kt taps -> one matmul (review item: fuse taps).
    cols = jnp.concatenate([x[:, k:k + t_out] for k in range(kt)], axis=-1)
    cols = cols.reshape(rows, kt * c_in)
    pq = jnp.dot(cols.astype(jnp.bfloat16), w_ref[...],
                 preferred_element_type=jnp.float32) + b_ref[...]
    p = pq[:, :c_out]
    q = pq[:, c_out:]

    # Align residual (channel zero-pad of the last tap) kept in f32.
    res = x[:, kt - 1:].reshape(rows, c_in)
    if c_out > c_in:
        res = jnp.concatenate(
            [res, jnp.zeros((rows, c_out - c_in), jnp.float32)], axis=-1)
    elif c_out < c_in:
        raise NotImplementedError("Align with c_in > c_out not needed here")
    p = p + res

    return (p * jax.nn.sigmoid(q)).reshape(bb, t_out, v, c_out)


def _graph_conv_relu(x, w_ref, b_ref, gso_t_ref, gb_ref):
    """Align(1x1) + folded channel weight -> graph shift (V,V) -> residual -> ReLU.

    Host-side fold: W = [aw | aw@gw], b = [ab | ab@gw], so only two matmuls remain:
    the wide align matmul and the tiny (.,V)x(V,V) graph shift.
    x: (BB, T, V, Cin) f32.  w_ref: (Cin, 2*Cg) bf16.  b_ref: (1, 2*Cg) f32.
    gso_t_ref: (V, V) bf16 (= gso^T).  gb_ref: (1, Cg) f32.
    """
    bb, t, v, c_in = x.shape
    c2 = w_ref.shape[1]
    cg = c2 // 2
    rows = bb * t * v

    xw = jnp.dot(x.reshape(rows, c_in).astype(jnp.bfloat16), w_ref[...],
                 preferred_element_type=jnp.float32) + b_ref[...]   # (rows, 2*Cg)
    xa = xw[:, :cg]          # align output -> residual path (f32)
    xg = xw[:, cg:]          # = xa @ gw (gw folded host-side)

    # Graph shift: per timestep gso @ xg[t]; done as minor-dim transpose (XLU) +
    # one (BB*T*Cg, V) x (V, V) matmul (review item: kill kron(I_T, gso)).
    xg3 = xg.reshape(bb * t, v, cg)
    xg_t = jnp.transpose(xg3, (0, 2, 1)).reshape(bb * t * cg, v)
    g = jnp.dot(xg_t.astype(jnp.bfloat16), gso_t_ref[...],
                preferred_element_type=jnp.float32)                 # (BB*T*Cg, V)
    g = jnp.transpose(g.reshape(bb * t, cg, v), (0, 2, 1)).reshape(rows, cg)

    return jnp.maximum(g + gb_ref[...] + xa, 0.0).reshape(bb, t, v, cg)


def _layer_norm_vc(x, g_ref, b_ref):
    """LayerNorm over (V, C) per (batch, timestep); single-pass moments. eps=1e-5."""
    bb, t, v, c = x.shape
    n = float(v * c)
    s1 = jnp.sum(jnp.sum(x, axis=3, keepdims=True), axis=2, keepdims=True)
    s2 = jnp.sum(jnp.sum(x * x, axis=3, keepdims=True), axis=2, keepdims=True)
    mean = s1 / n
    var = s2 / n - mean * mean
    xn = (x - mean) * jax.lax.rsqrt(var + 1e-5)
    return xn * g_ref[...] + b_ref[...]        # (V,C) broadcasts over (BB,T,.,.)


def _stgcn_fused_kernel(n_st, x_ref, *refs):
    """Entire STGCN forward for BB batch elements; everything VMEM-resident."""
    o_ref = refs[-1]
    w = refs[:-1]

    x = x_ref[...].astype(jnp.float32)                      # (BB, T, V, C0)

    i = 0
    for _ in range(n_st):                                   # static unroll
        (tc1_w, tc1_b, gc_w, gc_b, gso_t, gc_gb,
         tc2_w, tc2_b, ln_g, ln_b) = w[i:i + N_ST_WEIGHTS]
        i += N_ST_WEIGHTS
        x = _tconv_glu(x, tc1_w, tc1_b)                     # (BB, T-2, V, 64)
        x = _graph_conv_relu(x, gc_w, gc_b, gso_t, gc_gb)   # (BB, .,   V, 16)
        x = _tconv_glu(x, tc2_w, tc2_b)                     # (BB, T-4, V, 64)
        x = _layer_norm_vc(x, ln_g, ln_b)                   # dropout = identity

    (oc_w, oc_b, oln_g, oln_b,
     fc1_w, fc1_b, fc2_w, fc2_b) = w[i:i + N_OUT_WEIGHTS]
    x = _tconv_glu(x, oc_w, oc_b)                           # (BB, 1, V, 128)
    x = _layer_norm_vc(x, oln_g, oln_b)
    bb, _, v, c = x.shape
    h = x[:, 0].reshape(bb * v, c)                          # (BB*V, 128)
    h = jnp.maximum(
        jnp.dot(h.astype(jnp.bfloat16), fc1_w[...],
                preferred_element_type=jnp.float32) + fc1_b[...], 0.0)
    y = jnp.dot(h.astype(jnp.bfloat16), fc2_w[...],
                preferred_element_type=jnp.float32) + fc2_b[...]    # (BB*V, 128pad)
    o_ref[...] = y.reshape(bb, v, y.shape[-1]).astype(o_ref.dtype)


# --------------------------------------------------------------------------
# pallas_call wrapper: one call for the whole network
# --------------------------------------------------------------------------

def _const_index_map(ndim):
    return lambda i: (0,) * ndim


def _grid_steps_for_batch(b):
    """v7x: 2 TensorCores -> one batch element per core (grid=(B,)).
    Single-TC chips (v5e/v6e): fold the whole batch into matmul rows (grid=(1,))."""
    try:
        kind = jax.devices()[0].device_kind.lower()
        n_cores = 2 if ("v7" in kind or "7x" in kind or "v4" in kind
                        or "v5p" in kind) else 1
    except Exception:
        n_cores = 1
    steps = min(b, n_cores)
    while steps > 1 and b % steps:
        steps -= 1
    return max(steps, 1)


def stgcn_apply(x, weights, out_pad):
    """x: (B, T, V, C0) f32; weights: ordered flat tuple; -> (B, V, out_pad)."""
    b, t, v, c0 = x.shape
    n_st = (len(weights) - N_OUT_WEIGHTS) // N_ST_WEIGHTS
    steps = _grid_steps_for_batch(b)
    bb = b // steps

    in_specs = [pl.BlockSpec((bb, t, v, c0), lambda i: (i, 0, 0, 0))]
    # Constant block indices -> each weight is DMA'd into VMEM exactly once.
    in_specs += [pl.BlockSpec(a.shape, _const_index_map(a.ndim)) for a in weights]

    return pl.pallas_call(
        functools.partial(_stgcn_fused_kernel, n_st),
        out_shape=jax.ShapeDtypeStruct((b, v, out_pad), x.dtype),
        grid=(steps,),
        in_specs=in_specs,
        out_specs=pl.BlockSpec((bb, v, out_pad), lambda i: (i, 0, 0)),
        compiler_params=pltpu.CompilerParams(
            dimension_semantics=("parallel",)),
    )(x, *weights)


# --------------------------------------------------------------------------
# Model glue (plain JAX: embedding concat, reshape tail)
# --------------------------------------------------------------------------

def stgcn_forward(params, c_in, n_vertex, pred_len,
                  x_enc, x_mark_enc, x_dec, x_mark_dec):
    del x_dec, x_mark_dec
    b, seq_len, _ = x_enc.shape
    x = x_enc.reshape(b, seq_len, n_vertex, c_in)          # NHWC = (B, T, V, C)
    # TODO(synk): DataEmbedding_only_time source unavailable; modeled as a linear
    # time-feature embedding to one channel, broadcast over vertices and
    # concatenated to the data channels (dropout identity in eval).
    te = x_mark_enc @ params["te_w"]                        # (B, T, 1)
    te = jnp.broadcast_to(te[:, :, None, :], (b, seq_len, n_vertex, 1))
    x = jnp.concatenate([x, te], axis=-1)                   # (B, T, V, c_in+1)

    out_dim = pred_len * c_in
    out_pad = _lane_pad(out_dim)
    y = stgcn_apply(x, params["flat_weights"], out_pad)     # (B, V, 128)
    y = y[:, :, :out_dim]                                   # strip lane padding

    # TODO(synk): reference forward() contains leftover debug code
    # (`print(x.shape); raise RuntimeError`); we run the intended reshape tail.
    y = y.reshape(b, n_vertex, pred_len, c_in)
    y = jnp.transpose(y, (0, 2, 1, 3))                      # (B, pred, V, c)
    return y.reshape(b, pred_len, n_vertex * c_in)


# --------------------------------------------------------------------------
# Deterministic parameter init (no checkpoint) + host-side weight fusion
# --------------------------------------------------------------------------

def init_params(key, c_in, n_vertex, seq_len, pred_len, n_mark):
    blocks = [[c_in + 1], [64, 16, 64], [64, 16, 64], [128, 64],
              [pred_len * c_in]]
    ko = seq_len - (len(blocks) - 3) * 2 * (KT - 1)
    assert ko > 0, "this script implements the Ko > 0 (OutputBlock) path"

    keys = iter(jax.random.split(key, 256))

    def u(shape, fan_in):
        bound = 1.0 / (fan_in ** 0.5)
        return jax.random.uniform(next(keys), shape, jnp.float32, -bound, bound)

    def fuse_tconv(kt, cin, cout):
        """P/Q GLU conv weights -> single (kt*cin, 2*cout) bf16 matmul weight."""
        wp = u((kt, cin, cout), cin * kt)
        wq = u((kt, cin, cout), cin * kt)
        bp = u((cout,), cin * kt)
        bq = u((cout,), cin * kt)
        w = jnp.concatenate([wp.reshape(kt * cin, cout),
                             wq.reshape(kt * cin, cout)], axis=1)
        b = jnp.concatenate([bp, bq]).reshape(1, 2 * cout)
        return w.astype(jnp.bfloat16), b

    params = {"te_w": u((n_mark, 1), n_mark)}

    flat = []
    last_c = blocks[0][-1]
    for _ in range(len(blocks) - 3):
        ch = blocks[1]                      # [64, 16, 64] for both ST blocks
        tc1_w, tc1_b = fuse_tconv(KT, last_c, ch[0])
        # Graph conv: align(aw,ab), channel weight (gw,gb), shift operator gso.
        # TODO(synk): Model passes graph_conv_type=None, gso=None; the graph-shift
        # operator is a deterministically initialized (V, V) matrix.
        aw = u((ch[0], ch[1]), ch[0])
        ab = u((ch[1],), ch[0])
        gw = u((ch[1], ch[1]), ch[1])
        gb = u((ch[1],), ch[1])
        gso = u((n_vertex, n_vertex), n_vertex)
        # Fold gw into the align matmul: one wide matmul gives [xa | xa@gw].
        gc_w = jnp.concatenate([aw, aw @ gw], axis=1).astype(jnp.bfloat16)
        gc_b = jnp.concatenate([ab, ab @ gw]).reshape(1, 2 * ch[1])
        gso_t = gso.T.astype(jnp.bfloat16)
        gc_gb = gb.reshape(1, ch[1])
        tc2_w, tc2_b = fuse_tconv(KT, ch[1], ch[2])
        ln_g = jnp.ones((n_vertex, ch[2]), jnp.float32)
        ln_b = jnp.zeros((n_vertex, ch[2]), jnp.float32)
        flat += [tc1_w, tc1_b, gc_w, gc_b, gso_t, gc_gb,
                 tc2_w, tc2_b, ln_g, ln_b]
        last_c = ch[-1]

    oc1, oc2, end = blocks[-2][0], blocks[-2][1], blocks[-1][0]
    oc_w, oc_b = fuse_tconv(ko, last_c, oc1)            # K = Ko*64 = 256
    end_pad = _lane_pad(end)                            # lane-dense output store
    fc2_w = jnp.zeros((oc2, end_pad), jnp.float32)
    fc2_w = fc2_w.at[:, :end].set(u((oc2, end), oc2)).astype(jnp.bfloat16)
    fc2_b = jnp.zeros((1, end_pad), jnp.float32).at[0, :end].set(u((end,), oc2))
    flat += [oc_w, oc_b,
             jnp.ones((n_vertex, oc1), jnp.float32),
             jnp.zeros((n_vertex, oc1), jnp.float32),
             u((oc1, oc2), oc1).astype(jnp.bfloat16),
             u((oc2,), oc1).reshape(1, oc2),
             fc2_w, fc2_b]

    params["flat_weights"] = tuple(flat)
    return params


# --------------------------------------------------------------------------

if __name__ == "__main__":
    B, SEQ_LEN, N_VERTEX, C_IN, PRED_LEN, N_MARK = 2, 12, 8, 2, 4, 4

    params = init_params(jax.random.PRNGKey(42),
                         C_IN, N_VERTEX, SEQ_LEN, PRED_LEN, N_MARK)

    k1, k2, k3, k4 = jax.random.split(jax.random.PRNGKey(0), 4)
    x_enc = jax.random.normal(k1, (B, SEQ_LEN, N_VERTEX * C_IN), jnp.float32)
    x_mark_enc = jax.random.normal(k2, (B, SEQ_LEN, N_MARK), jnp.float32)
    x_dec = jax.random.normal(k3, (B, PRED_LEN, N_VERTEX * C_IN), jnp.float32)
    x_mark_dec = jax.random.normal(k4, (B, PRED_LEN, N_MARK), jnp.float32)

    fwd = jax.jit(functools.partial(stgcn_forward, params,
                                    C_IN, N_VERTEX, PRED_LEN))
    out = jax.block_until_ready(fwd(x_enc, x_mark_enc, x_dec, x_mark_dec))

    assert out.shape == (B, PRED_LEN, N_VERTEX * C_IN), out.shape
    assert bool(jnp.all(jnp.isfinite(out)))
    print("KERNEL_OK")
</pallas_src>

<mosaic_0001>
module attributes {stable_mosaic.version = 11 : i64} {
  func.func @_stgcn_fused_kernel(%arg0: i32, %arg1: memref<2x12x8x3xf32, #tpu.memory_space<vmem>>, %arg2: memref<9x128xbf16, #tpu.memory_space<vmem>>, %arg3: memref<1x128xf32, #tpu.memory_space<vmem>>, %arg4: memref<64x32xbf16, #tpu.memory_space<vmem>>, %arg5: memref<1x32xf32, #tpu.memory_space<vmem>>, %arg6: memref<8x8xbf16, #tpu.memory_space<vmem>>, %arg7: memref<1x16xf32, #tpu.memory_space<vmem>>, %arg8: memref<48x128xbf16, #tpu.memory_space<vmem>>, %arg9: memref<1x128xf32, #tpu.memory_space<vmem>>, %arg10: memref<8x64xf32, #tpu.memory_space<vmem>>, %arg11: memref<8x64xf32, #tpu.memory_space<vmem>>, %arg12: memref<192x128xbf16, #tpu.memory_space<vmem>>, %arg13: memref<1x128xf32, #tpu.memory_space<vmem>>, %arg14: memref<64x32xbf16, #tpu.memory_space<vmem>>, %arg15: memref<1x32xf32, #tpu.memory_space<vmem>>, %arg16: memref<8x8xbf16, #tpu.memory_space<vmem>>, %arg17: memref<1x16xf32, #tpu.memory_space<vmem>>, %arg18: memref<48x128xbf16, #tpu.memory_space<vmem>>, %arg19: memref<1x128xf32, #tpu.memory_space<vmem>>, %arg20: memref<8x64xf32, #tpu.memory_space<vmem>>, %arg21: memref<8x64xf32, #tpu.memory_space<vmem>>, %arg22: memref<256x256xbf16, #tpu.memory_space<vmem>>, %arg23: memref<1x256xf32, #tpu.memory_space<vmem>>, %arg24: memref<8x128xf32, #tpu.memory_space<vmem>>, %arg25: memref<8x128xf32, #tpu.memory_space<vmem>>, %arg26: memref<128x64xbf16, #tpu.memory_space<vmem>>, %arg27: memref<1x64xf32, #tpu.memory_space<vmem>>, %arg28: memref<64x128xbf16, #tpu.memory_space<vmem>>, %arg29: memref<1x128xf32, #tpu.memory_space<vmem>>, %arg30: memref<2x8x128xf32, #tpu.memory_space<vmem>>) attributes {dimension_semantics = [#tpu.dimension_semantics<parallel>], iteration_bounds = array<i64: 1>, scalar_prefetch = 0 : i64, scratch_operands = 0 : i64, tpu.core_type = #tpu.core_type<tc>, window_params = [{transform_indices = @transform_0, window_bounds = array<i64: 2, 12, 8, 3>}, {pipeline_mode = #tpu.pipeline_mode<synchronous>, transform_indices = @transform_1, window_bounds = array<i64: 9, 128>}, {pipeline_mode = #tpu.pipeline_mode<synchronous>, transform_indices = @transform_2, window_bounds = array<i64: 1, 128>}, {pipeline_mode = #tpu.pipeline_mode<synchronous>, transform_indices = @transform_3, window_bounds = array<i64: 64, 32>}, {pipeline_mode = #tpu.pipeline_mode<synchronous>, transform_indices = @transform_4, window_bounds = array<i64: 1, 32>}, {pipeline_mode = #tpu.pipeline_mode<synchronous>, transform_indices = @transform_5, window_bounds = array<i64: 8, 8>}, {pipeline_mode = #tpu.pipeline_mode<synchronous>, transform_indices = @transform_6, window_bounds = array<i64: 1, 16>}, {pipeline_mode = #tpu.pipeline_mode<synchronous>, transform_indices = @transform_7, window_bounds = array<i64: 48, 128>}, {pipeline_mode = #tpu.pipeline_mode<synchronous>, transform_indices = @transform_8, window_bounds = array<i64: 1, 128>}, {pipeline_mode = #tpu.pipeline_mode<synchronous>, transform_indices = @transform_9, window_bounds = array<i64: 8, 64>}, {pipeline_mode = #tpu.pipeline_mode<synchronous>, transform_indices = @transform_10, window_bounds = array<i64: 8, 64>}, {pipeline_mode = #tpu.pipeline_mode<synchronous>, transform_indices = @transform_11, window_bounds = array<i64: 192, 128>}, {pipeline_mode = #tpu.pipeline_mode<synchronous>, transform_indices = @transform_12, window_bounds = array<i64: 1, 128>}, {pipeline_mode = #tpu.pipeline_mode<synchronous>, transform_indices = @transform_13, window_bounds = array<i64: 64, 32>}, {pipeline_mode = #tpu.pipeline_mode<synchronous>, transform_indices = @transform_14, window_bounds = array<i64: 1, 32>}, {pipeline_mode = #tpu.pipeline_mode<synchronous>, transform_indices = @transform_15, window_bounds = array<i64: 8, 8>}, {pipeline_mode = #tpu.pipeline_mode<synchronous>, transform_indices = @transform_16, window_bounds = array<i64: 1, 16>}, {pipeline_mode = #tpu.pipeline_mode<synchronous>, transform_indices = @transform_17, window_bounds = array<i64: 48, 128>}, {pipeline_mode = #tpu.pipeline_mode<synchronous>, transform_indices = @transform_18, window_bounds = array<i64: 1, 128>}, {pipeline_mode = #tpu.pipeline_mode<synchronous>, transform_indices = @transform_19, window_bounds = array<i64: 8, 64>}, {pipeline_mode = #tpu.pipeline_mode<synchronous>, transform_indices = @transform_20, window_bounds = array<i64: 8, 64>}, {pipeline_mode = #tpu.pipeline_mode<synchronous>, transform_indices = @transform_21, window_bounds = array<i64: 256, 256>}, {pipeline_mode = #tpu.pipeline_mode<synchronous>, transform_indices = @transform_22, window_bounds = array<i64: 1, 256>}, {pipeline_mode = #tpu.pipeline_mode<synchronous>, transform_indices = @transform_23, window_bounds = array<i64: 8, 128>}, {pipeline_mode = #tpu.pipeline_mode<synchronous>, transform_indices = @transform_24, window_bounds = array<i64: 8, 128>}, {pipeline_mode = #tpu.pipeline_mode<synchronous>, transform_indices = @transform_25, window_bounds = array<i64: 128, 64>}, {pipeline_mode = #tpu.pipeline_mode<synchronous>, transform_indices = @transform_26, window_bounds = array<i64: 1, 64>}, {pipeline_mode = #tpu.pipeline_mode<synchronous>, transform_indices = @transform_27, window_bounds = array<i64: 64, 128>}, {pipeline_mode = #tpu.pipeline_mode<synchronous>, transform_indices = @transform_28, window_bounds = array<i64: 1, 128>}, {transform_indices = @transform_29, window_bounds = array<i64: 2, 8, 128>}]} {
    %c0 = arith.constant 0 : index
    %c0_0 = arith.constant 0 : index
    %c0_1 = arith.constant 0 : index
    %c0_2 = arith.constant 0 : index
    %0 = vector.load %arg1[%c0, %c0_0, %c0_1, %c0_2] : memref<2x12x8x3xf32, #tpu.memory_space<vmem>>, vector<2x12x8x3xf32>
    %1 = vector.extract_strided_slice %0 {offsets = [0, 0, 0, 0], sizes = [2, 10, 8, 3], strides = [1, 1, 1, 1]} : vector<2x12x8x3xf32> to vector<2x10x8x3xf32>
    %2 = vector.extract_strided_slice %0 {offsets = [0, 1, 0, 0], sizes = [2, 10, 8, 3], strides = [1, 1, 1, 1]} : vector<2x12x8x3xf32> to vector<2x10x8x3xf32>
    %3 = vector.extract_strided_slice %0 {offsets = [0, 2, 0, 0], sizes = [2, 10, 8, 3], strides = [1, 1, 1, 1]} : vector<2x12x8x3xf32> to vector<2x10x8x3xf32>
    %4 = tpu.concatenate %1, %2, %3 in 3 : vector<2x10x8x3xf32>, vector<2x10x8x3xf32>, vector<2x10x8x3xf32> -> vector<2x10x8x9xf32>
    %5 = vector.shape_cast %4 : vector<2x10x8x9xf32> to vector<160x9xf32>
    %6 = arith.truncf %5 : vector<160x9xf32> to vector<160x9xbf16>
    %c0_3 = arith.constant 0 : index
    %c0_4 = arith.constant 0 : index
    %7 = vector.load %arg2[%c0_3, %c0_4] : memref<9x128xbf16, #tpu.memory_space<vmem>>, vector<9x128xbf16>
    %cst = arith.constant dense<0.000000e+00> : vector<160x128xf32>
    %8 = tpu.matmul %6, %7, %cst {dimension_numbers = #tpu.dot_dimension_numbers<[1], [0], [0], [1], [0, 0, 1, 1], [], []>} : vector<160x9xbf16>, vector<9x128xbf16>, vector<160x128xf32> -> vector<160x128xf32>
    %c0_5 = arith.constant 0 : index
    %c0_6 = arith.constant 0 : index
    %9 = vector.load %arg3[%c0_5, %c0_6] : memref<1x128xf32, #tpu.memory_space<vmem>>, vector<1x128xf32>
    %10 = vector.broadcast %9 : vector<1x128xf32> to vector<160x128xf32>
    %11 = arith.addf %8, %10 : vector<160x128xf32>
    %12 = vector.extract_strided_slice %11 {offsets = [0, 0], sizes = [160, 64], strides = [1, 1]} : vector<160x128xf32> to vector<160x64xf32>
    %13 = vector.extract_strided_slice %11 {offsets = [0, 64], sizes = [160, 64], strides = [1, 1]} : vector<160x128xf32> to vector<160x64xf32>
    %14 = vector.extract_strided_slice %0 {offsets = [0, 2, 0, 0], sizes = [2, 10, 8, 3], strides = [1, 1, 1, 1]} : vector<2x12x8x3xf32> to vector<2x10x8x3xf32>
    %15 = vector.shape_cast %14 : vector<2x10x8x3xf32> to vector<160x3xf32>
    %cst_7 = arith.constant 0.000000e+00 : f32
    %16 = vector.broadcast %cst_7 : f32 to vector<160x61xf32>
    %17 = tpu.concatenate %15, %16 in 1 : vector<160x3xf32>, vector<160x61xf32> -> vector<160x64xf32>
    %18 = arith.addf %12, %17 : vector<160x64xf32>
    %19 = arith.negf %13 : vector<160x64xf32>
    %20 = math.exp %19 : vector<160x64xf32>
    %cst_8 = arith.constant 1.000000e+00 : f32
    %21 = vector.broadcast %cst_8 : f32 to vector<160x64xf32>
    %22 = arith.addf %21, %20 : vector<160x64xf32>
    %23 = arith.divf %21, %22 : vector<160x64xf32>
    %24 = arith.mulf %18, %23 : vector<160x64xf32>
    %25 = vector.shape_cast %24 : vector<160x64xf32> to vector<2x10x8x64xf32>
    %26 = vector.shape_cast %25 : vector<2x10x8x64xf32> to vector<160x64xf32>
    %27 = arith.truncf %26 : vector<160x64xf32> to vector<160x64xbf16>
    %c0_9 = arith.constant 0 : index
    %c0_10 = arith.constant 0 : index
    %28 = vector.load %arg4[%c0_9, %c0_10] : memref<64x32xbf16, #tpu.memory_space<vmem>>, vector<64x32xbf16>
    %cst_11 = arith.constant dense<0.000000e+00> : vector<160x32xf32>
    %29 = tpu.matmul %27, %28, %cst_11 {dimension_numbers = #tpu.dot_dimension_numbers<[1], [0], [0], [1], [0, 0, 1, 1], [], []>} : vector<160x64xbf16>, vector<64x32xbf16>, vector<160x32xf32> -> vector<160x32xf32>
    %c0_12 = arith.constant 0 : index
    %c0_13 = arith.constant 0 : index
    %30 = vector.load %arg5[%c0_12, %c0_13] : memref<1x32xf32, #tpu.memory_space<vmem>>, vector<1x32xf32>
    %31 = vector.broadcast %30 : vector<1x32xf32> to vector<160x32xf32>
    %32 = arith.addf %29, %31 : vector<160x32xf32>
    %33 = vector.extract_strided_slice %32 {offsets = [0, 0], sizes = [160, 16], strides = [1, 1]} : vector<160x32xf32> to vector<160x16xf32>
    %34 = vector.extract_strided_slice %32 {offsets = [0, 16], sizes = [160, 16], strides = [1, 1]} : vector<160x32xf32> to vector<160x16xf32>
    %35 = vector.shape_cast %34 : vector<160x16xf32> to vector<20x8x16xf32>
    %36 = tpu.transpose %35, [0, 2, 1] : vector<20x8x16xf32> -> vector<20x16x8xf32>
    %37 = vector.shape_cast %36 : vector<20x16x8xf32> to vector<320x8xf32>
    %38 = arith.truncf %37 : vector<320x8xf32> to vector<320x8xbf16>
    %c0_14 = arith.constant 0 : index
    %c0_15 = arith.constant 0 : index
    %39 = vector.load %arg6[%c0_14, %c0_15] : memref<8x8xbf16, #tpu.memory_space<vmem>>, vector<8x8xbf16>
    %cst_16 = arith.constant dense<0.000000e+00> : vector<320x8xf32>
    %40 = tpu.matmul %38, %39, %cst_16 {dimension_numbers = #tpu.dot_dimension_numbers<[1], [0], [0], [1], [0, 0, 1, 1], [], []>} : vector<320x8xbf16>, vector<8x8xbf16>, vector<320x8xf32> -> vector<320x8xf32>
    %41 = vector.shape_cast %40 : vector<320x8xf32> to vector<20x16x8xf32>
    %42 = tpu.transpose %41, [0, 2, 1] : vector<20x16x8xf32> -> vector<20x8x16xf32>
    %43 = vector.shape_cast %42 : vector<20x8x16xf32> to vector<160x16xf32>
    %c0_17 = arith.constant 0 : index
    %c0_18 = arith.constant 0 : index
    %44 = vector.load %arg7[%c0_17, %c0_18] : memref<1x16xf32, #tpu.memory_space<vmem>>, vector<1x16xf32>
    %45 = vector.broadcast %44 : vector<1x16xf32> to vector<160x16xf32>
    %46 = arith.addf %43, %45 : vector<160x16xf32>
    %47 = arith.addf %46, %33 : vector<160x16xf32>
    %cst_19 = arith.constant 0.000000e+00 : f32
    %48 = vector.broadcast %cst_19 : f32 to vector<160x16xf32>
    %49 = arith.maximumf %47, %48 : vector<160x16xf32>
    %50 = vector.shape_cast %49 : vector<160x16xf32> to vector<2x10x8x16xf32>
    %51 = vector.extract_strided_slice %50 {offsets = [0, 0, 0, 0], sizes = [2, 8, 8, 16], strides = [1, 1, 1, 1]} : vector<2x10x8x16xf32> to vector<2x8x8x16xf32>
    %52 = vector.extract_strided_slice %50 {offsets = [0, 1, 0, 0], sizes = [2, 8, 8, 16], strides = [1, 1, 1, 1]} : vector<2x10x8x16xf32> to vector<2x8x8x16xf32>
    %53 = vector.extract_strided_slice %50 {offsets = [0, 2, 0, 0], sizes = [2, 8, 8, 16], strides = [1, 1, 1, 1]} : vector<2x10x8x16xf32> to vector<2x8x8x16xf32>
    %54 = tpu.concatenate %51, %52, %53 in 3 : vector<2x8x8x16xf32>, vector<2x8x8x16xf32>, vector<2x8x8x16xf32> -> vector<2x8x8x48xf32>
    %55 = vector.shape_cast %54 : vector<2x8x8x48xf32> to vector<128x48xf32>
    %56 = arith.truncf %55 : vector<128x48xf32> to vector<128x48xbf16>
    %c0_20 = arith.constant 0 : index
    %c0_21 = arith.constant 0 : index
    %57 = vector.load %arg8[%c0_20, %c0_21] : memref<48x128xbf16, #tpu.memory_space<vmem>>, vector<48x128xbf16>
    %cst_22 = arith.constant dense<0.000000e+00> : vector<128x128xf32>
    %58 = tpu.matmul %56, %57, %cst_22 {dimension_numbers = #tpu.dot_dimension_numbers<[1], [0], [0], [1], [0, 0, 1, 1], [], []>} : vector<128x48xbf16>, vector<48x128xbf16>, vector<128x128xf32> -> vector<128x128xf32>
    %c0_23 = arith.constant 0 : index
    %c0_24 = arith.constant 0 : index
    %59 = vector.load %arg9[%c0_23, %c0_24] : memref<1x128xf32, #tpu.memory_space<vmem>>, vector<1x128xf32>
    %60 = vector.broadcast %59 : vector<1x128xf32> to vector<128x128xf32>
    %61 = arith.addf %58, %60 : vector<128x128xf32>
    %62 = vector.extract_strided_slice %61 {offsets = [0, 0], sizes = [128, 64], strides = [1, 1]} : vector<128x128xf32> to vector<128x64xf32>
    %63 = vector.extract_strided_slice %61 {offsets = [0, 64], sizes = [128, 64], strides = [1, 1]} : vector<128x128xf32> to vector<128x64xf32>
    %64 = vector.extract_strided_slice %50 {offsets = [0, 2, 0, 0], sizes = [2, 8, 8, 16], strides = [1, 1, 1, 1]} : vector<2x10x8x16xf32> to vector<2x8x8x16xf32>
    %65 = vector.shape_cast %64 : vector<2x8x8x16xf32> to vector<128x16xf32>
    %cst_25 = arith.constant 0.000000e+00 : f32
    %66 = vector.broadcast %cst_25 : f32 to vector<128x48xf32>
    %67 = tpu.concatenate %65, %66 in 1 : vector<128x16xf32>, vector<128x48xf32> -> vector<128x64xf32>
    %68 = arith.addf %62, %67 : vector<128x64xf32>
    %69 = arith.negf %63 : vector<128x64xf32>
    %70 = math.exp %69 : vector<128x64xf32>
    %cst_26 = arith.constant 1.000000e+00 : f32
    %71 = vector.broadcast %cst_26 : f32 to vector<128x64xf32>
    %72 = arith.addf %71, %70 : vector<128x64xf32>
    %73 = arith.divf %71, %72 : vector<128x64xf32>
    %74 = arith.mulf %68, %73 : vector<128x64xf32>
    %75 = vector.shape_cast %74 : vector<128x64xf32> to vector<2x8x8x64xf32>
    %cst_27 = arith.constant dense<0.000000e+00> : vector<2x8x8xf32>
    %76 = vector.multi_reduction <add>, %75, %cst_27 [3] : vector<2x8x8x64xf32> to vector<2x8x8xf32>
    %77 = vector.shape_cast %76 : vector<2x8x8xf32> to vector<2x8x8x1xf32>
    %cst_28 = arith.constant dense<0.000000e+00> : vector<2x8x1xf32>
    %78 = vector.multi_reduction <add>, %77, %cst_28 [2] : vector<2x8x8x1xf32> to vector<2x8x1xf32>
    %79 = vector.shape_cast %78 : vector<2x8x1xf32> to vector<2x8x1x1xf32>
    %80 = arith.mulf %75, %75 : vector<2x8x8x64xf32>
    %cst_29 = arith.constant dense<0.000000e+00> : vector<2x8x8xf32>
    %81 = vector.multi_reduction <add>, %80, %cst_29 [3] : vector<2x8x8x64xf32> to vector<2x8x8xf32>
    %82 = vector.shape_cast %81 : vector<2x8x8xf32> to vector<2x8x8x1xf32>
    %cst_30 = arith.constant dense<0.000000e+00> : vector<2x8x1xf32>
    %83 = vector.multi_reduction <add>, %82, %cst_30 [2] : vector<2x8x8x1xf32> to vector<2x8x1xf32>
    %84 = vector.shape_cast %83 : vector<2x8x1xf32> to vector<2x8x1x1xf32>
    %cst_31 = arith.constant 5.120000e+02 : f32
    %85 = vector.broadcast %cst_31 : f32 to vector<2x8x1x1xf32>
    %86 = arith.divf %79, %85 : vector<2x8x1x1xf32>
    %cst_32 = arith.constant 5.120000e+02 : f32
    %87 = vector.broadcast %cst_32 : f32 to vector<2x8x1x1xf32>
    %88 = arith.divf %84, %87 : vector<2x8x1x1xf32>
    %89 = arith.mulf %86, %86 : vector<2x8x1x1xf32>
    %90 = arith.subf %88, %89 : vector<2x8x1x1xf32>
    %91 = vector.broadcast %86 : vector<2x8x1x1xf32> to vector<2x8x8x64xf32>
    %92 = arith.subf %75, %91 : vector<2x8x8x64xf32>
    %cst_33 = arith.constant 9.99999974E-6 : f32
    %93 = vector.broadcast %cst_33 : f32 to vector<2x8x1x1xf32>
    %94 = arith.addf %90, %93 : vector<2x8x1x1xf32>
    %95 = math.rsqrt %94 : vector<2x8x1x1xf32>
    %96 = vector.broadcast %95 : vector<2x8x1x1xf32> to vector<2x8x8x64xf32>
    %97 = arith.mulf %92, %96 : vector<2x8x8x64xf32>
    %c0_34 = arith.constant 0 : index
    %c0_35 = arith.constant 0 : index
    %98 = vector.load %arg10[%c0_34, %c0_35] : memref<8x64xf32, #tpu.memory_space<vmem>>, vector<8x64xf32>
    %99 = vector.shape_cast %98 : vector<8x64xf32> to vector<1x1x8x64xf32>
    %100 = vector.broadcast %99 : vector<1x1x8x64xf32> to vector<2x8x8x64xf32>
    %101 = arith.mulf %97, %100 : vector<2x8x8x64xf32>
    %c0_36 = arith.constant 0 : index
    %c0_37 = arith.constant 0 : index
    %102 = vector.load %arg11[%c0_36, %c0_37] : memref<8x64xf32, #tpu.memory_space<vmem>>, vector<8x64xf32>
    %103 = vector.shape_cast %102 : vector<8x64xf32> to vector<1x1x8x64xf32>
    %104 = vector.broadcast %103 : vector<1x1x8x64xf32> to vector<2x8x8x64xf32>
    %105 = arith.addf %101, %104 : vector<2x8x8x64xf32>
    %106 = vector.extract_strided_slice %105 {offsets = [0, 0, 0, 0], sizes = [2, 6, 8, 64], strides = [1, 1, 1, 1]} : vector<2x8x8x64xf32> to vector<2x6x8x64xf32>
    %107 = vector.extract_strided_slice %105 {offsets = [0, 1, 0, 0], sizes = [2, 6, 8, 64], strides = [1, 1, 1, 1]} : vector<2x8x8x64xf32> to vector<2x6x8x64xf32>
    %108 = vector.extract_strided_slice %105 {offsets = [0, 2, 0, 0], sizes = [2, 6, 8, 64], strides = [1, 1, 1, 1]} : vector<2x8x8x64xf32> to vector<2x6x8x64xf32>
    %109 = tpu.concatenate %106, %107, %108 in 3 : vector<2x6x8x64xf32>, vector<2x6x8x64xf32>, vector<2x6x8x64xf32> -> vector<2x6x8x192xf32>
    %110 = vector.shape_cast %109 : vector<2x6x8x192xf32> to vector<96x192xf32>
    %111 = arith.truncf %110 : vector<96x192xf32> to vector<96x192xbf16>
    %c0_38 = arith.constant 0 : index
    %c0_39 = arith.constant 0 : index
    %112 = vector.load %arg12[%c0_38, %c0_39] : memref<192x128xbf16, #tpu.memory_space<vmem>>, vector<192x128xbf16>
    %cst_40 = arith.constant dense<0.000000e+00> : vector<96x128xf32>
    %113 = tpu.matmul %111, %112, %cst_40 {dimension_numbers = #tpu.dot_dimension_numbers<[1], [0], [0], [1], [0, 0, 1, 1], [], []>} : vector<96x192xbf16>, vector<192x128xbf16>, vector<96x128xf32> -> vector<96x128xf32>
    %c0_41 = arith.constant 0 : index
    %c0_42 = arith.constant 0 : index
    %114 = vector.load %arg13[%c0_41, %c0_42] : memref<1x128xf32, #tpu.memory_space<vmem>>, vector<1x128xf32>
    %115 = vector.broadcast %114 : vector<1x128xf32> to vector<96x128xf32>
    %116 = arith.addf %113, %115 : vector<96x128xf32>
    %117 = vector.extract_strided_slice %116 {offsets = [0, 0], sizes = [96, 64], strides = [1, 1]} : vector<96x128xf32> to vector<96x64xf32>
    %118 = vector.extract_strided_slice %116 {offsets = [0, 64], sizes = [96, 64], strides = [1, 1]} : vector<96x128xf32> to vector<96x64xf32>
    %119 = vector.extract_strided_slice %105 {offsets = [0, 2, 0, 0], sizes = [2, 6, 8, 64], strides = [1, 1, 1, 1]} : vector<2x8x8x64xf32> to vector<2x6x8x64xf32>
    %120 = vector.shape_cast %119 : vector<2x6x8x64xf32> to vector<96x64xf32>
    %121 = arith.addf %117, %120 : vector<96x64xf32>
    %122 = arith.negf %118 : vector<96x64xf32>
    %123 = math.exp %122 : vector<96x64xf32>
    %cst_43 = arith.constant 1.000000e+00 : f32
    %124 = vector.broadcast %cst_43 : f32 to vector<96x64xf32>
    %125 = arith.addf %124, %123 : vector<96x64xf32>
    %126 = arith.divf %124, %125 : vector<96x64xf32>
    %127 = arith.mulf %121, %126 : vector<96x64xf32>
    %128 = vector.shape_cast %127 : vector<96x64xf32> to vector<2x6x8x64xf32>
    %129 = vector.shape_cast %128 : vector<2x6x8x64xf32> to vector<96x64xf32>
    %130 = arith.truncf %129 : vector<96x64xf32> to vector<96x64xbf16>
    %c0_44 = arith.constant 0 : index
    %c0_45 = arith.constant 0 : index
    %131 = vector.load %arg14[%c0_44, %c0_45] : memref<64x32xbf16, #tpu.memory_space<vmem>>, vector<64x32xbf16>
    %cst_46 = arith.constant dense<0.000000e+00> : vector<96x32xf32>
    %132 = tpu.matmul %130, %131, %cst_46 {dimension_numbers = #tpu.dot_dimension_numbers<[1], [0], [0], [1], [0, 0, 1, 1], [], []>} : vector<96x64xbf16>, vector<64x32xbf16>, vector<96x32xf32> -> vector<96x32xf32>
    %c0_47 = arith.constant 0 : index
    %c0_48 = arith.constant 0 : index
    %133 = vector.load %arg15[%c0_47, %c0_48] : memref<1x32xf32, #tpu.memory_space<vmem>>, vector<1x32xf32>
    %134 = vector.broadcast %133 : vector<1x32xf32> to vector<96x32xf32>
    %135 = arith.addf %132, %134 : vector<96x32xf32>
    %136 = vector.extract_strided_slice %135 {offsets = [0, 0], sizes = [96, 16], strides = [1, 1]} : vector<96x32xf32> to vector<96x16xf32>
    %137 = vector.extract_strided_slice %135 {offsets = [0, 16], sizes = [96, 16], strides = [1, 1]} : vector<96x32xf32> to vector<96x16xf32>
    %138 = vector.shape_cast %137 : vector<96x16xf32> to vector<12x8x16xf32>
    %139 = tpu.transpose %138, [0, 2, 1] : vector<12x8x16xf32> -> vector<12x16x8xf32>
    %140 = vector.shape_cast %139 : vector<12x16x8xf32> to vector<192x8xf32>
    %141 = arith.truncf %140 : vector<192x8xf32> to vector<192x8xbf16>
    %c0_49 = arith.constant 0 : index
    %c0_50 = arith.constant 0 : index
    %142 = vector.load %arg16[%c0_49, %c0_50] : memref<8x8xbf16, #tpu.memory_space<vmem>>, vector<8x8xbf16>
    %cst_51 = arith.constant dense<0.000000e+00> : vector<192x8xf32>
    %143 = tpu.matmul %141, %142, %cst_51 {dimension_numbers = #tpu.dot_dimension_numbers<[1], [0], [0], [1], [0, 0, 1, 1], [], []>} : vector<192x8xbf16>, vector<8x8xbf16>, vector<192x8xf32> -> vector<192x8xf32>
    %144 = vector.shape_cast %143 : vector<192x8xf32> to vector<12x16x8xf32>
    %145 = tpu.transpose %144, [0, 2, 1] : vector<12x16x8xf32> -> vector<12x8x16xf32>
    %146 = vector.shape_cast %145 : vector<12x8x16xf32> to vector<96x16xf32>
    %c0_52 = arith.constant 0 : index
    %c0_53 = arith.constant 0 : index
    %147 = vector.load %arg17[%c0_52, %c0_53] : memref<1x16xf32, #tpu.memory_space<vmem>>, vector<1x16xf32>
    %148 = vector.broadcast %147 : vector<1x16xf32> to vector<96x16xf32>
    %149 = arith.addf %146, %148 : vector<96x16xf32>
    %150 = arith.addf %149, %136 : vector<96x16xf32>
    %cst_54 = arith.constant 0.000000e+00 : f32
    %151 = vector.broadcast %cst_54 : f32 to vector<96x16xf32>
    %152 = arith.maximumf %150, %151 : vector<96x16xf32>
    %153 = vector.shape_cast %152 : vector<96x16xf32> to vector<2x6x8x16xf32>
    %154 = vector.extract_strided_slice %153 {offsets = [0, 0, 0, 0], sizes = [2, 4, 8, 16], strides = [1, 1, 1, 1]} : vector<2x6x8x16xf32> to vector<2x4x8x16xf32>
    %155 = vector.extract_strided_slice %153 {offsets = [0, 1, 0, 0], sizes = [2, 4, 8, 16], strides = [1, 1, 1, 1]} : vector<2x6x8x16xf32> to vector<2x4x8x16xf32>
    %156 = vector.extract_strided_slice %153 {offsets = [0, 2, 0, 0], sizes = [2, 4, 8, 16], strides = [1, 1, 1, 1]} : vector<2x6x8x16xf32> to vector<2x4x8x16xf32>
    %157 = tpu.concatenate %154, %155, %156 in 3 : vector<2x4x8x16xf32>, vector<2x4x8x16xf32>, vector<2x4x8x16xf32> -> vector<2x4x8x48xf32>
    %158 = vector.shape_cast %157 : vector<2x4x8x48xf32> to vector<64x48xf32>
    %159 = arith.truncf %158 : vector<64x48xf32> to vector<64x48xbf16>
    %c0_55 = arith.constant 0 : index
    %c0_56 = arith.constant 0 : index
    %160 = vector.load %arg18[%c0_55, %c0_56] : memref<48x128xbf16, #tpu.memory_space<vmem>>, vector<48x128xbf16>
    %cst_57 = arith.constant dense<0.000000e+00> : vector<64x128xf32>
    %161 = tpu.matmul %159, %160, %cst_57 {dimension_numbers = #tpu.dot_dimension_numbers<[1], [0], [0], [1], [0, 0, 1, 1], [], []>} : vector<64x48xbf16>, vector<48x128xbf16>, vector<64x128xf32> -> vector<64x128xf32>
    %c0_58 = arith.constant 0 : index
    %c0_59 = arith.constant 0 : index
    %162 = vector.load %arg19[%c0_58, %c0_59] : memref<1x128xf32, #tpu.memory_space<vmem>>, vector<1x128xf32>
    %163 = vector.broadcast %162 : vector<1x128xf32> to vector<64x128xf32>
    %164 = arith.addf %161, %163 : vector<64x128xf32>
    %165 = vector.extract_strided_slice %164 {offsets = [0, 0], sizes = [64, 64], strides = [1, 1]} : vector<64x128xf32> to vector<64x64xf32>
    %166 = vector.extract_strided_slice %164 {offsets = [0, 64], sizes = [64, 64], strides = [1, 1]} : vector<64x128xf32> to vector<64x64xf32>
    %167 = vector.extract_strided_slice %153 {offsets = [0, 2, 0, 0], sizes = [2, 4, 8, 16], strides = [1, 1, 1, 1]} : vector<2x6x8x16xf32> to vector<2x4x8x16xf32>
    %168 = vector.shape_cast %167 : vector<2x4x8x16xf32> to vector<64x16xf32>
    %cst_60 = arith.constant 0.000000e+00 : f32
    %169 = vector.broadcast %cst_60 : f32 to vector<64x48xf32>
    %170 = tpu.concatenate %168, %169 in 1 : vector<64x16xf32>, vector<64x48xf32> -> vector<64x64xf32>
    %171 = arith.addf %165, %170 : vector<64x64xf32>
    %172 = arith.negf %166 : vector<64x64xf32>
    %173 = math.exp %172 : vector<64x64xf32>
    %cst_61 = arith.constant 1.000000e+00 : f32
    %174 = vector.broadcast %cst_61 : f32 to vector<64x64xf32>
    %175 = arith.addf %174, %173 : vector<64x64xf32>
    %176 = arith.divf %174, %175 : vector<64x64xf32>
    %177 = arith.mulf %171, %176 : vector<64x64xf32>
    %178 = vector.shape_cast %177 : vector<64x64xf32> to vector<2x4x8x64xf32>
    %cst_62 = arith.constant dense<0.000000e+00> : vector<2x4x8xf32>
    %179 = vector.multi_reduction <add>, %178, %cst_62 [3] : vector<2x4x8x64xf32> to vector<2x4x8xf32>
    %180 = vector.shape_cast %179 : vector<2x4x8xf32> to vector<2x4x8x1xf32>
    %cst_63 = arith.constant dense<0.000000e+00> : vector<2x4x1xf32>
    %181 = vector.multi_reduction <add>, %180, %cst_63 [2] : vector<2x4x8x1xf32> to vector<2x4x1xf32>
    %182 = vector.shape_cast %181 : vector<2x4x1xf32> to vector<2x4x1x1xf32>
    %183 = arith.mulf %178, %178 : vector<2x4x8x64xf32>
    %cst_64 = arith.constant dense<0.000000e+00> : vector<2x4x8xf32>
    %184 = vector.multi_reduction <add>, %183, %cst_64 [3] : vector<2x4x8x64xf32> to vector<2x4x8xf32>
    %185 = vector.shape_cast %184 : vector<2x4x8xf32> to vector<2x4x8x1xf32>
    %cst_65 = arith.constant dense<0.000000e+00> : vector<2x4x1xf32>
    %186 = vector.multi_reduction <add>, %185, %cst_65 [2] : vector<2x4x8x1xf32> to vector<2x4x1xf32>
    %187 = vector.shape_cast %186 : vector<2x4x1xf32> to vector<2x4x1x1xf32>
    %cst_66 = arith.constant 5.120000e+02 : f32
    %188 = vector.broadcast %cst_66 : f32 to vector<2x4x1x1xf32>
    %189 = arith.divf %182, %188 : vector<2x4x1x1xf32>
    %cst_67 = arith.constant 5.120000e+02 : f32
    %190 = vector.broadcast %cst_67 : f32 to vector<2x4x1x1xf32>
    %191 = arith.divf %187, %190 : vector<2x4x1x1xf32>
    %192 = arith.mulf %189, %189 : vector<2x4x1x1xf32>
    %193 = arith.subf %191, %192 : vector<2x4x1x1xf32>
    %194 = vector.broadcast %189 : vector<2x4x1x1xf32> to vector<2x4x8x64xf32>
    %195 = arith.subf %178, %194 : vector<2x4x8x64xf32>
    %cst_68 = arith.constant 9.99999974E-6 : f32
    %196 = vector.broadcast %cst_68 : f32 to vector<2x4x1x1xf32>
    %197 = arith.addf %193, %196 : vector<2x4x1x1xf32>
    %198 = math.rsqrt %197 : vector<2x4x1x1xf32>
    %199 = vector.broadcast %198 : vector<2x4x1x1xf32> to vector<2x4x8x64xf32>
    %200 = arith.mulf %195, %199 : vector<2x4x8x64xf32>
    %c0_69 = arith.constant 0 : index
    %c0_70 = arith.constant 0 : index
    %201 = vector.load %arg20[%c0_69, %c0_70] : memref<8x64xf32, #tpu.memory_space<vmem>>, vector<8x64xf32>
    %202 = vector.shape_cast %201 : vector<8x64xf32> to vector<1x1x8x64xf32>
    %203 = vector.broadcast %202 : vector<1x1x8x64xf32> to vector<2x4x8x64xf32>
    %204 = arith.mulf %200, %203 : vector<2x4x8x64xf32>
    %c0_71 = arith.constant 0 : index
    %c0_72 = arith.constant 0 : index
    %205 = vector.load %arg21[%c0_71, %c0_72] : memref<8x64xf32, #tpu.memory_space<vmem>>, vector<8x64xf32>
    %206 = vector.shape_cast %205 : vector<8x64xf32> to vector<1x1x8x64xf32>
    %207 = vector.broadcast %206 : vector<1x1x8x64xf32> to vector<2x4x8x64xf32>
    %208 = arith.addf %204, %207 : vector<2x4x8x64xf32>
    %209 = vector.extract_strided_slice %208 {offsets = [0, 0, 0, 0], sizes = [2, 1, 8, 64], strides = [1, 1, 1, 1]} : vector<2x4x8x64xf32> to vector<2x1x8x64xf32>
    %210 = vector.extract_strided_slice %208 {offsets = [0, 1, 0, 0], sizes = [2, 1, 8, 64], strides = [1, 1, 1, 1]} : vector<2x4x8x64xf32> to vector<2x1x8x64xf32>
    %211 = vector.extract_strided_slice %208 {offsets = [0, 2, 0, 0], sizes = [2, 1, 8, 64], strides = [1, 1, 1, 1]} : vector<2x4x8x64xf32> to vector<2x1x8x64xf32>
    %212 = vector.extract_strided_slice %208 {offsets = [0, 3, 0, 0], sizes = [2, 1, 8, 64], strides = [1, 1, 1, 1]} : vector<2x4x8x64xf32> to vector<2x1x8x64xf32>
    %213 = tpu.concatenate %209, %210, %211, %212 in 3 : vector<2x1x8x64xf32>, vector<2x1x8x64xf32>, vector<2x1x8x64xf32>, vector<2x1x8x64xf32> -> vector<2x1x8x256xf32>
    %214 = vector.shape_cast %213 : vector<2x1x8x256xf32> to vector<16x256xf32>
    %215 = arith.truncf %214 : vector<16x256xf32> to vector<16x256xbf16>
    %c0_73 = arith.constant 0 : index
    %c0_74 = arith.constant 0 : index
    %216 = vector.load %arg22[%c0_73, %c0_74] : memref<256x256xbf16, #tpu.memory_space<vmem>>, vector<256x256xbf16>
    %cst_75 = arith.constant dense<0.000000e+00> : vector<16x256xf32>
    %217 = tpu.matmul %215, %216, %cst_75 {dimension_numbers = #tpu.dot_dimension_numbers<[1], [0], [0], [1], [0, 0, 1, 1], [], []>} : vector<16x256xbf16>, vector<256x256xbf16>, vector<16x256xf32> -> vector<16x256xf32>
    %c0_76 = arith.constant 0 : index
    %c0_77 = arith.constant 0 : index
    %218 = vector.load %arg23[%c0_76, %c0_77] : memref<1x256xf32, #tpu.memory_space<vmem>>, vector<1x256xf32>
    %219 = vector.broadcast %218 : vector<1x256xf32> to vector<16x256xf32>
    %220 = arith.addf %217, %219 : vector<16x256xf32>
    %221 = vector.extract_strided_slice %220 {offsets = [0, 0], sizes = [16, 128], strides = [1, 1]} : vector<16x256xf32> to vector<16x128xf32>
    %222 = vector.extract_strided_slice %220 {offsets = [0, 128], sizes = [16, 128], strides = [1, 1]} : vector<16x256xf32> to vector<16x128xf32>
    %223 = vector.extract_strided_slice %208 {offsets = [0, 3, 0, 0], sizes = [2, 1, 8, 64], strides = [1, 1, 1, 1]} : vector<2x4x8x64xf32> to vector<2x1x8x64xf32>
    %224 = vector.shape_cast %223 : vector<2x1x8x64xf32> to vector<16x64xf32>
    %cst_78 = arith.constant 0.000000e+00 : f32
    %225 = vector.broadcast %cst_78 : f32 to vector<16x64xf32>
    %226 = tpu.concatenate %224, %225 in 1 : vector<16x64xf32>, vector<16x64xf32> -> vector<16x128xf32>
    %227 = arith.addf %221, %226 : vector<16x128xf32>
    %228 = arith.negf %222 : vector<16x128xf32>
    %229 = math.exp %228 : vector<16x128xf32>
    %cst_79 = arith.constant 1.000000e+00 : f32
    %230 = vector.broadcast %cst_79 : f32 to vector<16x128xf32>
    %231 = arith.addf %230, %229 : vector<16x128xf32>
    %232 = arith.divf %230, %231 : vector<16x128xf32>
    %233 = arith.mulf %227, %232 : vector<16x128xf32>
    %234 = vector.shape_cast %233 : vector<16x128xf32> to vector<2x1x8x128xf32>
    %cst_80 = arith.constant dense<0.000000e+00> : vector<2x1x8xf32>
    %235 = vector.multi_reduction <add>, %234, %cst_80 [3] : vector<2x1x8x128xf32> to vector<2x1x8xf32>
    %236 = vector.shape_cast %235 : vector<2x1x8xf32> to vector<2x1x8x1xf32>
    %cst_81 = arith.constant dense<0.000000e+00> : vector<2x1x1xf32>
    %237 = vector.multi_reduction <add>, %236, %cst_81 [2] : vector<2x1x8x1xf32> to vector<2x1x1xf32>
    %238 = vector.shape_cast %237 : vector<2x1x1xf32> to vector<2x1x1x1xf32>
    %239 = arith.mulf %234, %234 : vector<2x1x8x128xf32>
    %cst_82 = arith.constant dense<0.000000e+00> : vector<2x1x8xf32>
    %240 = vector.multi_reduction <add>, %239, %cst_82 [3] : vector<2x1x8x128xf32> to vector<2x1x8xf32>
    %241 = vector.shape_cast %240 : vector<2x1x8xf32> to vector<2x1x8x1xf32>
    %cst_83 = arith.constant dense<0.000000e+00> : vector<2x1x1xf32>
    %242 = vector.multi_reduction <add>, %241, %cst_83 [2] : vector<2x1x8x1xf32> to vector<2x1x1xf32>
    %243 = vector.shape_cast %242 : vector<2x1x1xf32> to vector<2x1x1x1xf32>
    %cst_84 = arith.constant 1.024000e+03 : f32
    %244 = vector.broadcast %cst_84 : f32 to vector<2x1x1x1xf32>
    %245 = arith.divf %238, %244 : vector<2x1x1x1xf32>
    %cst_85 = arith.constant 1.024000e+03 : f32
    %246 = vector.broadcast %cst_85 : f32 to vector<2x1x1x1xf32>
    %247 = arith.divf %243, %246 : vector<2x1x1x1xf32>
    %248 = arith.mulf %245, %245 : vector<2x1x1x1xf32>
    %249 = arith.subf %247, %248 : vector<2x1x1x1xf32>
    %250 = vector.broadcast %245 : vector<2x1x1x1xf32> to vector<2x1x8x128xf32>
    %251 = arith.subf %234, %250 : vector<2x1x8x128xf32>
    %cst_86 = arith.constant 9.99999974E-6 : f32
    %252 = vector.broadcast %cst_86 : f32 to vector<2x1x1x1xf32>
    %253 = arith.addf %249, %252 : vector<2x1x1x1xf32>
    %254 = math.rsqrt %253 : vector<2x1x1x1xf32>
    %255 = vector.broadcast %254 : vector<2x1x1x1xf32> to vector<2x1x8x128xf32>
    %256 = arith.mulf %251, %255 : vector<2x1x8x128xf32>
    %c0_87 = arith.constant 0 : index
    %c0_88 = arith.constant 0 : index
    %257 = vector.load %arg24[%c0_87, %c0_88] : memref<8x128xf32, #tpu.memory_space<vmem>>, vector<8x128xf32>
    %258 = vector.shape_cast %257 : vector<8x128xf32> to vector<1x1x8x128xf32>
    %259 = vector.broadcast %258 : vector<1x1x8x128xf32> to vector<2x1x8x128xf32>
    %260 = arith.mulf %256, %259 : vector<2x1x8x128xf32>
    %c0_89 = arith.constant 0 : index
    %c0_90 = arith.constant 0 : index
    %261 = vector.load %arg25[%c0_89, %c0_90] : memref<8x128xf32, #tpu.memory_space<vmem>>, vector<8x128xf32>
    %262 = vector.shape_cast %261 : vector<8x128xf32> to vector<1x1x8x128xf32>
    %263 = vector.broadcast %262 : vector<1x1x8x128xf32> to vector<2x1x8x128xf32>
    %264 = arith.addf %260, %263 : vector<2x1x8x128xf32>
    %265 = vector.shape_cast %264 : vector<2x1x8x128xf32> to vector<2x8x128xf32>
    %266 = vector.shape_cast %265 : vector<2x8x128xf32> to vector<16x128xf32>
    %267 = arith.truncf %266 : vector<16x128xf32> to vector<16x128xbf16>
    %c0_91 = arith.constant 0 : index
    %c0_92 = arith.constant 0 : index
    %268 = vector.load %arg26[%c0_91, %c0_92] : memref<128x64xbf16, #tpu.memory_space<vmem>>, vector<128x64xbf16>
    %cst_93 = arith.constant dense<0.000000e+00> : vector<16x64xf32>
    %269 = tpu.matmul %267, %268, %cst_93 {dimension_numbers = #tpu.dot_dimension_numbers<[1], [0], [0], [1], [0, 0, 1, 1], [], []>} : vector<16x128xbf16>, vector<128x64xbf16>, vector<16x64xf32> -> vector<16x64xf32>
    %c0_94 = arith.constant 0 : index
    %c0_95 = arith.constant 0 : index
    %270 = vector.load %arg27[%c0_94, %c0_95] : memref<1x64xf32, #tpu.memory_space<vmem>>, vector<1x64xf32>
    %271 = vector.broadcast %270 : vector<1x64xf32> to vector<16x64xf32>
    %272 = arith.addf %269, %271 : vector<16x64xf32>
    %cst_96 = arith.constant 0.000000e+00 : f32
    %273 = vector.broadcast %cst_96 : f32 to vector<16x64xf32>
    %274 = arith.maximumf %272, %273 : vector<16x64xf32>
    %275 = arith.truncf %274 : vector<16x64xf32> to vector<16x64xbf16>
    %c0_97 = arith.constant 0 : index
    %c0_98 = arith.constant 0 : index
    %276 = vector.load %arg28[%c0_97, %c0_98] : memref<64x128xbf16, #tpu.memory_space<vmem>>, vector<64x128xbf16>
    %cst_99 = arith.constant dense<0.000000e+00> : vector<16x128xf32>
    %277 = tpu.matmul %275, %276, %cst_99 {dimension_numbers = #tpu.dot_dimension_numbers<[1], [0], [0], [1], [0, 0, 1, 1], [], []>} : vector<16x64xbf16>, vector<64x128xbf16>, vector<16x128xf32> -> vector<16x128xf32>
    %c0_100 = arith.constant 0 : index
    %c0_101 = arith.constant 0 : index
    %278 = vector.load %arg29[%c0_100, %c0_101] : memref<1x128xf32, #tpu.memory_space<vmem>>, vector<1x128xf32>
    %279 = vector.broadcast %278 : vector<1x128xf32> to vector<16x128xf32>
    %280 = arith.addf %277, %279 : vector<16x128xf32>
    %281 = vector.shape_cast %280 : vector<16x128xf32> to vector<2x8x128xf32>
    %c0_102 = arith.constant 0 : index
    %c0_103 = arith.constant 0 : index
    %c0_104 = arith.constant 0 : index
    %282 = vector.load %arg30[%c0_102, %c0_103, %c0_104] : memref<2x8x128xf32, #tpu.memory_space<vmem>>, vector<2x8x128xf32>
    tpu.vector_store %arg30[%c0_102, %c0_103, %c0_104], %281 {strides = array<i32>} : memref<2x8x128xf32, #tpu.memory_space<vmem>>, vector<2x8x128xf32>,
    return
  }
  func.func @transform_0(%arg0: i32) -> (i32, i32, i32, i32) {
    %c0_i32 = arith.constant 0 : i32
    %c0_i32_0 = arith.constant 0 : i32
    %c0_i32_1 = arith.constant 0 : i32
    %c0_i32_2 = arith.constant 0 : i32
    return %arg0, %c0_i32, %c0_i32_0, %c0_i32_1 : i32, i32, i32, i32
  }
  func.func @transform_1(%arg0: i32) -> (i32, i32) {
    %c0_i32 = arith.constant 0 : i32
    %c0_i32_0 = arith.constant 0 : i32
    %c0_i32_1 = arith.constant 0 : i32
    return %c0_i32, %c0_i32_0 : i32, i32
  }
  func.func @transform_2(%arg0: i32) -> (i32, i32) {
    %c0_i32 = arith.constant 0 : i32
    %c0_i32_0 = arith.constant 0 : i32
    %c0_i32_1 = arith.constant 0 : i32
    return %c0_i32, %c0_i32_0 : i32, i32
  }
  func.func @transform_3(%arg0: i32) -> (i32, i32) {
    %c0_i32 = arith.constant 0 : i32
    %c0_i32_0 = arith.constant 0 : i32
    %c0_i32_1 = arith.constant 0 : i32
    return %c0_i32, %c0_i32_0 : i32, i32
  }
  func.func @transform_4(%arg0: i32) -> (i32, i32) {
    %c0_i32 = arith.constant 0 : i32
    %c0_i32_0 = arith.constant 0 : i32
    %c0_i32_1 = arith.constant 0 : i32
    return %c0_i32, %c0_i32_0 : i32, i32
  }
  func.func @transform_5(%arg0: i32) -> (i32, i32) {
    %c0_i32 = arith.constant 0 : i32
    %c0_i32_0 = arith.constant 0 : i32
    %c0_i32_1 = arith.constant 0 : i32
    return %c0_i32, %c0_i32_0 : i32, i32
  }
  func.func @transform_6(%arg0: i32) -> (i32, i32) {
    %c0_i32 = arith.constant 0 : i32
    %c0_i32_0 = arith.constant 0 : i32
    %c0_i32_1 = arith.constant 0 : i32
    return %c0_i32, %c0_i32_0 : i32, i32
  }
  func.func @transform_7(%arg0: i32) -> (i32, i32) {
    %c0_i32 = arith.constant 0 : i32
    %c0_i32_0 = arith.constant 0 : i32
    %c0_i32_1 = arith.constant 0 : i32
    return %c0_i32, %c0_i32_0 : i32, i32
  }
  func.func @transform_8(%arg0: i32) -> (i32, i32) {
    %c0_i32 = arith.constant 0 : i32
    %c0_i32_0 = arith.constant 0 : i32
    %c0_i32_1 = arith.constant 0 : i32
    return %c0_i32, %c0_i32_0 : i32, i32
  }
  func.func @transform_9(%arg0: i32) -> (i32, i32) {
    %c0_i32 = arith.constant 0 : i32
    %c0_i32_0 = arith.constant 0 : i32
    %c0_i32_1 = arith.constant 0 : i32
    return %c0_i32, %c0_i32_0 : i32, i32
  }
  func.func @transform_10(%arg0: i32) -> (i32, i32) {
    %c0_i32 = arith.constant 0 : i32
    %c0_i32_0 = arith.constant 0 : i32
    %c0_i32_1 = arith.constant 0 : i32
    return %c0_i32, %c0_i32_0 : i32, i32
  }
  func.func @transform_11(%arg0: i32) -> (i32, i32) {
    %c0_i32 = arith.constant 0 : i32
    %c0_i32_0 = arith.constant 0 : i32
    %c0_i32_1 = arith.constant 0 : i32
    return %c0_i32, %c0_i32_0 : i32, i32
  }
  func.func @transform_12(%arg0: i32) -> (i32, i32) {
    %c0_i32 = arith.constant 0 : i32
    %c0_i32_0 = arith.constant 0 : i32
    %c0_i32_1 = arith.constant 0 : i32
    return %c0_i32, %c0_i32_0 : i32, i32
  }
  func.func @transform_13(%arg0: i32) -> (i32, i32) {
    %c0_i32 = arith.constant 0 : i32
    %c0_i32_0 = arith.constant 0 : i32
    %c0_i32_1 = arith.constant 0 : i32
    return %c0_i32, %c0_i32_0 : i32, i32
  }
  func.func @transform_14(%arg0: i32) -> (i32, i32) {
    %c0_i32 = arith.constant 0 : i32
    %c0_i32_0 = arith.constant 0 : i32
    %c0_i32_1 = arith.constant 0 : i32
    return %c0_i32, %c0_i32_0 : i32, i32
  }
  func.func @transform_15(%arg0: i32) -> (i32, i32) {
    %c0_i32 = arith.constant 0 : i32
    %c0_i32_0 = arith.constant 0 : i32
    %c0_i32_1 = arith.constant 0 : i32
    return %c0_i32, %c0_i32_0 : i32, i32
  }
  func.func @transform_16(%arg0: i32) -> (i32, i32) {
    %c0_i32 = arith.constant 0 : i32
    %c0_i32_0 = arith.constant 0 : i32
    %c0_i32_1 = arith.constant 0 : i32
    return %c0_i32, %c0_i32_0 : i32, i32
  }
  func.func @transform_17(%arg0: i32) -> (i32, i32) {
    %c0_i32 = arith.constant 0 : i32
    %c0_i32_0 = arith.constant 0 : i32
    %c0_i32_1 = arith.constant 0 : i32
    return %c0_i32, %c0_i32_0 : i32, i32
  }
  func.func @transform_18(%arg0: i32) -> (i32, i32) {
    %c0_i32 = arith.constant 0 : i32
    %c0_i32_0 = arith.constant 0 : i32
    %c0_i32_1 = arith.constant 0 : i32
    return %c0_i32, %c0_i32_0 : i32, i32
  }
  func.func @transform_19(%arg0: i32) -> (i32, i32) {
    %c0_i32 = arith.constant 0 : i32
    %c0_i32_0 = arith.constant 0 : i32
    %c0_i32_1 = arith.constant 0 : i32
    return %c0_i32, %c0_i32_0 : i32, i32
  }
  func.func @transform_20(%arg0: i32) -> (i32, i32) {
    %c0_i32 = arith.constant 0 : i32
    %c0_i32_0 = arith.constant 0 : i32
    %c0_i32_1 = arith.constant 0 : i32
    return %c0_i32, %c0_i32_0 : i32, i32
  }
  func.func @transform_21(%arg0: i32) -> (i32, i32) {
    %c0_i32 = arith.constant 0 : i32
    %c0_i32_0 = arith.constant 0 : i32
    %c0_i32_1 = arith.constant 0 : i32
    return %c0_i32, %c0_i32_0 : i32, i32
  }
  func.func @transform_22(%arg0: i32) -> (i32, i32) {
    %c0_i32 = arith.constant 0 : i32
    %c0_i32_0 = arith.constant 0 : i32
    %c0_i32_1 = arith.constant 0 : i32
    return %c0_i32, %c0_i32_0 : i32, i32
  }
  func.func @transform_23(%arg0: i32) -> (i32, i32) {
    %c0_i32 = arith.constant 0 : i32
    %c0_i32_0 = arith.constant 0 : i32
    %c0_i32_1 = arith.constant 0 : i32
    return %c0_i32, %c0_i32_0 : i32, i32
  }
  func.func @transform_24(%arg0: i32) -> (i32, i32) {
    %c0_i32 = arith.constant 0 : i32
    %c0_i32_0 = arith.constant 0 : i32
    %c0_i32_1 = arith.constant 0 : i32
    return %c0_i32, %c0_i32_0 : i32, i32
  }
  func.func @transform_25(%arg0: i32) -> (i32, i32) {
    %c0_i32 = arith.constant 0 : i32
    %c0_i32_0 = arith.constant 0 : i32
    %c0_i32_1 = arith.constant 0 : i32
    return %c0_i32, %c0_i32_0 : i32, i32
  }
  func.func @transform_26(%arg0: i32) -> (i32, i32) {
    %c0_i32 = arith.constant 0 : i32
    %c0_i32_0 = arith.constant 0 : i32
    %c0_i32_1 = arith.constant 0 : i32
    return %c0_i32, %c0_i32_0 : i32, i32
  }
  func.func @transform_27(%arg0: i32) -> (i32, i32) {
    %c0_i32 = arith.constant 0 : i32
    %c0_i32_0 = arith.constant 0 : i32
    %c0_i32_1 = arith.constant 0 : i32
    return %c0_i32, %c0_i32_0 : i32, i32
  }
  func.func @transform_28(%arg0: i32) -> (i32, i32) {
    %c0_i32 = arith.constant 0 : i32
    %c0_i32_0 = arith.constant 0 : i32
    %c0_i32_1 = arith.constant 0 : i32
    return %c0_i32, %c0_i32_0 : i32, i32
  }
  func.func @transform_29(%arg0: i32) -> (i32, i32, i32) {
    %c0_i32 = arith.constant 0 : i32
    %c0_i32_0 = arith.constant 0 : i32
    %c0_i32_1 = arith.constant 0 : i32
    return %arg0, %c0_i32, %c0_i32_0 : i32, i32, i32
  }
}

</mosaic_0001>

<bundles_post_ra>
// kernel: stgcn_forward.1
= control target key start
LH: loop header
LB: loop body
LE: loop exit
PB: predicated region body
PF: predicated region fallthrough
CT: control target
= control target key end

     0   :  { %s7816_s6 = smov 1   ;;  %vm386_vm0 = vcmask 1043456   ;;  %s7817_s10 = smov 3   ;;  %vm387_vm1 = vcmask 1044480   ;;  %v7819_v12 = vmov 65535   ;;  %vm289_vm2 = vcmask 23552   ;;  %s9595_s0 = inlined_call_operand.smem [shape: u32[30], index: -1, kind: input, shape index: {}] }
   0x1   :  { %s7860_s5 = sld [smem:[%s9595_s0]]   ;;  %s7818_s11 = smov 6   ;;  %v388_v13 = vsel %vm386_vm0, 4294967295, %v7819_v12  ;;  %vm310_vm3 = vcmask 48128   ;;  %vm355_vm4 = vcmask 72704   ;;  %vm815_vm5 = vcmask 523264  }
   0x2   :  { %s6323_s9 = sld [smem:[%s9595_s0 + %s7816_s6]]   ;;  %v389_v17 = vsel %vm387_vm1, %v388_v13, 0  ;;  %s7820_s15 = smov 2   ;;  %vm1700_vm6 = vcmask 64512   ;;  %vm2778_vm7 = vcmask 130048   ;;  %vm2795_vm8 = vcmask 261120  }
   0x3   :  { %s7894_s14 = sld [smem:[%s9595_s0 + %s7817_s10]]   ;;  %s7821_s19 = smov 64   ;;  %vm2851_vm9 = vcmask 392192   ;;  %vm7845_vm10 = vmmov 0  }
   0x4   :  { %s6324_s18 = sld [smem:[%s9595_s0 + %s7820_s15]]   ;;  %s7822_s20 = smov 4  }
   0x5   :  { %s6326_s23 = sld [smem:[%s9595_s0 + %s7822_s20]]   ;;  %s7823_s24 = smov 112  }
   0x6   :  { %s7824_s25 = smov 5   ;;  %s6328_s1 = sld [smem:[%s9595_s0 + %s7818_s11]]  }
   0x7   :  { %v7863_v0 = vld [vmem:[%s7860_s5 + $0x8] sm:$0xff]  ;;  %v7866_v1 = vld [vmem:[%s7860_s5 + $0x10] sm:$0xff]  ;;  %v7869_v2 = vld [vmem:[%s7860_s5 + $0x18] sm:$0xff]  ;;  %s6327_s28 = sld [smem:[%s9595_s0 + %s7824_s25]]   ;;  %s7825_s2 = smov 32  }
   0x8   :  { %v6913_v3 = vpack.i.bf16 %v7866_v1, %v7863_v0  ;;  %v6923_v4 = vpack.i.bf16 %v7869_v2, %v7866_v1  ;;  %v7876_v5 = vld [vmem:[%s7860_s5 + $0x20] sm:$0xff]  ;;  %v7879_v6 = vld [vmem:[%s7860_s5 + $0x28] sm:$0xff]  ;;  %v7897_v9 = vld [vmem:[%s7860_s5 + $0x30] sm:$0xff]  ;;  %s7826_s3 = smov 16   ;;  %s7827_s4 = smov 7  }
   0x9   :  { %v6918_v7 = vpack.i.bf16 %v7876_v5, %v7869_v2  ;;  %v6928_v8 = vpack.i.bf16 %v7879_v6, %v7876_v5  ;;  %v7900_v10 = vld [vmem:[%s7860_s5 + $0x38] sm:$0xff]  ;;  %v7903_v11 = vld [vmem:[%s7860_s5 + $0x40] sm:$0xff]  ;;  %v6933_v14 = vpack.i.bf16 %v7897_v9, %v7879_v6  ;;  %v7913_v16 = vld [vmem:[%s7860_s5 + $0x48] sm:$0xff]  ;;  %s6329_s7 = sld [smem:[%s9595_s0 + %s7827_s4]]   ;;  %s7828_s8 = smov 8  }
   0xa   :  { %6914 = vrot.lane.b32.xlu0 %v6913_v3, %s7817_s10  ;;  %6924 = vrot.lane.b32.xlu1 %v6923_v4, %s7818_s11  ;;  %v6938_v15 = vpack.i.bf16 %v7903_v11, %v7900_v10  ;;  %v7445_v18 = vld [vmem:[%s6323_s9] sm:$0x1f]   ;;  %v7916_v19 = vld [vmem:[%s7860_s5 + $0x50] sm:$0xff]  ;;  %v6943_v22 = vpack.i.bf16 %v7900_v10, %v7897_v9  ;;  %v6948_v23 = vpack.i.bf16 %v7913_v16, %v7903_v11  ;;  %s7829_s12 = smov 11   ;;  %s7831_s16 = smov 9  }
   0xb   :  { %v7919_v20 = vld [vmem:[%s7860_s5 + $0x68] sm:$0xff]  ;;  %v7922_v21 = vld [vmem:[%s7860_s5 + $0x70] sm:$0xff]  ;;  %v391_v24 = vand.u32 %v7445_v18, %v389_v17  ;;  %v6953_v25 = vpack.i.bf16 %v7916_v19, %v7913_v16  ;;  %v7937_v27 = vld [vmem:[%s7860_s5 + $0x58] sm:$0xff]  ;;  %s8792_s15 = sld [smem:[%s9595_s0 + %s7829_s12]]   ;;  %s7832_s21 = smov 10  }
   0xc   :  { %v6958_v26 = vpack.i.bf16 %v7922_v21, %v7919_v20  ;;  %v7940_v28 = vld [vmem:[%s7860_s5 + $0x78] sm:$0xff]  ;;  %v6963_v29 = vpack.i.bf16 %v7937_v27, %v7916_v19  ;;  %v7949_v31 = vld [vmem:[%s7860_s5 + $0x80] sm:$0xff]  ;;  %v7952_v32 = vld [vmem:[%s7860_s5 + $0x88] sm:$0xff]  ;;  %s6331_s20 = sld [smem:[%s9595_s0 + %s7831_s16]]   ;;  %s7833_s26 = smov 12  }
   0xd   :  { %6669 = vmatprep.subr.bf16.mxu0 %v391_v24  ;;  %v6968_v30 = vpack.i.bf16 %v7940_v28, %v7922_v21  ;;  %v7955_v33 = vld [vmem:[%s7860_s5 + $0x90] sm:$0xff]  ;;  %v6973_v34 = vpack.i.bf16 %v7949_v31, %v7940_v28  ;;  %v7964_v36 = vld [vmem:[%s7860_s5 + $0x98] sm:$0xff]  ;;  %v6983_v37 = vpack.i.bf16 %v7952_v32, %v7949_v31  ;;  %v7973_v39 = vld [vmem:[%s7860_s5 + $0xa0] sm:$0xff]  ;;  %s6332_s25 = sld [smem:[%s9595_s0 + %s7832_s21]]   ;;  %s7834_s30 = smov 13  }
   0xe   :  { %6919 = vrot.lane.b32.xlu0 %v6918_v7, %s7817_s10  ;;  %6929 = vrot.lane.b32.xlu1 %v6928_v8, %s7818_s11  ;;  %v6978_v35 = vpack.i.bf16 %v7955_v33, %v7952_v32  ;;  %v6988_v38 = vpack.i.bf16 %v7964_v36, %v7955_v33  ;;  %v7976_v40 = vld [vmem:[%s7860_s5 + $0xa8] sm:$0xff]  ;;  %v7979_v41 = vld [vmem:[%s7860_s5 + $0xb0] sm:$0xff]  ;;  %v6993_v42 = vpack.i.bf16 %v7973_v39, %v7964_v36  ;;  %s6334_s29 = sld [smem:[%s9595_s0 + %s7833_s26]]   ;;  %s7835_s6 = smov 14  }
   0xf   :  { %6670 = vmatpush3.bf16.msra.mxu0 %v391_v24  ;;  %v6998_v43 = vpack.i.bf16 %v7979_v41, %v7976_v40  ;;  %v7988_v44 = vld [vmem:[%s7860_s5 + $0xb8] sm:$0xff]  ;;  %v7003_v45 = vpack.i.bf16 %v7976_v40, %v7973_v39  ;;  %v123_v49 = vld [vmem:[%s7860_s5] sm:$0xff]  ;;  %s6336_s9 = sld [smem:[%s9595_s0 + %s7835_s6]]   ;;  %s7837_s16 = smov 17  }
  0x10   :  { %v7008_v46 = vpack.i.bf16 %v7988_v44, %v7979_v41  ;;  %s7841_s4 = smov 20   ;;  %s7848_s21 = smov 24  }
  0x11   :  { %s7849_s26 = smov 26   ;;  %s7851_s6 = smov 29  }
  0x12   :  { %6934 = vrot.lane.b32.xlu0 %v6933_v14, %s7817_s10  ;;  %6939 = vrot.lane.b32.xlu1 %v6938_v15, %s7817_s10 }
  0x16   :  { %6944 = vrot.lane.b32.xlu0 %v6943_v22, %s7818_s11  ;;  %6949 = vrot.lane.b32.xlu1 %v6948_v23, %s7818_s11 }
  0x1a   :  { %6954 = vrot.lane.b32.xlu0 %v6953_v25, %s7817_s10  ;;  %6959 = vrot.lane.b32.xlu1 %v6958_v26, %s7817_s10 }
  0x1e   :  { %6964 = vrot.lane.b32.xlu0 %v6963_v29, %s7818_s11  ;;  %6969 = vrot.lane.b32.xlu1 %v6968_v30, %s7818_s11 }
  0x22   :  { %6974 = vrot.lane.b32.xlu0 %v6973_v34, %s7817_s10  ;;  %6979 = vrot.lane.b32.xlu1 %v6978_v35, %s7817_s10 }
  0x26   :  { %6984 = vrot.lane.b32.xlu0 %v6983_v37, %s7818_s11  ;;  %6989 = vrot.lane.b32.xlu1 %v6988_v38, %s7818_s11 }
  0x2a   :  { %6994 = vrot.lane.b32.xlu0 %v6993_v42, %s7817_s10  ;;  %6999 = vrot.lane.b32.xlu1 %v6998_v43, %s7817_s10  ;;  %s7836_s10 = smov 15  }
  0x2b   :  { %s6337_s13 = sld [smem:[%s9595_s0 + %s7836_s10]]  }
  0x2e   :  { %7004 = vrot.lane.b32.xlu0 %v7003_v45, %s7818_s11  ;;  %7009 = vrot.lane.b32.xlu1 %v7008_v46, %s7818_s11  ;;  %s6330_s11 = sld [smem:[%s9595_s0 + %s7828_s8]]  }
  0x2f   :  { %s6351_s8 = sld [smem:[%s9595_s0 + %s7851_s6]]  }
  0x7c   :  { %v6915_v47 = vpop.permute.xlu0 %6914  ;;  %v6925_v48 = vpop.permute.xlu1 %6924 }
  0x7d   :  { %v6917_v50 = vunpack.i.h.bf16 %v6915_v47  ;;  %v6916_v51 = vunpack.i.l.bf16 %v6915_v47  ;;  %v6927_v52 = vunpack.i.h.bf16 %v6925_v48  ;;  %v6926_v53 = vunpack.i.l.bf16 %v6925_v48 }
  0x7f   :  { %v290_v54 = vsel %vm289_vm2, %v123_v49, %v6916_v51  ;;  %v291_v55 = vsel %vm289_vm2, %v7863_v0, %v6917_v50 }
  0x80   :  { %v6920_v56 = vpop.permute.xlu0 %6919  ;;  %v6930_v57 = vpop.permute.xlu1 %6929  ;;  %v311_v58 = vsel %vm310_vm3, %v290_v54, %v6926_v53  ;;  %v312_v59 = vsel %vm310_vm3, %v291_v55, %v6927_v52  ;;  %v135_v53 = vld [vmem:[%s7860_s5 + $0x60] sm:$0xff]  ;;  %s9053_s5 = sld [smem:[%s9595_s0 + %s7834_s30]]   ;;  %s7850_s30 = smov 28  }
  0x81   :  { %v6922_v60 = vunpack.i.h.bf16 %v6920_v56  ;;  %v6921_v61 = vunpack.i.l.bf16 %v6920_v56  ;;  %v6932_v62 = vunpack.i.h.bf16 %v6930_v57  ;;  %v6931_v63 = vunpack.i.l.bf16 %v6930_v57 }
  0x82   :  { %v331_v3 = vpack.c.bf16 %v312_v59, %v311_v58 }
  0x83   :  { %v293_v4 = vsel %vm289_vm2, %v7869_v2, %v6922_v60  ;;  %v292_v7 = vsel %vm289_vm2, %v7866_v1, %v6921_v61 }
  0x84   :  { %v313_v0 = vsel %vm310_vm3, %v292_v7, %v6931_v63  ;;  %v314_v8 = vsel %vm310_vm3, %v293_v4, %v6932_v62  ;;  %6671 = vmatprep.mubr.msk.bf16.mxu0 %vm355_vm4, %v331_v3  ;;  %v6935_v12 = vpop.permute.xlu0 %6934  ;;  %v6940_v13 = vpop.permute.xlu1 %6939 }
  0x85   :  { %v6937_v14 = vunpack.i.h.bf16 %v6935_v12  ;;  %v6936_v15 = vunpack.i.l.bf16 %v6935_v12  ;;  %v6942_v17 = vunpack.i.h.bf16 %v6940_v13  ;;  %v6941_v18 = vunpack.i.l.bf16 %v6940_v13 }
  0x86   :  { %v332_v22 = vpack.c.bf16 %v314_v8, %v313_v0 }
  0x87   :  { %v295_v23 = vsel %vm289_vm2, %v7879_v6, %v6937_v14  ;;  %v294_v24 = vsel %vm289_vm2, %v7876_v5, %v6936_v15  ;;  %v297_v25 = vsel %vm289_vm2, %v7900_v10, %v6942_v17  ;;  %v296_v26 = vsel %vm289_vm2, %v7897_v9, %v6941_v18 }
  0x88   :  { %6672 = vmatmul.mubr.msk.bf16.vlgmr.msra.gmra.mxu0 %vm355_vm4, %v332_v22  ;;  %v6945_v29 = vpop.permute.xlu0 %6944  ;;  %v6950_v30 = vpop.permute.xlu1 %6949 }
  0x89   :  { %v6947_v34 = vunpack.i.h.bf16 %v6945_v29  ;;  %v6946_v35 = vunpack.i.l.bf16 %v6945_v29  ;;  %v6952_v37 = vunpack.i.h.bf16 %v6950_v30  ;;  %v6951_v38 = vunpack.i.l.bf16 %v6950_v30 }
  0x8b   :  { %v315_v42 = vsel %vm310_vm3, %v294_v24, %v6946_v35  ;;  %v316_v43 = vsel %vm310_vm3, %v295_v23, %v6947_v34  ;;  %v317_v45 = vsel %vm310_vm3, %v296_v26, %v6951_v38  ;;  %v318_v46 = vsel %vm310_vm3, %v297_v25, %v6952_v37 }
  0x8c   :  { %v6955_v47 = vpop.permute.xlu0 %6954  ;;  %v6960_v48 = vpop.permute.xlu1 %6959  ;;  %v333_v49 = vpack.c.bf16 %v316_v43, %v315_v42  ;;  %v334_v50 = vpack.c.bf16 %v318_v46, %v317_v45 }
  0x8d   :  { %v6957_v51 = vunpack.i.h.bf16 %v6955_v47  ;;  %v6956_v52 = vunpack.i.l.bf16 %v6955_v47  ;;  %v6962_v54 = vunpack.i.h.bf16 %v6960_v48  ;;  %v6961_v55 = vunpack.i.l.bf16 %v6960_v48 }
  0x8e   :  { %6675 = vmatprep.mubr.msk.bf16.mxu0 %vm355_vm4, %v333_v49 }
  0x8f   :  { %v299_v56 = vsel %vm289_vm2, %v7913_v16, %v6957_v51  ;;  %v298_v57 = vsel %vm289_vm2, %v7903_v11, %v6956_v52  ;;  %v301_v58 = vsel %vm289_vm2, %v7919_v20, %v6962_v54  ;;  %v300_v59 = vsel %vm289_vm2, %v135_v53, %v6961_v55 }
  0x90   :  { %6676 = vmatmul.mubr.msk.bf16.gmra.mxu0 %vm355_vm4, %v334_v50  ;;  %v6965_v60 = vpop.permute.xlu0 %6964  ;;  %v6970_v61 = vpop.permute.xlu1 %6969 }
  0x91   :  { %v6967_v62 = vunpack.i.h.bf16 %v6965_v60  ;;  %v6966_v63 = vunpack.i.l.bf16 %v6965_v60  ;;  %v6972_v3 = vunpack.i.h.bf16 %v6970_v61  ;;  %v6971_v4 = vunpack.i.l.bf16 %v6970_v61 }
  0x93   :  { %v319_v7 = vsel %vm310_vm3, %v298_v57, %v6966_v63  ;;  %v320_v0 = vsel %vm310_vm3, %v299_v56, %v6967_v62  ;;  %v321_v8 = vsel %vm310_vm3, %v300_v59, %v6971_v4  ;;  %v322_v12 = vsel %vm310_vm3, %v301_v58, %v6972_v3 }
  0x94   :  { %v6975_v13 = vpop.permute.xlu0 %6974  ;;  %v6980_v20 = vpop.permute.xlu1 %6979  ;;  %v335_v14 = vpack.c.bf16 %v320_v0, %v319_v7  ;;  %v336_v15 = vpack.c.bf16 %v322_v12, %v321_v8 }
  0x95   :  { %v6977_v17 = vunpack.i.h.bf16 %v6975_v13  ;;  %v6976_v18 = vunpack.i.l.bf16 %v6975_v13  ;;  %v6982_v22 = vunpack.i.h.bf16 %v6980_v20  ;;  %v6981_v23 = vunpack.i.l.bf16 %v6980_v20 }
  0x96   :  { %6679 = vmatprep.mubr.msk.bf16.mxu0 %vm355_vm4, %v335_v14  ;;  %v7446_v14 = vld [vmem:[%s7894_s14 + $0x18] sm:$0xff]  }
  0x97   :  { %v303_v24 = vsel %vm289_vm2, %v7940_v28, %v6977_v17  ;;  %v302_v25 = vsel %vm289_vm2, %v7922_v21, %v6976_v18  ;;  %v305_v26 = vsel %vm289_vm2, %v7952_v32, %v6982_v22  ;;  %v304_v29 = vsel %vm289_vm2, %v7949_v31, %v6981_v23  ;;  %6691 = vmatprep.subr.bf16.mxu1 %v7446_v14 }
  0x98   :  { %6680 = vmatmul.mubr.msk.bf16.gmra.mxu0 %vm355_vm4, %v336_v15  ;;  %v6985_v30 = vpop.permute.xlu0 %6984  ;;  %v6990_v34 = vpop.permute.xlu1 %6989  ;;  %6692 = vmatpush3.bf16.msra.mxu1 %v7446_v14  ;;  %v8072_v15 = vld [vmem:[%s6324_s18] ss:$0 sm:$0xff]  ;;  %s7847_s18 = smov 23  }
  0x99   :  { %v6987_v35 = vunpack.i.h.bf16 %v6985_v30  ;;  %v6986_v37 = vunpack.i.l.bf16 %v6985_v30  ;;  %v6992_v38 = vunpack.i.h.bf16 %v6990_v34  ;;  %v6991_v42 = vunpack.i.l.bf16 %v6990_v34 }
  0x9b   :  { %v323_v43 = vsel %vm310_vm3, %v302_v25, %v6986_v37  ;;  %v324_v45 = vsel %vm310_vm3, %v303_v24, %v6987_v35  ;;  %v325_v46 = vsel %vm310_vm3, %v304_v29, %v6991_v42  ;;  %v326_v47 = vsel %vm310_vm3, %v305_v26, %v6992_v38 }
  0x9c   :  { %v6995_v48 = vpop.permute.xlu0 %6994  ;;  %v7000_v49 = vpop.permute.xlu1 %6999  ;;  %v337_v50 = vpack.c.bf16 %v324_v45, %v323_v43  ;;  %v338_v51 = vpack.c.bf16 %v326_v47, %v325_v46 }
  0x9d   :  { %v6997_v52 = vunpack.i.h.bf16 %v6995_v48  ;;  %v6996_v53 = vunpack.i.l.bf16 %v6995_v48  ;;  %v7002_v54 = vunpack.i.h.bf16 %v7000_v49  ;;  %v7001_v55 = vunpack.i.l.bf16 %v7000_v49 }
  0x9e   :  { %6683 = vmatprep.mubr.msk.bf16.mxu0 %vm355_vm4, %v337_v50 }
  0x9f   :  { %v307_v56 = vsel %vm289_vm2, %v7964_v36, %v6997_v52  ;;  %v306_v57 = vsel %vm289_vm2, %v7955_v33, %v6996_v53  ;;  %v309_v58 = vsel %vm289_vm2, %v7976_v40, %v7002_v54  ;;  %v308_v59 = vsel %vm289_vm2, %v7973_v39, %v7001_v55 }
  0xa0   :  { %6684 = vmatmul.mubr.msk.bf16.gmra.mxu0 %vm355_vm4, %v338_v51  ;;  %v7005_v60 = vpop.permute.xlu0 %7004  ;;  %v7010_v61 = vpop.permute.xlu1 %7009 }
  0xa1   :  { %v7007_v62 = vunpack.i.h.bf16 %v7005_v60  ;;  %v7006_v63 = vunpack.i.l.bf16 %v7005_v60  ;;  %v7012_v3 = vunpack.i.h.bf16 %v7010_v61  ;;  %v7011_v4 = vunpack.i.l.bf16 %v7010_v61 }
  0xa3   :  { %v327_v7 = vsel %vm310_vm3, %v306_v57, %v7006_v63  ;;  %v328_v0 = vsel %vm310_vm3, %v307_v56, %v7007_v62  ;;  %v329_v8 = vsel %vm310_vm3, %v308_v59, %v7011_v4  ;;  %v330_v12 = vsel %vm310_vm3, %v309_v58, %v7012_v3 }
  0xa4   :  { %v339_v13 = vpack.c.bf16 %v328_v0, %v327_v7  ;;  %v340_v20 = vpack.c.bf16 %v330_v12, %v329_v8  ;;  %v7447_v12 = vld [vmem:[%s7894_s14 + $0x10] sm:$0xff]  }
  0xa5   :  { %6693 = vmatprep.subr.bf16.mxu1 %v7447_v12 }
  0xa6   :  { %6687 = vmatprep.mubr.msk.bf16.mxu0 %vm355_vm4, %v339_v13  ;;  %6694 = vmatpush3.bf16.msra.mxu1 %v7447_v12 }
  0xa8   :  { %6688 = vmatmul.mubr.msk.bf16.gmra.mxu0 %vm355_vm4, %v340_v20 }
 0x148   :  { %v6673_v17 = vpop.f32.mrf.mxu0 }
 0x149   :  { %v8075_v18 = vadd.f32 %v6673_v17, %v8072_v15 }
 0x14a   :  { %v427_v22 = vpop.f32.mrf.mxu0 }
 0x14b   :  { %v6366_v23 = vmul.f32 -1.442695, %v8075_v18  ;;  %v8079_v24 = vadd.f32 %v8072_v15, %v427_v22 }
 0x14c   :  { %v6674_v25 = vpop.f32.mrf.mxu0 }
 0x14d   :  { %7532 = vpow2.f32 %v6366_v23  ;;  %v6364_v26 = vmul.f32 -1.442695, %v8079_v24  ;;  %v8083_v29 = vadd.f32 %v6674_v25, %v8072_v15 }
 0x14e   :  { %v430_v30 = vpop.f32.mrf.mxu0 }
 0x14f   :  { %7534 = vpow2.f32 %v6364_v26  ;;  %v6367_v34 = vmul.f32 -1.442695, %v8083_v29  ;;  %v8087_v35 = vadd.f32 %v8072_v15, %v430_v30 }
 0x150   :  { %v6677_v37 = vpop.f32.mrf.mxu0 }
 0x151   :  { %7536 = vpow2.f32 %v6367_v34  ;;  %v6365_v38 = vmul.f32 -1.442695, %v8087_v35  ;;  %v8091_v42 = vadd.f32 %v6677_v37, %v8072_v15  ;;  %v7448_v37 = vld [vmem:[%s7894_s14 + $0x8] sm:$0xff]  }
 0x152   :  { %v443_v43 = vpop.f32.mrf.mxu0  ;;  %6695 = vmatprep.subr.bf16.mxu1 %v7448_v37 }
 0x153   :  { %7538 = vpow2.f32 %v6365_v38  ;;  %v6370_v45 = vmul.f32 -1.442695, %v8091_v42  ;;  %v8095_v46 = vadd.f32 %v8072_v15, %v443_v43  ;;  %6696 = vmatpush3.bf16.msra.mxu1 %v7448_v37 }
 0x154   :  { %v6678_v47 = vpop.f32.mrf.mxu0 }
 0x155   :  { %7540 = vpow2.f32 %v6370_v45  ;;  %v6368_v48 = vmul.f32 -1.442695, %v8095_v46  ;;  %v8099_v49 = vadd.f32 %v6678_v47, %v8072_v15 }
 0x156   :  { %v446_v50 = vpop.f32.mrf.mxu0 }
 0x157   :  { %7542 = vpow2.f32 %v6368_v48  ;;  %v6371_v51 = vmul.f32 -1.442695, %v8099_v49  ;;  %v8103_v52 = vadd.f32 %v8072_v15, %v446_v50 }
 0x158   :  { %v6681_v53 = vpop.f32.mrf.mxu0 }
 0x159   :  { %7544 = vpow2.f32 %v6371_v51  ;;  %v6369_v54 = vmul.f32 -1.442695, %v8103_v52  ;;  %v8107_v55 = vadd.f32 %v6681_v53, %v8072_v15 }
 0x15a   :  { %v7533_v56 = vpop.eup %7532  ;;  %v459_v57 = vpop.f32.mrf.mxu0 }
 0x15b   :  { %7546 = vpow2.f32 %v6369_v54  ;;  %v6374_v58 = vmul.f32 -1.442695, %v8107_v55  ;;  %v8111_v60 = vadd.f32 %v8072_v15, %v459_v57  ;;  %v608_v62 = vadd.f32 1.0, %v7533_v56  ;;  %v7449_v57 = vld [vmem:[%s7894_s14] sm:$0xff]   ;;  %s7846_s14 = smov 27  }
 0x15c   :  { %v7535_v59 = vpop.eup %7534  ;;  %v6682_v61 = vpop.f32.mrf.mxu0  ;;  %6697 = vmatprep.subr.bf16.mxu1 %v7449_v57  ;;  %s9563_s17 = sld [smem:[%s9595_s0 + %s7846_s14]]  }
 0x15d   :  { %v606_v63 = vadd.f32 1.0, %v7535_v59  ;;  %v8114_v3 = vadd.f32 %v6682_v61, %v8072_v15  ;;  %7548 = vpow2.f32 %v6374_v58  ;;  %v6372_v7 = vmul.f32 -1.442695, %v8111_v60  ;;  %6698 = vmatpush3.bf16.msra.mxu1 %v7449_v57 }
 0x15e   :  { %v7537_v4 = vpop.eup %7536  ;;  %v462_v0 = vpop.f32.mrf.mxu0 }
 0x15f   :  { %7550 = vrcp.f32 %v606_v63  ;;  %v6375_v8 = vmul.f32 -1.442695, %v8114_v3  ;;  %v8120_v20 = vadd.f32 %v8072_v15, %v462_v0  ;;  %v609_v17 = vadd.f32 1.0, %v7537_v4 }
 0x160   :  { %v7539_v13 = vpop.eup %7538  ;;  %7552 = vpow2.f32 %v6372_v7  ;;  %v6685_v14 = vpop.f32.mrf.mxu0 }
 0x161   :  { %7554 = vrcp.f32 %v608_v62  ;;  %v607_v22 = vadd.f32 1.0, %v7539_v13  ;;  %v8123_v23 = vadd.f32 %v6685_v14, %v8072_v15  ;;  %v6373_v26 = vmul.f32 -1.442695, %v8120_v20 }
 0x162   :  { %v7541_v25 = vpop.eup %7540  ;;  %7556 = vpow2.f32 %v6375_v8  ;;  %v475_v30 = vpop.f32.mrf.mxu0 }
 0x163   :  { %7558 = vrcp.f32 %v607_v22  ;;  %v6378_v34 = vmul.f32 -1.442695, %v8123_v23  ;;  %v8129_v43 = vadd.f32 %v8072_v15, %v475_v30  ;;  %v612_v47 = vadd.f32 1.0, %v7541_v25 }
 0x164   :  { %v7543_v38 = vpop.eup %7542  ;;  %7560 = vpow2.f32 %v6373_v26  ;;  %v6686_v45 = vpop.f32.mrf.mxu0 }
 0x165   :  { %7562 = vrcp.f32 %v609_v17  ;;  %v610_v48 = vadd.f32 1.0, %v7543_v38  ;;  %v8132_v50 = vadd.f32 %v6686_v45, %v8072_v15  ;;  %v6376_v53 = vmul.f32 -1.442695, %v8129_v43 }
 0x166   :  { %v7545_v51 = vpop.eup %7544  ;;  %7564 = vpow2.f32 %v6378_v34  ;;  %v478_v54 = vpop.f32.mrf.mxu0 }
 0x167   :  { %7566 = vrcp.f32 %v610_v48  ;;  %v6379_v56 = vmul.f32 -1.442695, %v8132_v50  ;;  %v8138_v59 = vadd.f32 %v8072_v15, %v478_v54  ;;  %v613_v62 = vadd.f32 1.0, %v7545_v51 }
 0x168   :  { %v7547_v58 = vpop.eup %7546  ;;  %7568 = vpow2.f32 %v6376_v53  ;;  %v6689_v61 = vpop.f32.mrf.mxu0 }
 0x169   :  { %7570 = vrcp.f32 %v612_v47  ;;  %v611_v63 = vadd.f32 1.0, %v7547_v58  ;;  %v8141_v4 = vadd.f32 %v6689_v61, %v8072_v15  ;;  %v6377_v7 = vmul.f32 -1.442695, %v8138_v59 }
 0x16a   :  { %7572 = vpow2.f32 %v6379_v56  ;;  %v491_v0 = vpop.f32.mrf.mxu0  ;;  %v7549_v8 = vpop.eup %7548 }
 0x16b   :  { %7574 = vrcp.f32 %v611_v63  ;;  %v6382_v12 = vmul.f32 -1.442695, %v8141_v4  ;;  %v8146_v13 = vadd.f32 %v8072_v15, %v491_v0  ;;  %v616_v25 = vadd.f32 1.0, %v7549_v8 }
 0x16c   :  { %v7551_v14 = vpop.eup %7550  ;;  %7576 = vpow2.f32 %v6377_v7  ;;  %v6690_v17 = vpop.f32.mrf.mxu0 }
 0x16d   :  { %v7553_v22 = vpop.eup %7552  ;;  %7578 = vrcp.f32 %v613_v62  ;;  %v6380_v26 = vmul.f32 -1.442695, %v8146_v13  ;;  %v8150_v30 = vadd.f32 %v6690_v17, %v8072_v15  ;;  %686 = vrot.lane.b32.xlu0 %v7551_v14, %s7821_s19 }
 0x16e   :  { %v7555_v34 = vpop.eup %7554  ;;  %v614_v37 = vadd.f32 1.0, %v7553_v22  ;;  %7580 = vpow2.f32 %v6382_v12  ;;  %v494_v38 = vpop.f32.mrf.mxu0 }
 0x16f   :  { %v7557_v45 = vpop.eup %7556  ;;  %7582 = vpow2.f32 %v6380_v26  ;;  %v6383_v47 = vmul.f32 -1.442695, %v8150_v30  ;;  %v8155_v48 = vadd.f32 %v8072_v15, %v494_v38 }
 0x170   :  { %v7559_v51 = vpop.eup %7558  ;;  %7584 = vrcp.f32 %v614_v37  ;;  %v617_v57 = vadd.f32 1.0, %v7557_v45 }
 0x171   :  { %v7561_v53 = vpop.eup %7560  ;;  %7586 = vrcp.f32 %v616_v25  ;;  %v6381_v54 = vmul.f32 -1.442695, %v8155_v48  ;;  %688 = vrot.lane.b32.xlu1 %v7559_v51, %s7821_s19  ;;  %690 = vrot.lane.b32.xlu0 %v7555_v34, %s7821_s19 }
 0x172   :  { %v7563_v56 = vpop.eup %7562  ;;  %v615_v58 = vadd.f32 1.0, %v7561_v53  ;;  %7588 = vpow2.f32 %v6383_v47 }
 0x173   :  { %v7565_v61 = vpop.eup %7564  ;;  %7590 = vpow2.f32 %v6381_v54 }
 0x174   :  { %v7567_v62 = vpop.eup %7566  ;;  %7592 = vrcp.f32 %v615_v58  ;;  %v620_v7 = vadd.f32 1.0, %v7565_v61 }
 0x175   :  { %v7569_v15 = vpop.eup %7568  ;;  %692 = vrot.lane.b32.xlu1 %v7563_v56, %s7821_s19  ;;  %694 = vrot.lane.b32.xlu0 %v7567_v62, %s7821_s19  ;;  %7594 = vrcp.f32 %v617_v57 }
 0x176   :  { %v7571_v63 = vpop.eup %7570  ;;  %v618_v0 = vadd.f32 1.0, %v7569_v15 }
 0x177   :  { %v7573_v8 = vpop.eup %7572 }
 0x178   :  { %v7575_v12 = vpop.eup %7574  ;;  %7596 = vrcp.f32 %v618_v0  ;;  %v621_v22 = vadd.f32 1.0, %v7573_v8 }
 0x179   :  { %v7577_v14 = vpop.eup %7576  ;;  %696 = vrot.lane.b32.xlu1 %v7575_v12, %s7821_s19  ;;  %698 = vrot.lane.b32.xlu0 %v7571_v63, %s7821_s19  ;;  %7598 = vrcp.f32 %v620_v7 }
 0x17a   :  { %v7579_v17 = vpop.eup %7578  ;;  %v619_v25 = vadd.f32 1.0, %v7577_v14  ;;  %v506_v14 = vsel %vm289_vm2, %v7866_v1, 0.0 }
 0x17b   :  { %v7581_v26 = vpop.eup %7580 }
 0x17c   :  { %v7583_v34 = vpop.eup %7582  ;;  %7600 = vrcp.f32 %v619_v25  ;;  %v624_v47 = vadd.f32 1.0, %v7581_v26  ;;  %v526_v25 = vadd.f32 %v506_v14, %v8079_v24  ;;  %v510_v24 = vsel %vm289_vm2, %v7897_v9, 0.0 }
 0x17d   :  { %v7585_v37 = vpop.eup %7584  ;;  %v622_v38 = vadd.f32 1.0, %v7583_v34  ;;  %700 = vrot.lane.b32.xlu1 %v7579_v17, %s7821_s19  ;;  %7602 = vrcp.f32 %v621_v22  ;;  %v507_v17 = vsel %vm289_vm2, %v7869_v2, 0.0  ;;  %v508_v34 = vsel %vm289_vm2, %v7876_v5, 0.0 }
 0x17e   :  { %v7587_v45 = vpop.eup %7586  ;;  %702 = vrot.lane.b32.xlu0 %v7585_v37, %s7821_s19  ;;  %v527_v26 = vadd.f32 %v507_v17, %v8087_v35  ;;  %v509_v37 = vsel %vm289_vm2, %v7879_v6, 0.0  ;;  %v528_v1 = vadd.f32 %v508_v34, %v8075_v18  ;;  %v511_v35 = vsel %vm289_vm2, %v7900_v10, 0.0 }
 0x17f   :  { %v7589_v51 = vpop.eup %7588  ;;  %7604 = vrcp.f32 %v622_v38  ;;  %v529_v2 = vadd.f32 %v509_v37, %v8083_v29  ;;  %v512_v29 = vsel %vm289_vm2, %v7903_v11, 0.0  ;;  %v513_v9 = vsel %vm289_vm2, %v7913_v16, 0.0 }
 0x180   :  { %v7591_v53 = vpop.eup %7590  ;;  %7606 = vrcp.f32 %v624_v47  ;;  %v625_v57 = vadd.f32 1.0, %v7589_v51  ;;  %v515_v11 = vsel %vm289_vm2, %v7937_v27, 0.0 }
 0x181   :  { %v7593_v54 = vpop.eup %7592  ;;  %v623_v56 = vadd.f32 1.0, %v7591_v53 }
 0x182   :  { %704 = vrot.lane.b32.xlu1 %v7593_v54, %s7821_s19  ;;  %706 = vrot.lane.b32.xlu0 %v7587_v45, %s7821_s19  ;;  %v7595_v58 = vpop.eup %7594 }
 0x183   :  { %7608 = vrcp.f32 %v623_v56 }
 0x184   :  { %7610 = vrcp.f32 %v625_v57  ;;  %v530_v57 = vadd.f32 %v510_v24, %v8095_v46 }
 0x185   :  { %v7597_v61 = vpop.eup %7596 }
 0x186   :  { %708 = vrot.lane.b32.xlu1 %v7595_v58, %s7821_s19  ;;  %710 = vrot.lane.b32.xlu0 %v7597_v61, %s7821_s19  ;;  %v7599_v62 = vpop.eup %7598  ;;  %v531_v58 = vadd.f32 %v511_v35, %v8103_v52  ;;  %v514_v52 = vsel %vm289_vm2, %v7916_v19, 0.0 }
 0x187   :  { %v534_v17 = vadd.f32 %v514_v52, %v8111_v60  ;;  %v518_v60 = vsel %vm289_vm2, %v7949_v31, 0.0  ;;  %v521_v31 = vsel %vm289_vm2, %v7964_v36, 0.0 }
 0x189   :  { %v7601_v15 = vpop.eup %7600 }
 0x18a   :  { %712 = vrot.lane.b32.xlu1 %v7601_v15, %s7821_s19  ;;  %714 = vrot.lane.b32.xlu0 %v7599_v62, %s7821_s19  ;;  %v7603_v63 = vpop.eup %7602 }
 0x18c   :  { %v7605_v7 = vpop.eup %7604 }
 0x18d   :  { %v7607_v0 = vpop.eup %7606 }
 0x18e   :  { %716 = vrot.lane.b32.xlu1 %v7603_v63, %s7821_s19  ;;  %718 = vrot.lane.b32.xlu0 %v7605_v7, %s7821_s19  ;;  %v532_v63 = vadd.f32 %v512_v29, %v8091_v42  ;;  %v533_v7 = vadd.f32 %v513_v9, %v8099_v49  ;;  %v535_v42 = vadd.f32 %v515_v11, %v8120_v20  ;;  %v516_v49 = vsel %vm289_vm2, %v7922_v21, 0.0 }
 0x18f   :  { %v536_v34 = vadd.f32 %v516_v49, %v8107_v55  ;;  %v519_v21 = vsel %vm289_vm2, %v7952_v32, 0.0 }
 0x190   :  { %v7609_v8 = vpop.eup %7608 }
 0x191   :  { %v7611_v12 = vpop.eup %7610 }
 0x192   :  { %720 = vrot.lane.b32.xlu1 %v7609_v8, %s7821_s19  ;;  %722 = vrot.lane.b32.xlu0 %v7607_v0, %s7821_s19 }
 0x196   :  { %724 = vrot.lane.b32.xlu1 %v7611_v12, %s7821_s19 }
 0x1df   :  { %v687_v22 = vpop.permute.xlu0 %686 }
 0x1e0   :  { %v746_v47 = vmul.f32 %v687_v22, %v526_v25  ;;  %v517_v22 = vsel %vm289_vm2, %v7940_v28, 0.0 }
 0x1e1   :  { %v537_v37 = vadd.f32 %v517_v22, %v8114_v3  ;;  %v520_v3 = vsel %vm289_vm2, %v7955_v33, 0.0  ;;  %v523_v33 = vsel %vm289_vm2, %v7976_v40, 0.0 }
 0x1e2   :  { %v540_v35 = vadd.f32 %v520_v3, %v8123_v23 }
 0x1e3   :  { %v689_v38 = vpop.permute.xlu1 %688  ;;  %v691_v45 = vpop.permute.xlu0 %690 }
 0x1e4   :  { %v747_v51 = vmul.f32 %v689_v38, %v527_v26  ;;  %v748_v56 = vmul.f32 %v691_v45, %v528_v1  ;;  %v539_v1 = vadd.f32 %v519_v21, %v8138_v59  ;;  %v522_v59 = vsel %vm289_vm2, %v7973_v39, 0.0 }
 0x1e5   :  { %v525_v39 = vsel %vm289_vm2, %v7988_v44, 0.0 }
 0x1e6   :  { %v766_v53 = vpack.c.bf16 %v747_v51, %v746_v47  ;;  %v538_v51 = vadd.f32 %v518_v60, %v8129_v43 }
 0x1e7   :  { %v693_v5 = vpop.permute.xlu1 %692  ;;  %v695_v54 = vpop.permute.xlu0 %694 }
 0x1e8   :  { %v749_v6 = vmul.f32 %v693_v5, %v529_v2  ;;  %6699 = vmatprep.mubr.msk.bf16.mxu1 %vm815_vm5, %v766_v53  ;;  %v750_v10 = vmul.f32 %v695_v54, %v530_v57  ;;  %v541_v5 = vadd.f32 %v521_v31, %v8132_v50  ;;  %v542_v57 = vadd.f32 %v522_v59, %v8146_v13 }
 0x1e9   :  { %v524_v50 = vsel %vm289_vm2, %v7979_v41, 0.0 }
 0x1ea   :  { %v767_v18 = vpack.c.bf16 %v749_v6, %v748_v56 }
 0x1eb   :  { %v697_v61 = vpop.permute.xlu1 %696  ;;  %v699_v62 = vpop.permute.xlu0 %698 }
 0x1ec   :  { %v751_v15 = vmul.f32 %v697_v61, %v531_v58  ;;  %6700 = vmatmul.mubr.msk.bf16.vlgmr.msra.gmra.mxu1 %vm815_vm5, %v767_v18  ;;  %v752_v8 = vmul.f32 %v699_v62, %v532_v63  ;;  %v543_v58 = vadd.f32 %v523_v33, %v8155_v48  ;;  %v544_v61 = vadd.f32 %v524_v50, %v8141_v4  ;;  %v6384_v63 = vld [vmem:[%s6326_s23] ss:$0 sm:$0xff]  ;;  %s7839_s23 = smov 21  }
 0x1ed   :  { %v545_v62 = vadd.f32 %v525_v39, %v8150_v30  ;;  %v1699_v39 = vld [vmem:[%s6327_s28] sm:$0xf]  ;;  %s9431_s27 = sld [smem:[%s9595_s0 + %s7839_s23]]   ;;  %s7840_s28 = smov 19  }
 0x1ee   :  { %v768_v46 = vpack.c.bf16 %v751_v15, %v750_v10  ;;  %6875 = vmatprep.subr.msk.bf16.mxu0 %vm386_vm0, %v1699_v39 }
 0x1ef   :  { %v701_v0 = vpop.permute.xlu1 %700 }
 0x1f0   :  { %v753_v16 = vmul.f32 %v701_v0, %v533_v7  ;;  %v703_v12 = vpop.permute.xlu0 %702  ;;  %6703 = vmatprep.mubr.msk.bf16.mxu1 %vm815_vm5, %v768_v46 }
 0x1f1   :  { %v754_v27 = vmul.f32 %v703_v12, %v534_v17 }
 0x1f2   :  { %v769_v14 = vpack.c.bf16 %v753_v16, %v752_v8 }
 0x1f4   :  { %v705_v19 = vpop.permute.xlu1 %704  ;;  %v707_v25 = vpop.permute.xlu0 %706  ;;  %6704 = vmatmul.mubr.msk.bf16.gmra.mxu1 %vm815_vm5, %v769_v14 }
 0x1f5   :  { %v755_v26 = vmul.f32 %v705_v19, %v535_v42  ;;  %v756_v28 = vmul.f32 %v707_v25, %v536_v34 }
 0x1f7   :  { %v770_v38 = vpack.c.bf16 %v755_v26, %v754_v27 }
 0x1f8   :  { %v709_v20 = vpop.permute.xlu1 %708  ;;  %v711_v45 = vpop.permute.xlu0 %710 }
 0x1f9   :  { %v757_v47 = vmul.f32 %v709_v20, %v537_v37  ;;  %6707 = vmatprep.mubr.msk.bf16.mxu1 %vm815_vm5, %v770_v38  ;;  %v758_v32 = vmul.f32 %v711_v45, %v538_v51 }
 0x1fb   :  { %v771_v55 = vpack.c.bf16 %v757_v47, %v756_v28 }
 0x1fc   :  { %v713_v2 = vpop.permute.xlu1 %712  ;;  %v715_v53 = vpop.permute.xlu0 %714 }
 0x1fd   :  { %v759_v24 = vmul.f32 %v713_v2, %v539_v1  ;;  %6708 = vmatmul.mubr.msk.bf16.gmra.mxu1 %vm815_vm5, %v771_v55  ;;  %v760_v36 = vmul.f32 %v715_v53, %v540_v35 }
 0x1ff   :  { %v772_v43 = vpack.c.bf16 %v759_v24, %v758_v32 }
 0x200   :  { %v717_v54 = vpop.permute.xlu1 %716  ;;  %v719_v56 = vpop.permute.xlu0 %718 }
 0x201   :  { %v761_v6 = vmul.f32 %v717_v54, %v541_v5  ;;  %6711 = vmatprep.mubr.msk.bf16.mxu1 %vm815_vm5, %v772_v43  ;;  %v762_v29 = vmul.f32 %v719_v56, %v542_v57 }
 0x203   :  { %v773_v23 = vpack.c.bf16 %v761_v6, %v760_v36 }
 0x204   :  { %v721_v18 = vpop.permute.xlu1 %720  ;;  %v723_v9 = vpop.permute.xlu0 %722 }
 0x205   :  { %v763_v40 = vmul.f32 %v721_v18, %v543_v58  ;;  %6712 = vmatmul.mubr.msk.bf16.gmra.mxu1 %vm815_vm5, %v773_v23  ;;  %v764_v48 = vmul.f32 %v723_v9, %v544_v61 }
 0x207   :  { %v774_v13 = vpack.c.bf16 %v763_v40, %v762_v29  ;;  %v1762_v29 = vsel %vm386_vm0, %v1699_v39, 0 }
 0x208   :  { %v725_v10 = vpop.permute.xlu1 %724  ;;  %6720 = vmatpush3.bf16.msra.mxu0 %v1762_v29 }
 0x209   :  { %v765_v15 = vmul.f32 %v725_v10, %v545_v62  ;;  %6715 = vmatprep.mubr.msk.bf16.mxu1 %vm815_vm5, %v774_v13 }
 0x20b   :  { %v775_v41 = vpack.c.bf16 %v765_v15, %v764_v48 }
 0x20d   :  { %6716 = vmatmul.mubr.msk.bf16.gmra.mxu1 %vm815_vm5, %v775_v41 }
 0x2ac   :  { %v6701_v44 = vpop.f32.mrf.mxu1 }
 0x2ad   :  { %v8250_v46 = vadd.f32 %v6701_v44, %v6384_v63 }
 0x2ae   :  { %v880_v7 = vpop.f32.mrf.mxu1 }
 0x2af   :  { %v8254_v52 = vadd.f32 %v6384_v63, %v880_v7 }
 0x2b0   :  { %v6702_v4 = vpop.f32.mrf.mxu1 }
 0x2b1   :  { %v8252_v30 = vadd.f32 %v6702_v4, %v6384_v63 }
 0x2b2   :  { %v883_v0 = vpop.f32.mrf.mxu1 }
 0x2b3   :  { %v7013_v11 = vpack.i.bf16 %v8252_v30, %v8250_v46  ;;  %v8258_v8 = vadd.f32 %v6384_v63, %v883_v0 }
 0x2b4   :  { %v6705_v16 = vpop.f32.mrf.mxu1 }
 0x2b5   :  { %v7018_v12 = vpack.i.bf16 %v8258_v8, %v8254_v52  ;;  %7014 = vrot.lane.b32.xlu1 %v7013_v11, %s7823_s24  ;;  %v8264_v42 = vadd.f32 %v6705_v16, %v6384_v63 }
 0x2b6   :  { %v896_v14 = vpop.f32.mrf.mxu1 }
 0x2b7   :  { %7019 = vrot.lane.b32.xlu0 %v7018_v12, %s7823_s24  ;;  %v8268_v19 = vadd.f32 %v6384_v63, %v896_v14 }
 0x2b8   :  { %v6706_v17 = vpop.f32.mrf.mxu1 }
 0x2b9   :  { %v8266_v49 = vadd.f32 %v6706_v17, %v6384_v63 }
 0x2ba   :  { %v899_v22 = vpop.f32.mrf.mxu1 }
 0x2bb   :  { %v7023_v25 = vpack.i.bf16 %v8266_v49, %v8264_v42  ;;  %v8272_v27 = vadd.f32 %v6384_v63, %v899_v22 }
 0x2bd   :  { %v7028_v26 = vpack.i.bf16 %v8272_v27, %v8268_v19  ;;  %v6709_v34 = vpop.f32.mrf.mxu1  ;;  %7024 = vrot.lane.b32.xlu1 %v7023_v25, %s7823_s24 }
 0x2be   :  { %v8278_v60 = vadd.f32 %v6709_v34, %v6384_v63 }
 0x2bf   :  { %v912_v37 = vpop.f32.mrf.mxu1  ;;  %7029 = vrot.lane.b32.xlu0 %v7028_v26, %s7823_s24 }
 0x2c0   :  { %v8282_v45 = vadd.f32 %v6384_v63, %v912_v37 }
 0x2c1   :  { %v6710_v38 = vpop.f32.mrf.mxu1 }
 0x2c2   :  { %v8280_v21 = vadd.f32 %v6710_v38, %v6384_v63 }
 0x2c3   :  { %v915_v20 = vpop.f32.mrf.mxu1 }
 0x2c4   :  { %v7033_v28 = vpack.i.bf16 %v8280_v21, %v8278_v60  ;;  %v8286_v47 = vadd.f32 %v6384_v63, %v915_v20 }
 0x2c5   :  { %v6713_v51 = vpop.f32.mrf.mxu1 }
 0x2c6   :  { %v7038_v1 = vpack.i.bf16 %v8286_v47, %v8282_v45  ;;  %7034 = vrot.lane.b32.xlu1 %v7033_v28, %s7823_s24  ;;  %v8292_v31 = vadd.f32 %v6713_v51, %v6384_v63 }
 0x2c7   :  { %v928_v55 = vpop.f32.mrf.mxu1 }
 0x2c8   :  { %7039 = vrot.lane.b32.xlu0 %v7038_v1, %s7823_s24  ;;  %v8296_v32 = vadd.f32 %v6384_v63, %v928_v55 }
 0x2c9   :  { %v6714_v3 = vpop.f32.mrf.mxu1 }
 0x2ca   :  { %v8294_v2 = vadd.f32 %v6714_v3, %v6384_v63 }
 0x2cb   :  { %v931_v53 = vpop.f32.mrf.mxu1 }
 0x2cc   :  { %v7043_v24 = vpack.i.bf16 %v8294_v2, %v8292_v31  ;;  %v8300_v35 = vadd.f32 %v6384_v63, %v931_v53 }
 0x2cd   :  { %v6717_v5 = vpop.f32.mrf.mxu1 }
 0x2ce   :  { %v7048_v43 = vpack.i.bf16 %v8300_v35, %v8296_v32  ;;  %v8304_v59 = vadd.f32 %v6717_v5, %v6384_v63  ;;  %7044 = vrot.lane.b32.xlu1 %v7043_v24, %s7823_s24 }
 0x2cf   :  { %v944_v33 = vpop.f32.mrf.mxu1 }
 0x2d0   :  { %7049 = vrot.lane.b32.xlu0 %v7048_v43, %s7823_s24  ;;  %v8310_v6 = vadd.f32 %v6384_v63, %v944_v33 }
 0x2d1   :  { %v6718_v54 = vpop.f32.mrf.mxu1 }
 0x2d2   :  { %v8308_v56 = vadd.f32 %v6718_v54, %v6384_v63 }
 0x2d3   :  { %v947_v36 = vpop.f32.mrf.mxu1 }
 0x2d4   :  { %v8312_v57 = vadd.f32 %v6384_v63, %v947_v36  ;;  %v7082_v10 = vpack.i.bf16 %v8308_v56, %v8304_v59 }
 0x2d6   :  { %v7053_v58 = vpack.i.bf16 %v8312_v57, %v8310_v6 }
 0x2d8   :  { %7054 = vrot.lane.b32.xlu1 %v7053_v58, %s7823_s24 }
 0x327   :  { %v7015_v23 = vpop.permute.xlu1 %7014 }
 0x328   :  { %7059 = vxpose.xlu1.b32.start.end [1/1] (short) (narrow) %v7015_v23, 16 }
 0x329   :  { %v7020_v50 = vpop.permute.xlu0 %7019 }
 0x32a   :  { %7071 = vxpose.xlu0.b32.start.end [1/1] (short) (narrow) %v7020_v50, 16 }
 0x32f   :  { %v7025_v40 = vpop.permute.xlu1 %7024 }
 0x331   :  { %v7030_v18 = vpop.permute.xlu0 %7029 }
 0x332   :  { %7088 = vxpose.xlu1.b32.start.end [1/1] (short) (narrow) %v7030_v18, 16 }
 0x337   :  { %7100 = vxpose.xlu1.b32.start.end [1/1] (short) (narrow) %v7025_v40, 16 }
 0x338   :  { %v7035_v61 = vpop.permute.xlu1 %7034 }
 0x33a   :  { %v7040_v9 = vpop.permute.xlu0 %7039 }
 0x33c   :  { %7112 = vxpose.xlu1.b32.start.end [1/1] (short) (narrow) %v7040_v9, 16 }
 0x340   :  { %v7045_v13 = vpop.permute.xlu1 %7044 }
 0x341   :  { %7124 = vxpose.xlu1.b32.start.end [1/1] (short) (narrow) %v7035_v61, 16 }
 0x342   :  { %v7050_v62 = vpop.permute.xlu0 %7049 }
 0x346   :  { %7136 = vxpose.xlu1.b32.start.end [1/1] (short) (narrow) %v7050_v62, 16 }
 0x34a   :  { %v7055_v48 = vpop.permute.xlu1 %7054 }
 0x34b   :  { %7148 = vxpose.xlu1.b32.start.end [1/1] (short) (narrow) %v7045_v13, 16 }
 0x357   :  { %7083 = vrot.lane.b32.xlu0 %v7082_v10, %s7823_s24 }
 0x375   :  { %7160 = vxpose.xlu0.b32.start.end [1/1] (short) (narrow) %v7055_v48, 16 }
 0x3a4   :  { %v7060_v15 = vpop.trf.xlu1 }
 0x3a5   :  { %v7061_v63 = vunpack.i.l.bf16 %v7060_v15  ;;  %v7064_v26 = vunpack.i.h.bf16 %v7060_v15 }
 0x3a6   :  { %v7072_v41 = vpop.trf.xlu0 }
 0x3a7   :  { %v7076_v44 = vunpack.i.h.bf16 %v7072_v41  ;;  %v7073_v4 = vunpack.i.l.bf16 %v7072_v41 }
 0x3a8   :  { %v7065_v7 = vpop.trf.xlu1 }
 0x3a9   :  { %v7066_v0 = vunpack.i.l.bf16 %v7065_v7  ;;  %v7069_v34 = vunpack.i.h.bf16 %v7065_v7 }
 0x3aa   :  { %v7077_v11 = vpop.trf.xlu0 }
 0x3ab   :  { %v7081_v16 = vunpack.i.h.bf16 %v7077_v11  ;;  %v7078_v12 = vunpack.i.l.bf16 %v7077_v11  ;;  %v1681_v22 = vpack.c.bf16 %v7066_v0, %v7061_v63  ;;  %v1682_v28 = vpack.c.bf16 %v7069_v34, %v7064_v26 }
 0x3ad   :  { %v1680_v14 = vpack.c.bf16 %v7081_v16, %v7076_v44  ;;  %v1679_v17 = vpack.c.bf16 %v7078_v12, %v7073_v4 }
 0x3ae   :  { %v7089_v25 = vpop.trf.xlu1 }
 0x3af   :  { %6721 = vmatprep.mubr.msk.bf16.mxu0 %vm1700_vm6, %v1679_v17  ;;  %v7090_v37 = vunpack.i.l.bf16 %v7089_v25  ;;  %v7093_v55 = vunpack.i.h.bf16 %v7089_v25 }
 0x3b0   :  { %6722 = vmatmul.mubr.msk.bf16.vlgmr.msra.gmra.mxu0 %vm1700_vm6, %v1680_v14 }
 0x3b1   :  { %6725 = vmatprep.mubr.msk.bf16.mxu0 %vm1700_vm6, %v1681_v22 }
 0x3b2   :  { %v7094_v38 = vpop.trf.xlu1 }
 0x3b3   :  { %v7095_v20 = vunpack.i.l.bf16 %v7094_v38  ;;  %v7098_v3 = vunpack.i.h.bf16 %v7094_v38 }
 0x3b5   :  { %v1683_v51 = vpack.c.bf16 %v7095_v20, %v7090_v37  ;;  %v1684_v43 = vpack.c.bf16 %v7098_v3, %v7093_v55 }
 0x3b6   :  { %v7101_v1 = vpop.trf.xlu1 }
 0x3b7   :  { %v7102_v53 = vunpack.i.l.bf16 %v7101_v1  ;;  %v7105_v36 = vunpack.i.h.bf16 %v7101_v1 }
 0x3b8   :  { %6726 = vmatmul.mubr.msk.bf16.gmra.mxu0 %vm1700_vm6, %v1682_v28 }
 0x3b9   :  { %6729 = vmatprep.mubr.msk.bf16.mxu0 %vm1700_vm6, %v1683_v51 }
 0x3ba   :  { %v7106_v24 = vpop.trf.xlu1 }
 0x3bb   :  { %v7107_v5 = vunpack.i.l.bf16 %v7106_v24  ;;  %v7110_v58 = vunpack.i.h.bf16 %v7106_v24 }
 0x3bd   :  { %v1685_v33 = vpack.c.bf16 %v7107_v5, %v7102_v53  ;;  %v1686_v18 = vpack.c.bf16 %v7110_v58, %v7105_v36 }
 0x3be   :  { %v7113_v54 = vpop.trf.xlu1 }
 0x3bf   :  { %v7114_v23 = vunpack.i.l.bf16 %v7113_v54  ;;  %v7117_v9 = vunpack.i.h.bf16 %v7113_v54 }
 0x3c0   :  { %6730 = vmatmul.mubr.msk.bf16.gmra.mxu0 %vm1700_vm6, %v1684_v43 }
 0x3c1   :  { %6733 = vmatprep.mubr.msk.bf16.mxu0 %vm1700_vm6, %v1685_v33 }
 0x3c2   :  { %v7118_v50 = vpop.trf.xlu1 }
 0x3c3   :  { %v7119_v39 = vunpack.i.l.bf16 %v7118_v50  ;;  %v7122_v61 = vunpack.i.h.bf16 %v7118_v50 }
 0x3c5   :  { %v1687_v29 = vpack.c.bf16 %v7119_v39, %v7114_v23  ;;  %v1688_v15 = vpack.c.bf16 %v7122_v61, %v7117_v9 }
 0x3c6   :  { %v7125_v40 = vpop.trf.xlu1 }
 0x3c7   :  { %v7126_v13 = vunpack.i.l.bf16 %v7125_v40  ;;  %v7129_v63 = vunpack.i.h.bf16 %v7125_v40 }
 0x3c8   :  { %6734 = vmatmul.mubr.msk.bf16.gmra.mxu0 %vm1700_vm6, %v1686_v18 }
 0x3c9   :  { %v7084_v62 = vpop.permute.xlu0 %7083  ;;  %6737 = vmatprep.mubr.msk.bf16.mxu0 %vm1700_vm6, %v1687_v29 }
 0x3ca   :  { %v7130_v10 = vpop.trf.xlu1  ;;  %7172 = vxpose.xlu1.b32.start.end [1/1] (short) (narrow) %v7084_v62, 16 }
 0x3cb   :  { %v7131_v48 = vunpack.i.l.bf16 %v7130_v10  ;;  %v7134_v7 = vunpack.i.h.bf16 %v7130_v10 }
 0x3cd   :  { %v1689_v41 = vpack.c.bf16 %v7131_v48, %v7126_v13  ;;  %v1690_v16 = vpack.c.bf16 %v7134_v7, %v7129_v63 }
 0x3ce   :  { %v7137_v44 = vpop.trf.xlu1 }
 0x3cf   :  { %v7138_v4 = vunpack.i.l.bf16 %v7137_v44  ;;  %v7141_v17 = vunpack.i.h.bf16 %v7137_v44 }
 0x3d0   :  { %6738 = vmatmul.mubr.msk.bf16.gmra.mxu0 %vm1700_vm6, %v1688_v15 }
 0x3d1   :  { %6741 = vmatprep.mubr.msk.bf16.mxu0 %vm1700_vm6, %v1689_v41 }
 0x3d2   :  { %v7142_v0 = vpop.trf.xlu1 }
 0x3d3   :  { %v7143_v11 = vunpack.i.l.bf16 %v7142_v0  ;;  %v7146_v22 = vunpack.i.h.bf16 %v7142_v0 }
 0x3d5   :  { %v1691_v12 = vpack.c.bf16 %v7143_v11, %v7138_v4  ;;  %v1692_v37 = vpack.c.bf16 %v7146_v22, %v7141_v17 }
 0x3d6   :  { %v7149_v14 = vpop.trf.xlu1 }
 0x3d7   :  { %v7150_v25 = vunpack.i.l.bf16 %v7149_v14  ;;  %v7153_v20 = vunpack.i.h.bf16 %v7149_v14 }
 0x3d8   :  { %6742 = vmatmul.mubr.msk.bf16.gmra.mxu0 %vm1700_vm6, %v1690_v16 }
 0x3d9   :  { %6745 = vmatprep.mubr.msk.bf16.mxu0 %vm1700_vm6, %v1691_v12 }
 0x3da   :  { %v7154_v26 = vpop.trf.xlu1 }
 0x3db   :  { %v7155_v34 = vunpack.i.l.bf16 %v7154_v26  ;;  %v7158_v28 = vunpack.i.h.bf16 %v7154_v26 }
 0x3dd   :  { %v1693_v38 = vpack.c.bf16 %v7155_v34, %v7150_v25  ;;  %v1694_v51 = vpack.c.bf16 %v7158_v28, %v7153_v20 }
 0x3e0   :  { %6746 = vmatmul.mubr.msk.bf16.gmra.mxu0 %vm1700_vm6, %v1692_v37 }
 0x3e1   :  { %6749 = vmatprep.mubr.msk.bf16.mxu0 %vm1700_vm6, %v1693_v38 }
 0x3e8   :  { %6750 = vmatmul.mubr.msk.bf16.gmra.mxu0 %vm1700_vm6, %v1694_v51 }
 0x3f1   :  { %v7161_v1 = vpop.trf.xlu0 }
 0x3f2   :  { %v7165_v55 = vunpack.i.h.bf16 %v7161_v1  ;;  %v7162_v3 = vunpack.i.l.bf16 %v7161_v1 }
 0x3f5   :  { %v7166_v53 = vpop.trf.xlu0 }
 0x3f6   :  { %v7170_v24 = vunpack.i.h.bf16 %v7166_v53  ;;  %v7167_v5 = vunpack.i.l.bf16 %v7166_v53 }
 0x3f8   :  { %v1695_v43 = vpack.c.bf16 %v7167_v5, %v7162_v3  ;;  %v1696_v33 = vpack.c.bf16 %v7170_v24, %v7165_v55 }
 0x3fa   :  { %6753 = vmatprep.mubr.msk.bf16.mxu0 %vm1700_vm6, %v1695_v43 }
 0x3fb   :  { %6754 = vmatmul.mubr.msk.bf16.gmra.mxu0 %vm1700_vm6, %v1696_v33 }
 0x446   :  { %v7173_v54 = vpop.trf.xlu1 }
 0x447   :  { %v7177_v36 = vunpack.i.h.bf16 %v7173_v54  ;;  %v7174_v58 = vunpack.i.l.bf16 %v7173_v54 }
 0x44a   :  { %v7178_v23 = vpop.trf.xlu1 }
 0x44b   :  { %v7182_v50 = vunpack.i.h.bf16 %v7178_v23  ;;  %v7179_v39 = vunpack.i.l.bf16 %v7178_v23 }
 0x44d   :  { %v1697_v18 = vpack.c.bf16 %v7179_v39, %v7174_v58  ;;  %v1698_v29 = vpack.c.bf16 %v7182_v50, %v7177_v36 }
 0x44f   :  { %6757 = vmatprep.mubr.msk.bf16.mxu0 %vm1700_vm6, %v1697_v18 }
 0x450   :  { %6758 = vmatmul.mubr.msk.bf16.gmra.mxu0 %vm1700_vm6, %v1698_v29  ;;  %v8357_v29 = vld [vmem:[%s6328_s1] ss:$0 sm:$0xff]  ;;  %s9482_s1 = sld [smem:[%s9595_s0 + %s7840_s28]]  }
 0x470   :  { %v6723_v40 = vpop.f32.mrf.mxu0 }
 0x471   :  { %1989 = vxpose.xlu1.b32.start [1/2] (short) (narrow) %v6723_v40, 8 }
 0x472   :  { %v8345_v9 = vpop.f32.mrf.mxu0 }
 0x474   :  { %v6724_v61 = vpop.f32.mrf.mxu0 }
 0x475   :  { %1990 = vxpose.xlu1.b32.end [2/2] (short) (narrow) %v6724_v61, 8 }
 0x476   :  { %v8347_v62 = vpop.f32.mrf.mxu0 }
 0x478   :  { %v6727_v13 = vpop.f32.mrf.mxu0 }
 0x479   :  { %2053 = vxpose.xlu1.b32.start [1/2] (short) (narrow) %v6727_v13, 8 }
 0x47a   :  { %v1814_v10 = vpop.f32.mrf.mxu0 }
 0x47c   :  { %v6728_v48 = vpop.f32.mrf.mxu0 }
 0x47d   :  { %2054 = vxpose.xlu1.b32.end [2/2] (short) (narrow) %v6728_v48, 8 }
 0x47e   :  { %v1817_v15 = vpop.f32.mrf.mxu0 }
 0x480   :  { %v6731_v41 = vpop.f32.mrf.mxu0 }
 0x481   :  { %2021 = vxpose.xlu1.b32.start [1/2] (short) (narrow) %v1814_v10, 8 }
 0x482   :  { %v1830_v44 = vpop.f32.mrf.mxu0 }
 0x483   :  { %2085 = vxpose.xlu0.b32.start [1/2] (short) (narrow) %v1830_v44, 8 }
 0x484   :  { %v6732_v63 = vpop.f32.mrf.mxu0 }
 0x485   :  { %2022 = vxpose.xlu1.b32.end [2/2] (short) (narrow) %v1817_v15, 8 }
 0x486   :  { %v1833_v7 = vpop.f32.mrf.mxu0 }
 0x487   :  { %2086 = vxpose.xlu0.b32.end [2/2] (short) (narrow) %v1833_v7, 8 }
 0x488   :  { %v6735_v4 = vpop.f32.mrf.mxu0 }
 0x489   :  { %2117 = vxpose.xlu1.b32.start [1/2] (short) (narrow) %v6731_v41, 8 }
 0x48a   :  { %v1846_v0 = vpop.f32.mrf.mxu0 }
 0x48b   :  { %2181 = vxpose.xlu0.b32.start [1/2] (short) (narrow) %v6735_v4, 8 }
 0x48c   :  { %v6736_v11 = vpop.f32.mrf.mxu0 }
 0x48d   :  { %2118 = vxpose.xlu1.b32.end [2/2] (short) (narrow) %v6732_v63, 8 }
 0x48e   :  { %v1849_v16 = vpop.f32.mrf.mxu0 }
 0x48f   :  { %2182 = vxpose.xlu0.b32.end [2/2] (short) (narrow) %v6736_v11, 8 }
 0x490   :  { %v6739_v12 = vpop.f32.mrf.mxu0 }
 0x491   :  { %2149 = vxpose.xlu1.b32.start [1/2] (short) (narrow) %v1846_v0, 8 }
 0x492   :  { %v1862_v14 = vpop.f32.mrf.mxu0 }
 0x493   :  { %2245 = vxpose.xlu0.b32.start [1/2] (short) (narrow) %v6739_v12, 8 }
 0x494   :  { %v6740_v17 = vpop.f32.mrf.mxu0 }
 0x495   :  { %2150 = vxpose.xlu1.b32.end [2/2] (short) (narrow) %v1849_v16, 8 }
 0x496   :  { %v1865_v22 = vpop.f32.mrf.mxu0 }
 0x497   :  { %2246 = vxpose.xlu0.b32.end [2/2] (short) (narrow) %v6740_v17, 8 }
 0x498   :  { %v6743_v25 = vpop.f32.mrf.mxu0 }
 0x499   :  { %2213 = vxpose.xlu1.b32.start [1/2] (short) (narrow) %v1862_v14, 8 }
 0x49a   :  { %v8349_v26 = vpop.f32.mrf.mxu0 }
 0x49c   :  { %v6744_v34 = vpop.f32.mrf.mxu0 }
 0x49d   :  { %2214 = vxpose.xlu1.b32.end [2/2] (short) (narrow) %v1865_v22, 8 }
 0x49e   :  { %v8351_v37 = vpop.f32.mrf.mxu0 }
 0x4a0   :  { %v6747_v38 = vpop.f32.mrf.mxu0 }
 0x4a1   :  { %2309 = vxpose.xlu1.b32.start [1/2] (short) (narrow) %v6743_v25, 8 }
 0x4a2   :  { %v1894_v20 = vpop.f32.mrf.mxu0 }
 0x4a3   :  { %2341 = vxpose.xlu0.b32.start [1/2] (short) (narrow) %v1894_v20, 8 }
 0x4a4   :  { %v6748_v28 = vpop.f32.mrf.mxu0 }
 0x4a5   :  { %2310 = vxpose.xlu1.b32.end [2/2] (short) (narrow) %v6744_v34, 8 }
 0x4a6   :  { %v1897_v51 = vpop.f32.mrf.mxu0 }
 0x4a7   :  { %2342 = vxpose.xlu0.b32.end [2/2] (short) (narrow) %v1897_v51, 8 }
 0x4a8   :  { %v6751_v1 = vpop.f32.mrf.mxu0 }
 0x4a9   :  { %2373 = vxpose.xlu1.b32.start [1/2] (short) (narrow) %v6747_v38, 8 }
 0x4aa   :  { %v1910_v55 = vpop.f32.mrf.mxu0 }
 0x4ab   :  { %2405 = vxpose.xlu0.b32.start [1/2] (short) (narrow) %v1910_v55, 8 }
 0x4ac   :  { %v6752_v3 = vpop.f32.mrf.mxu0 }
 0x4ad   :  { %2374 = vxpose.xlu1.b32.end [2/2] (short) (narrow) %v6748_v28, 8 }
 0x4ae   :  { %v1913_v53 = vpop.f32.mrf.mxu0 }
 0x4af   :  { %2406 = vxpose.xlu0.b32.end [2/2] (short) (narrow) %v1913_v53, 8 }
 0x4b1   :  { %2437 = vxpose.xlu1.b32.start [1/2] (short) (narrow) %v6751_v1, 8 }
 0x4b5   :  { %2438 = vxpose.xlu1.b32.end [2/2] (short) (narrow) %v6752_v3, 8 }
 0x4bb   :  { %v6755_v24 = vpop.f32.mrf.mxu0 }
 0x4bc   :  { %2501 = vxpose.xlu1.b32.start [1/2] (short) (narrow) %v6755_v24, 8 }
 0x4bd   :  { %v1926_v5 = vpop.f32.mrf.mxu0 }
 0x4be   :  { %2469 = vxpose.xlu0.b32.start [1/2] (short) (narrow) %v1926_v5, 8 }
 0x4bf   :  { %v6756_v43 = vpop.f32.mrf.mxu0 }
 0x4c0   :  { %2502 = vxpose.xlu1.b32.end [2/2] (short) (narrow) %v6756_v43, 8 }
 0x4c1   :  { %v1929_v33 = vpop.f32.mrf.mxu0 }
 0x4c2   :  { %2470 = vxpose.xlu0.b32.end [2/2] (short) (narrow) %v1929_v33, 8 }
 0x4ed   :  { %v2005_v50 = vpop.trf.xlu1 }
 0x4f5   :  { %v2069_v39 = vpop.trf.xlu1 }
 0x4f6   :  { %v2607_v10 = vadd.f32 %v8357_v29, %v2069_v39 }
 0x4f8   :  { %v2627_v44 = vadd.f32 %v2607_v10, %v8252_v30 }
 0x4fa   :  { %v8368_v0 = vmax.f32 %v2627_v44, 0.0 }
 0x4fd   :  { %v2037_v18 = vpop.trf.xlu1 }
 0x4fe   :  { %v2606_v40 = vadd.f32 %v8357_v29, %v2037_v18 }
 0x4ff   :  { %v2101_v61 = vpop.trf.xlu0 }
 0x500   :  { %v2626_v48 = vadd.f32 %v2606_v40, %v8250_v46  ;;  %v2608_v15 = vadd.f32 %v8357_v29, %v2101_v61 }
 0x502   :  { %v8364_v63 = vmax.f32 %v2626_v48, 0.0  ;;  %v2628_v7 = vadd.f32 %v2608_v15, %v8268_v19  ;;  %v2605_v19 = vadd.f32 %v8357_v29, %v2005_v50 }
 0x504   :  { %v8371_v12 = vmax.f32 %v2628_v7, 0.0  ;;  %v7188_v14 = vpack.i.bf16 %v8368_v0, %v8364_v63 }
 0x505   :  { %v2133_v13 = vpop.trf.xlu1 }
 0x506   :  { %v2609_v11 = vadd.f32 %v8357_v29, %v2133_v13  ;;  %v7193_v25 = vpack.i.bf16 %v8371_v12, %v8368_v0 }
 0x507   :  { %v2197_v16 = vpop.trf.xlu0 }
 0x508   :  { %v2629_v30 = vadd.f32 %v2609_v11, %v8272_v27  ;;  %v2611_v17 = vadd.f32 %v8357_v29, %v2197_v16  ;;  %v8389_v27 = vadd.f32 %v2605_v19, %v8258_v8 }
 0x50a   :  { %v8384_v34 = vmax.f32 %v2629_v30, 0.0  ;;  %v2645_v55 = vmax.f32 %v8389_v27, 0.0 }
 0x50c   :  { %v7183_v8 = vpack.i.bf16 %v8364_v63, %v2645_v55 }
 0x50d   :  { %v2165_v41 = vpop.trf.xlu1 }
 0x50e   :  { %v2610_v4 = vadd.f32 %v8357_v29, %v2165_v41 }
 0x50f   :  { %v2261_v1 = vpop.trf.xlu0 }
 0x510   :  { %v6759_v54 = vpop.f32.mrf.mxu0  ;;  %v2630_v46 = vadd.f32 %v2610_v4, %v8264_v42  ;;  %v2631_v42 = vadd.f32 %v2611_v17, %v8266_v49  ;;  %v2613_v5 = vadd.f32 %v8357_v29, %v2261_v1  ;;  %v7451_v1 = vld [vmem:[%s6329_s7 + $0x8] sm:$0xff]  }
 0x511   :  { %2565 = vxpose.xlu1.b32.start [1/2] (short) (narrow) %v6759_v54, 8  ;;  %v7198_v54 = vpack.i.bf16 %v8384_v34, %v8371_v12 }
 0x512   :  { %v1942_v36 = vpop.f32.mrf.mxu0  ;;  %v8380_v22 = vmax.f32 %v2630_v46, 0.0  ;;  %v8394_v51 = vmax.f32 %v2631_v42, 0.0 }
 0x513   :  { %2533 = vxpose.xlu0.b32.start [1/2] (short) (narrow) %v1942_v36, 8  ;;  %v8413_v36 = vadd.f32 %v2613_v5, %v8286_v47 }
 0x514   :  { %v6760_v58 = vpop.f32.mrf.mxu0  ;;  %v7203_v20 = vpack.i.bf16 %v8380_v22, %v8384_v34  ;;  %v7208_v49 = vpack.i.bf16 %v8394_v51, %v8380_v22 }
 0x515   :  { %2566 = vxpose.xlu1.b32.end [2/2] (short) (narrow) %v6760_v58, 8  ;;  %v2229_v38 = vpop.trf.xlu1  ;;  %v2653_v40 = vmax.f32 %v8413_v36, 0.0 }
 0x516   :  { %v1945_v23 = vpop.f32.mrf.mxu0  ;;  %v2612_v28 = vadd.f32 %v8357_v29, %v2229_v38 }
 0x517   :  { %2534 = vxpose.xlu0.b32.end [2/2] (short) (narrow) %v1945_v23, 8 }
 0x518   :  { %v2632_v3 = vadd.f32 %v2612_v28, %v8282_v45 }
 0x51a   :  { %v8407_v43 = vmax.f32 %v2632_v3, 0.0 }
 0x51c   :  { %v7213_v39 = vpack.i.bf16 %v8407_v43, %v8394_v51 }
 0x51d   :  { %v2325_v53 = vpop.trf.xlu1 }
 0x51e   :  { %v2615_v58 = vadd.f32 %v8357_v29, %v2325_v53 }
 0x51f   :  { %v2357_v24 = vpop.trf.xlu0 }
 0x520   :  { %v2616_v33 = vadd.f32 %v8357_v29, %v2357_v24  ;;  %v8423_v61 = vadd.f32 %v2615_v58, %v8280_v21 }
 0x522   :  { %v2636_v23 = vadd.f32 %v2616_v33, %v8296_v32  ;;  %v7218_v32 = vpack.i.bf16 %v2653_v40, %v8407_v43  ;;  %v2655_v15 = vmax.f32 %v8423_v61, 0.0 }
 0x524   :  { %v8426_v47 = vmax.f32 %v2636_v23, 0.0 }
 0x525   :  { %v2389_v45 = vpop.trf.xlu1 }
 0x526   :  { %v2617_v50 = vadd.f32 %v8357_v29, %v2389_v45 }
 0x527   :  { %v2421_v18 = vpop.trf.xlu0 }
 0x528   :  { %v2637_v13 = vadd.f32 %v2617_v50, %v8300_v35  ;;  %v2618_v10 = vadd.f32 %v8357_v29, %v2421_v18  ;;  %v7223_v35 = vpack.i.bf16 %v8426_v47, %v2655_v15 }
 0x52a   :  { %v8435_v41 = vmax.f32 %v2637_v13, 0.0  ;;  %v2638_v21 = vadd.f32 %v2618_v10, %v8292_v31 }
 0x52c   :  { %v8443_v4 = vmax.f32 %v2638_v21, 0.0  ;;  %v7228_v46 = vpack.i.bf16 %v8435_v41, %v8426_v47 }
 0x52d   :  { %v2453_v48 = vpop.trf.xlu1 }
 0x52e   :  { %v2619_v44 = vadd.f32 %v8357_v29, %v2453_v48  ;;  %v7233_v17 = vpack.i.bf16 %v8443_v4, %v8435_v41 }
 0x530   :  { %v2639_v11 = vadd.f32 %v2619_v44, %v8294_v2 }
 0x533   :  { %7189 = vrot.lane.b32.xlu1 %v7188_v14, %s7825_s2  ;;  %v8450_v14 = vmax.f32 %v2639_v11, 0.0 }
 0x537   :  { %7194 = vrot.lane.b32.xlu1 %v7193_v25, %s7826_s3  ;;  %v7238_v25 = vpack.i.bf16 %v8450_v14, %v8443_v4 }
 0x538   :  { %v2517_v31 = vpop.trf.xlu1 }
 0x539   :  { %v2621_v19 = vadd.f32 %v8357_v29, %v2517_v31 }
 0x53a   :  { %v2485_v7 = vpop.trf.xlu0 }
 0x53b   :  { %7204 = vrot.lane.b32.xlu1 %v7203_v20, %s7826_s3  ;;  %v2620_v16 = vadd.f32 %v8357_v29, %v2485_v7  ;;  %v2641_v42 = vadd.f32 %v2621_v19, %v8312_v57  ;;  %v7450_v20 = vld [vmem:[%s6329_s7 + $0x10] sm:$0xff]   ;;  %v7452_v57 = vld [vmem:[%s6329_s7] sm:$0xff]   ;;  %s9495_s7 = sld [smem:[%s9595_s0 + %s7841_s4]]  }
 0x53c   :  { %6761 = vmatprep.subr.bf16.mxu1 %v7450_v20 }
 0x53d   :  { %v2640_v30 = vadd.f32 %v2620_v16, %v8310_v6  ;;  %v8468_v38 = vmax.f32 %v2641_v42, 0.0  ;;  %6762 = vmatpush3.bf16.msra.mxu1 %v7450_v20 }
 0x53e   :  { %6763 = vmatprep.subr.bf16.mxu1 %v7451_v1 }
 0x53f   :  { %7209 = vrot.lane.b32.xlu1 %v7208_v49, %s7825_s2  ;;  %v8457_v2 = vmax.f32 %v2640_v30, 0.0 }
 0x540   :  { %7184 = vrot.lane.b32.xlu0 %v7183_v8, %s7826_s3 }
 0x541   :  { %v7243_v6 = vpack.i.bf16 %v8457_v2, %v8450_v14  ;;  %v7248_v28 = vpack.i.bf16 %v8468_v38, %v8457_v2  ;;  %6764 = vmatpush3.bf16.msra.mxu1 %v7451_v1 }
 0x542   :  { %6765 = vmatprep.subr.bf16.mxu1 %v7452_v57 }
 0x544   :  { %7199 = vrot.lane.b32.xlu0 %v7198_v54, %s7825_s2 }
 0x545   :  { %6766 = vmatpush3.bf16.msra.mxu1 %v7452_v57 }
 0x548   :  { %7214 = vrot.lane.b32.xlu0 %v7213_v39, %s7826_s3 }
 0x54c   :  { %7219 = vrot.lane.b32.xlu0 %v7218_v32, %s7825_s2 }
 0x550   :  { %7224 = vrot.lane.b32.xlu0 %v7223_v35, %s7826_s3 }
 0x554   :  { %7229 = vrot.lane.b32.xlu0 %v7228_v46, %s7825_s2 }
 0x558   :  { %7234 = vrot.lane.b32.xlu0 %v7233_v17, %s7826_s3 }
 0x55c   :  { %7239 = vrot.lane.b32.xlu0 %v7238_v25, %s7825_s2 }
 0x560   :  { %7244 = vrot.lane.b32.xlu0 %v7243_v6, %s7826_s3 }
 0x564   :  { %7249 = vrot.lane.b32.xlu0 %v7248_v28, %s7825_s2 }
 0x568   :  { %1957 = vxpose.xlu1.b32.start [1/2] (short) (narrow) %v8345_v9, 8 }
 0x56c   :  { %1958 = vxpose.xlu1.b32.end [2/2] (short) (narrow) %v8347_v62, 8 }
 0x58d   :  { %v2581_v49 = vpop.trf.xlu1 }
 0x58e   :  { %v2623_v8 = vadd.f32 %v8357_v29, %v2581_v49 }
 0x58f   :  { %v2549_v3 = vpop.trf.xlu0 }
 0x590   :  { %v2622_v53 = vadd.f32 %v8357_v29, %v2549_v3  ;;  %v8480_v5 = vadd.f32 %v2623_v8, %v8308_v56 }
 0x592   :  { %v2642_v24 = vadd.f32 %v2622_v53, %v8304_v59  ;;  %v2663_v62 = vmax.f32 %v8480_v5, 0.0 }
 0x594   :  { %v8482_v33 = vmax.f32 %v2642_v24, 0.0 }
 0x596   :  { %v7253_v9 = vpack.i.bf16 %v8482_v33, %v8468_v38  ;;  %v7258_v54 = vpack.i.bf16 %v2663_v62, %v8482_v33 }
 0x598   :  { %7254 = vrot.lane.b32.xlu0 %v7253_v9, %s7826_s3 }
 0x59c   :  { %7259 = vrot.lane.b32.xlu0 %v7258_v54, %s7825_s2 }
 0x5a5   :  { %v7190_v59 = vpop.permute.xlu1 %7189 }
 0x5a6   :  { %v7192_v16 = vunpack.i.h.bf16 %v7190_v59  ;;  %v7191_v17 = vunpack.i.l.bf16 %v7190_v59 }
 0x5a9   :  { %v7195_v56 = vpop.permute.xlu1 %7194 }
 0x5aa   :  { %v7197_v10 = vunpack.i.h.bf16 %v7195_v56  ;;  %v7196_v32 = vunpack.i.l.bf16 %v7195_v56 }
 0x5ac   :  { %v2782_v19 = vsel %vm2778_vm7, %v8368_v0, %v7197_v10  ;;  %v2781_v25 = vsel %vm2778_vm7, %v8364_v63, %v7196_v32 }
 0x5ad   :  { %v7205_v45 = vpop.permute.xlu1 %7204 }
 0x5ae   :  { %v7207_v48 = vunpack.i.h.bf16 %v7205_v45  ;;  %v7206_v44 = vunpack.i.l.bf16 %v7205_v45 }
 0x5b0   :  { %v2783_v42 = vsel %vm2778_vm7, %v8371_v12, %v7206_v44 }
 0x5b1   :  { %v7210_v23 = vpop.permute.xlu1 %7209 }
 0x5b2   :  { %v7185_v58 = vpop.permute.xlu0 %7184  ;;  %v7212_v7 = vunpack.i.h.bf16 %v7210_v23  ;;  %v7211_v11 = vunpack.i.l.bf16 %v7210_v23 }
 0x5b3   :  { %v7187_v18 = vunpack.i.h.bf16 %v7185_v58  ;;  %v7186_v31 = vunpack.i.l.bf16 %v7185_v58 }
 0x5b4   :  { %v2800_v20 = vsel %vm2795_vm8, %v2783_v42, %v7211_v11 }
 0x5b5   :  { %v2780_v46 = vsel %vm2778_vm7, %v2645_v55, %v7187_v18 }
 0x5b6   :  { %v7200_v50 = vpop.permute.xlu0 %7199  ;;  %v2797_v49 = vsel %vm2795_vm8, %v2780_v46, %v7192_v16 }
 0x5b7   :  { %v7202_v35 = vunpack.i.h.bf16 %v7200_v50 }
 0x5b9   :  { %v2799_v6 = vsel %vm2795_vm8, %v2782_v19, %v7202_v35 }
 0x5ba   :  { %2277 = vxpose.xlu0.b32.start [1/2] (short) (narrow) %v8349_v26, 8  ;;  %v7215_v21 = vpop.permute.xlu0 %7214  ;;  %v7201_v26 = vunpack.i.l.bf16 %v7200_v50 }
 0x5bb   :  { %v7217_v53 = vunpack.i.h.bf16 %v7215_v21  ;;  %v7216_v24 = vunpack.i.l.bf16 %v7215_v21 }
 0x5bc   :  { %v2798_v27 = vsel %vm2795_vm8, %v2781_v25, %v7201_v26 }
 0x5bd   :  { %v2813_v8 = vpack.c.bf16 %v2799_v6, %v2798_v27  ;;  %v2786_v56 = vsel %vm2778_vm7, %v8394_v51, %v7217_v53  ;;  %v2785_v45 = vsel %vm2778_vm7, %v8380_v22, %v7216_v24 }
 0x5be   :  { %2278 = vxpose.xlu0.b32.end [2/2] (short) (narrow) %v8351_v37, 8  ;;  %v7220_v1 = vpop.permute.xlu0 %7219 }
 0x5bf   :  { %v7222_v9 = vunpack.i.h.bf16 %v7220_v1  ;;  %v7221_v54 = vunpack.i.l.bf16 %v7220_v1 }
 0x5c1   :  { %v2802_v58 = vsel %vm2795_vm8, %v2785_v45, %v7221_v54  ;;  %v2803_v23 = vsel %vm2795_vm8, %v2786_v56, %v7222_v9 }
 0x5c2   :  { %v2815_v50 = vpack.c.bf16 %v2803_v23, %v2802_v58 }
 0x5e4   :  { %v1973_v39 = vpop.trf.xlu1 }
 0x5e5   :  { %v2604_v13 = vadd.f32 %v8357_v29, %v1973_v39  ;;  %v7225_v39 = vpop.permute.xlu0 %7224 }
 0x5e6   :  { %v7226_v42 = vunpack.i.l.bf16 %v7225_v39 }
 0x5e7   :  { %v2624_v37 = vadd.f32 %v2604_v13, %v8254_v52  ;;  %v2784_v52 = vsel %vm2778_vm7, %v8384_v34, %v7207_v48 }
 0x5e8   :  { %v2801_v28 = vsel %vm2795_vm8, %v2784_v52, %v7212_v7  ;;  %v7227_v7 = vunpack.i.h.bf16 %v7225_v39 }
 0x5e9   :  { %v2644_v30 = vmax.f32 %v2624_v37, 0.0  ;;  %v2814_v59 = vpack.c.bf16 %v2801_v28, %v2800_v20  ;;  %v7230_v18 = vpop.permute.xlu0 %7229 }
 0x5ea   :  { %v7232_v19 = vunpack.i.h.bf16 %v7230_v18 }
 0x5eb   :  { %v2779_v55 = vsel %vm2778_vm7, %v2644_v30, %v7186_v31 }
 0x5ec   :  { %v2796_v57 = vsel %vm2795_vm8, %v2779_v55, %v7191_v17  ;;  %v7231_v55 = vunpack.i.l.bf16 %v7230_v18 }
 0x5ed   :  { %v2812_v3 = vpack.c.bf16 %v2797_v49, %v2796_v57  ;;  %v7235_v13 = vpop.permute.xlu0 %7234 }
 0x5ee   :  { %v7236_v26 = vunpack.i.l.bf16 %v7235_v13  ;;  %v7237_v11 = vunpack.i.h.bf16 %v7235_v13  ;;  %v8557_v13 = vld [vmem:[%s6330_s11] ss:$0 sm:$0xff]  ;;  %s7843_s11 = smov 25  }
 0x5ef   :  { %6767 = vmatprep.mubr.msk.bf16.mxu1 %vm2851_vm9, %v2812_v3 }
 0x5f0   :  { %6768 = vmatmul.mubr.msk.bf16.vlgmr.msra.gmra.mxu1 %vm2851_vm9, %v2813_v8  ;;  %v2789_v6 = vsel %vm2778_vm7, %v8426_v47, %v7236_v26  ;;  %v2790_v20 = vsel %vm2778_vm7, %v8435_v41, %v7237_v11 }
 0x5f1   :  { %6771 = vmatprep.mubr.msk.bf16.mxu1 %vm2851_vm9, %v2814_v59  ;;  %v7240_v10 = vpop.permute.xlu0 %7239 }
 0x5f2   :  { %v7241_v16 = vunpack.i.l.bf16 %v7240_v10  ;;  %v7242_v46 = vunpack.i.h.bf16 %v7240_v10 }
 0x5f4   :  { %v2806_v28 = vsel %vm2795_vm8, %v2789_v6, %v7241_v16 }
 0x5f5   :  { %v7245_v32 = vpop.permute.xlu0 %7244 }
 0x5f6   :  { %v7247_v31 = vunpack.i.h.bf16 %v7245_v32  ;;  %v7246_v30 = vunpack.i.l.bf16 %v7245_v32 }
 0x5f8   :  { %6772 = vmatmul.mubr.msk.bf16.gmra.mxu1 %vm2851_vm9, %v2815_v50  ;;  %v2792_v1 = vsel %vm2778_vm7, %v8450_v14, %v7247_v31  ;;  %v2791_v57 = vsel %vm2778_vm7, %v8443_v4, %v7246_v30 }
 0x5f9   :  { %v7250_v48 = vpop.permute.xlu0 %7249 }
 0x5fa   :  { %v7252_v25 = vunpack.i.h.bf16 %v7250_v48  ;;  %v7251_v52 = vunpack.i.l.bf16 %v7250_v48 }
 0x5fc   :  { %v2809_v3 = vsel %vm2795_vm8, %v2792_v1, %v7252_v25 }
 0x60a   :  { %v7255_v21 = vpop.permute.xlu0 %7254 }
 0x60b   :  { %v7257_v24 = vunpack.i.h.bf16 %v7255_v21  ;;  %v7256_v9 = vunpack.i.l.bf16 %v7255_v21 }
 0x60d   :  { %v2794_v58 = vsel %vm2778_vm7, %v8468_v38, %v7257_v24  ;;  %v2793_v23 = vsel %vm2778_vm7, %v8457_v2, %v7256_v9 }
 0x60e   :  { %v7260_v44 = vpop.permute.xlu0 %7259 }
 0x60f   :  { %v7262_v59 = vunpack.i.h.bf16 %v7260_v44  ;;  %v7261_v56 = vunpack.i.l.bf16 %v7260_v44 }
 0x611   :  { %v2810_v50 = vsel %vm2795_vm8, %v2793_v23, %v7261_v56  ;;  %v2811_v39 = vsel %vm2795_vm8, %v2794_v58, %v7262_v59 }
 0x612   :  { %v2819_v18 = vpack.c.bf16 %v2811_v39, %v2810_v50 }
 0x636   :  { %v2293_v35 = vpop.trf.xlu0 }
 0x637   :  { %v2614_v37 = vadd.f32 %v8357_v29, %v2293_v35  ;;  %v2788_v29 = vsel %vm2778_vm7, %v2655_v15, %v7227_v7  ;;  %v2808_v15 = vsel %vm2795_vm8, %v2791_v57, %v7251_v52 }
 0x638   :  { %v2805_v61 = vsel %vm2795_vm8, %v2788_v29, %v7232_v19  ;;  %v2818_v45 = vpack.c.bf16 %v2809_v3, %v2808_v15  ;;  %v2980_v29 = vsel %vm2778_vm7, %v2653_v40, 0.0 }
 0x639   :  { %v2634_v17 = vadd.f32 %v2614_v37, %v8278_v60  ;;  %v2807_v60 = vsel %vm2795_vm8, %v2790_v20, %v7242_v46 }
 0x63a   :  { %v2817_v54 = vpack.c.bf16 %v2807_v60, %v2806_v28 }
 0x63b   :  { %v2654_v27 = vmax.f32 %v2634_v17, 0.0  ;;  %v2979_v17 = vsel %vm2778_vm7, %v8407_v43, 0.0 }
 0x63d   :  { %v2787_v49 = vsel %vm2778_vm7, %v2654_v27, %v7226_v42 }
 0x63e   :  { %v2804_v8 = vsel %vm2795_vm8, %v2787_v49, %v7231_v55 }
 0x63f   :  { %v2816_v53 = vpack.c.bf16 %v2805_v61, %v2804_v8 }
 0x641   :  { %6775 = vmatprep.mubr.msk.bf16.mxu1 %vm2851_vm9, %v2816_v53 }
 0x642   :  { %6776 = vmatmul.mubr.msk.bf16.gmra.mxu1 %vm2851_vm9, %v2817_v54 }
 0x643   :  { %6779 = vmatprep.mubr.msk.bf16.mxu1 %vm2851_vm9, %v2818_v45 }
 0x64a   :  { %6780 = vmatmul.mubr.msk.bf16.gmra.mxu1 %vm2851_vm9, %v2819_v18 }
 0x6b0   :  { %v6769_v10 = vpop.f32.mrf.mxu1 }
 0x6b1   :  { %v8560_v32 = vadd.f32 %v6769_v10, %v8557_v13 }
 0x6b2   :  { %v2910_v48 = vpop.f32.mrf.mxu1 }
 0x6b3   :  { %v6434_v21 = vmul.f32 -1.442695, %v8560_v32  ;;  %v8564_v44 = vadd.f32 %v8557_v13, %v2910_v48 }
 0x6b4   :  { %v6770_v35 = vpop.f32.mrf.mxu1 }
 0x6b5   :  { %7612 = vpow2.f32 %v6434_v21  ;;  %v6432_v26 = vmul.f32 -1.442695, %v8564_v44  ;;  %v8568_v37 = vadd.f32 %v6770_v35, %v8557_v13 }
 0x6b6   :  { %v2913_v7 = vpop.f32.mrf.mxu1 }
 0x6b7   :  { %7614 = vpow2.f32 %v6432_v26  ;;  %v6435_v11 = vmul.f32 -1.442695, %v8568_v37  ;;  %v8572_v16 = vadd.f32 %v8557_v13, %v2913_v7 }
 0x6b8   :  { %v6773_v46 = vpop.f32.mrf.mxu1 }
 0x6b9   :  { %7616 = vpow2.f32 %v6435_v11  ;;  %v6433_v31 = vmul.f32 -1.442695, %v8572_v16  ;;  %v2935_v30 = vadd.f32 %v6773_v46, %v8557_v13 }
 0x6ba   :  { %v2926_v19 = vpop.f32.mrf.mxu1 }
 0x6bb   :  { %7618 = vpow2.f32 %v6433_v31  ;;  %v8578_v25 = vadd.f32 %v2979_v17, %v2935_v30  ;;  %v6438_v52 = vmul.f32 -1.442695, %v2935_v30  ;;  %v8581_v42 = vadd.f32 %v8557_v13, %v2926_v19 }
 0x6bc   :  { %v6774_v6 = vpop.f32.mrf.mxu1 }
 0x6bd   :  { %v2938_v27 = vadd.f32 %v6774_v6, %v8557_v13  ;;  %7620 = vpow2.f32 %v6438_v52  ;;  %v6436_v55 = vmul.f32 -1.442695, %v8581_v42 }
 0x6be   :  { %v2929_v43 = vpop.f32.mrf.mxu1 }
 0x6bf   :  { %v8588_v20 = vadd.f32 %v2980_v29, %v2938_v27  ;;  %v6439_v60 = vmul.f32 -1.442695, %v2938_v27  ;;  %v8591_v1 = vadd.f32 %v8557_v13, %v2929_v43  ;;  %7622 = vpow2.f32 %v6436_v55 }
 0x6c0   :  { %v2987_v55 = vsel %vm2778_vm7, %v8482_v33, 0.0  ;;  %v2988_v33 = vsel %vm2778_vm7, %v2663_v62, 0.0 }
 0x6c1   :  { %v6437_v36 = vmul.f32 -1.442695, %v8591_v1 }
 0x6c2   :  { %v7613_v28 = vpop.eup %7612 }
 0x6c3   :  { %v3055_v57 = vadd.f32 1.0, %v7613_v28 }
 0x6c4   :  { %v7615_v49 = vpop.eup %7614 }
 0x6c5   :  { %7624 = vrcp.f32 %v3055_v57  ;;  %v3053_v61 = vadd.f32 1.0, %v7615_v49 }
 0x6c6   :  { %v7617_v15 = vpop.eup %7616  ;;  %7626 = vpow2.f32 %v6439_v60 }
 0x6c7   :  { %7628 = vrcp.f32 %v3053_v61  ;;  %v3056_v40 = vadd.f32 1.0, %v7617_v15 }
 0x6c8   :  { %v7619_v3 = vpop.eup %7618  ;;  %7630 = vpow2.f32 %v6437_v36 }
 0x6c9   :  { %7632 = vrcp.f32 %v3056_v40  ;;  %v3054_v8 = vadd.f32 1.0, %v7619_v3 }
 0x6ca   :  { %v7621_v53 = vpop.eup %7620 }
 0x6cb   :  { %7634 = vrcp.f32 %v3054_v8  ;;  %v3059_v24 = vadd.f32 1.0, %v7621_v53 }
 0x6cc   :  { %v7623_v9 = vpop.eup %7622 }
 0x6cd   :  { %7636 = vrcp.f32 %v3059_v24  ;;  %v3057_v56 = vadd.f32 1.0, %v7623_v9 }
 0x6cf   :  { %7638 = vrcp.f32 %v3057_v56 }
 0x6d2   :  { %v7625_v54 = vpop.eup %7624 }
 0x6d3   :  { %v7627_v59 = vpop.eup %7626  ;;  %3121 = vrot.lane.b32.xlu0 %v7625_v54, %s7821_s19 }
 0x6d4   :  { %v7629_v45 = vpop.eup %7628  ;;  %v3060_v23 = vadd.f32 1.0, %v7627_v59 }
 0x6d5   :  { %3117 = vrot.lane.b32.xlu1 %v7629_v45, %s7821_s19  ;;  %v7631_v58 = vpop.eup %7630 }
 0x6d6   :  { %v7633_v50 = vpop.eup %7632  ;;  %7640 = vrcp.f32 %v3060_v23  ;;  %v3058_v39 = vadd.f32 1.0, %v7631_v58 }
 0x6d8   :  { %v7635_v18 = vpop.eup %7634  ;;  %7642 = vrcp.f32 %v3058_v39 }
 0x6d9   :  { %3123 = vrot.lane.b32.xlu1 %v7633_v50, %s7821_s19 }
 0x6da   :  { %v7637_v10 = vpop.eup %7636 }
 0x6dc   :  { %v7639_v48 = vpop.eup %7638 }
 0x6dd   :  { %3119 = vrot.lane.b32.xlu1 %v7635_v18, %s7821_s19 }
 0x6e1   :  { %3129 = vrot.lane.b32.xlu1 %v7637_v10, %s7821_s19 }
 0x6e3   :  { %v7641_v21 = vpop.eup %7640 }
 0x6e5   :  { %3125 = vrot.lane.b32.xlu1 %v7639_v48, %s7821_s19  ;;  %v7643_v35 = vpop.eup %7642 }
 0x6e9   :  { %3131 = vrot.lane.b32.xlu1 %v7641_v21, %s7821_s19 }
 0x6ed   :  { %3127 = vrot.lane.b32.xlu1 %v7643_v35, %s7821_s19 }
 0x702   :  { %v6777_v26 = vpop.f32.mrf.mxu1 }
 0x703   :  { %v8603_v7 = vadd.f32 %v6777_v26, %v8557_v13  ;;  %v2975_v26 = vsel %vm2778_vm7, %v8371_v12, 0.0  ;;  %v2974_v12 = vsel %vm2778_vm7, %v8368_v0, 0.0 }
 0x704   :  { %v8605_v11 = vpop.f32.mrf.mxu1 }
 0x705   :  { %v6442_v46 = vmul.f32 -1.442695, %v8603_v7 }
 0x706   :  { %v6778_v31 = vpop.f32.mrf.mxu1 }
 0x707   :  { %7644 = vpow2.f32 %v6442_v46  ;;  %v8609_v30 = vadd.f32 %v6778_v31, %v8557_v13  ;;  %v2991_v46 = vadd.f32 %v2975_v26, %v8560_v32  ;;  %v2990_v32 = vadd.f32 %v2974_v12, %v8572_v16 }
 0x708   :  { %v2945_v17 = vpop.f32.mrf.mxu1 }
 0x709   :  { %v6443_v19 = vmul.f32 -1.442695, %v8609_v30  ;;  %v8613_v52 = vadd.f32 %v8557_v13, %v2945_v17 }
 0x70a   :  { %v6781_v6 = vpop.f32.mrf.mxu1 }
 0x70b   :  { %7646 = vpow2.f32 %v6443_v19  ;;  %v6441_v27 = vmul.f32 -1.442695, %v8613_v52  ;;  %v2967_v29 = vadd.f32 %v6781_v6, %v8557_v13  ;;  %v8653_v6 = vadd.f32 %v8557_v13, %v8605_v11 }
 0x70c   :  { %v2958_v43 = vpop.f32.mrf.mxu1 }
 0x70d   :  { %7648 = vpow2.f32 %v6441_v27  ;;  %v8619_v28 = vadd.f32 %v2987_v55, %v2967_v29  ;;  %v6446_v60 = vmul.f32 -1.442695, %v2967_v29  ;;  %v8622_v57 = vadd.f32 %v8557_v13, %v2958_v43 }
 0x70e   :  { %v6782_v49 = vpop.f32.mrf.mxu1  ;;  %v6440_v43 = vmul.f32 -1.442695, %v8653_v6 }
 0x70f   :  { %7650 = vpow2.f32 %v6446_v60  ;;  %v6444_v61 = vmul.f32 -1.442695, %v8622_v57  ;;  %v8626_v15 = vadd.f32 %v6782_v49, %v8557_v13 }
 0x710   :  { %v2961_v36 = vpop.f32.mrf.mxu1 }
 0x711   :  { %7652 = vpow2.f32 %v6444_v61  ;;  %v8632_v40 = vadd.f32 %v8557_v13, %v2961_v36  ;;  %v8635_v3 = vadd.f32 %v2988_v33, %v8626_v15  ;;  %v2976_v36 = vsel %vm2778_vm7, %v8384_v34, 0.0 }
 0x712   :  { %v2992_v33 = vadd.f32 %v2976_v36, %v8568_v37 }
 0x713   :  { %v6445_v8 = vmul.f32 -1.442695, %v8632_v40 }
 0x714   :  { %v7645_v53 = vpop.eup %7644 }
 0x715   :  { %v3063_v24 = vadd.f32 1.0, %v7645_v53  ;;  %7654 = vpow2.f32 %v6445_v8  ;;  %v2977_v8 = vsel %vm2778_vm7, %v8380_v22, 0.0 }
 0x717   :  { %7656 = vrcp.f32 %v3063_v24  ;;  %v2993_v24 = vadd.f32 %v2977_v8, %v8581_v42  ;;  %v2986_v8 = vsel %vm2778_vm7, %v8468_v38, 0.0 }
 0x718   :  { %v7647_v9 = vpop.eup %7646 }
 0x719   :  { %v3064_v54 = vadd.f32 1.0, %v7647_v9 }
 0x71a   :  { %v7649_v59 = vpop.eup %7648 }
 0x71b   :  { %7658 = vrcp.f32 %v3064_v54  ;;  %v3062_v5 = vadd.f32 1.0, %v7649_v59 }
 0x71c   :  { %v7651_v56 = vpop.eup %7650 }
 0x71d   :  { %v3067_v62 = vadd.f32 1.0, %v7651_v56  ;;  %7660 = vrcp.f32 %v3062_v5 }
 0x71e   :  { %v7653_v45 = vpop.eup %7652 }
 0x71f   :  { %7662 = vrcp.f32 %v3067_v62  ;;  %v3065_v58 = vadd.f32 1.0, %v7653_v45 }
 0x721   :  { %7664 = vrcp.f32 %v3065_v58 }
 0x722   :  { %v7655_v23 = vpop.eup %7654 }
 0x723   :  { %v3066_v50 = vadd.f32 1.0, %v7655_v23 }
 0x724   :  { %v7657_v39 = vpop.eup %7656 }
 0x725   :  { %3137 = vrot.lane.b32.xlu1 %v7657_v39, %s7821_s19  ;;  %7666 = vrcp.f32 %v3066_v50  ;;  %v2978_v50 = vsel %vm2778_vm7, %v8394_v51, 0.0 }
 0x726   :  { %7668 = vpow2.f32 %v6440_v43 }
 0x728   :  { %v7659_v18 = vpop.eup %7658 }
 0x729   :  { %3139 = vrot.lane.b32.xlu1 %v7659_v18, %s7821_s19  ;;  %v2994_v18 = vadd.f32 %v2978_v50, %v8591_v1  ;;  %v2983_v1 = vsel %vm2778_vm7, %v8443_v4, 0.0 }
 0x72a   :  { %v7661_v10 = vpop.eup %7660 }
 0x72c   :  { %v7663_v48 = vpop.eup %7662 }
 0x72d   :  { %3145 = vrot.lane.b32.xlu0 %v7663_v48, %s7821_s19  ;;  %3135 = vrot.lane.b32.xlu1 %v7661_v10, %s7821_s19 }
 0x72e   :  { %v7665_v21 = vpop.eup %7664 }
 0x731   :  { %3141 = vrot.lane.b32.xlu1 %v7665_v21, %s7821_s19 }
 0x732   :  { %v7667_v35 = vpop.eup %7666 }
 0x733   :  { %v7669_v59 = vpop.eup %7668 }
 0x734   :  { %v3061_v62 = vadd.f32 1.0, %v7669_v59  ;;  %v2973_v59 = vsel %vm2778_vm7, %v8364_v63, 0.0 }
 0x735   :  { %3143 = vrot.lane.b32.xlu1 %v7667_v35, %s7821_s19 }
 0x736   :  { %7670 = vrcp.f32 %v3061_v62 }
 0x743   :  { %v7671_v51 = vpop.eup %7670 }
 0x745   :  { %v3122_v31 = vpop.permute.xlu0 %3121 }
 0x746   :  { %v8647_v17 = vmul.f32 %v3122_v31, %v2991_v46  ;;  %v2999_v46 = vadd.f32 %v2983_v1, %v8603_v7  ;;  %v2982_v7 = vsel %vm2778_vm7, %v8435_v41, 0.0  ;;  %v7453_v1 = vld [vmem:[%s8792_s15 + $0x38] sm:$0xff]  }
 0x747   :  { %v8649_v19 = vpop.permute.xlu1 %3117 }
 0x748   :  { %v3327_v27 = vmul.f32 %v8647_v17, %v8647_v17  ;;  %v3187_v54 = vsel %vm815_vm5, %v8647_v17, 0.0 }
 0x74a   :  { %v3347_v29 = vsel %vm815_vm5, %v3327_v27, 0.0 }
 0x74b   :  { %v3124_v55 = vpop.permute.xlu1 %3123 }
 0x74c   :  { %3348 = vadd.xlane.f32.xlu0 %v3347_v29  ;;  %v8678_v9 = vmul.f32 %v3124_v55, %v2992_v33  ;;  %v2984_v29 = vsel %vm2778_vm7, %v8450_v14, 0.0  ;;  %v2998_v14 = vadd.f32 %v2982_v7, %v8613_v52 }
 0x74d   :  { %v3000_v55 = vadd.f32 %v2984_v29, %v8609_v30  ;;  %v7830_v29 = vmov 0  }
 0x74e   :  { %v3328_v22 = vmul.f32 %v8678_v9, %v8678_v9  ;;  %3841 = vmatprep.subr.bf16.mxu1 %v7830_v29 }
 0x74f   :  { %v3120_v60 = vpop.permute.xlu1 %3119  ;;  %3842 = vmatpush1.bf16.msra.mxu1 %v7453_v1 }
 0x750   :  { %v8662_v49 = vmul.f32 %v3120_v60, %v2990_v32  ;;  %v3350_v45 = vsel %vm815_vm5, %v3328_v22, 0.0  ;;  %v2985_v22 = vsel %vm2778_vm7, %v8457_v2, 0.0  ;;  %3843 = vmatprep.subr.bf16.mxu1 %v7830_v29 }
 0x752   :  { %v3184_v13 = vsel %vm815_vm5, %v8662_v49, 0.0  ;;  %v3326_v11 = vmul.f32 %v8662_v49, %v8662_v49 }
 0x753   :  { %3185 = vadd.xlane.f32.xlu0 %v3184_v13  ;;  %v3130_v61 = vpop.permute.xlu1 %3129 }
 0x754   :  { %v8672_v0 = vmul.f32 %v3130_v61, %v8578_v25  ;;  %v3344_v16 = vsel %vm815_vm5, %v3326_v11, 0.0  ;;  %v3190_v25 = vsel %vm815_vm5, %v8678_v9, 0.0 }
 0x756   :  { %v3199_v37 = vsel %vm815_vm5, %v8672_v0, 0.0  ;;  %v3331_v56 = vmul.f32 %v8672_v0, %v8672_v0 }
 0x757   :  { %3345 = vadd.xlane.f32.xlu0 %v3344_v16  ;;  %v3126_v53 = vpop.permute.xlu1 %3125 }
 0x758   :  { %v8682_v34 = vmul.f32 %v3126_v53, %v2993_v24  ;;  %v3359_v58 = vsel %vm815_vm5, %v3331_v56, 0.0  ;;  %v3002_v53 = vadd.f32 %v2986_v8, %v8632_v40 }
 0x759   :  { %3188 = vadd.xlane.f32.xlu1 %v3187_v54 }
 0x75a   :  { %v3193_v5 = vsel %vm815_vm5, %v8682_v34, 0.0  ;;  %v3329_v23 = vmul.f32 %v8682_v34, %v8682_v34 }
 0x75b   :  { %3200 = vadd.xlane.f32.xlu0 %v3199_v37  ;;  %v8690_v42 = vpop.permute.xlu1 %3131 }
 0x75c   :  { %v3353_v48 = vsel %vm815_vm5, %v3329_v23, 0.0  ;;  %v8780_v50 = vmul.f32 %v8690_v42, %v8588_v20 }
 0x75d   :  { %3191 = vadd.xlane.f32.xlu1 %v3190_v25 }
 0x75f   :  { %3194 = vadd.xlane.f32.xlu0 %v3193_v5  ;;  %v3128_v39 = vpop.permute.xlu1 %3127  ;;  %v2989_v5 = vadd.f32 %v2973_v59, %v8564_v44 }
 0x760   :  { %v8703_v10 = vmul.f32 %v3128_v39, %v2994_v18 }
 0x761   :  { %3351 = vadd.xlane.f32.xlu1 %v3350_v45  ;;  %v8766_v62 = vmul.f32 %v8649_v19, %v2989_v5 }
 0x762   :  { %v3196_v21 = vsel %vm815_vm5, %v8703_v10, 0.0  ;;  %v3330_v35 = vmul.f32 %v8703_v10, %v8703_v10 }
 0x763   :  { %3360 = vadd.xlane.f32.xlu0 %v3359_v58  ;;  %v3181_v44 = vsel %vm815_vm5, %v8766_v62, 0.0  ;;  %v3325_v58 = vmul.f32 %v8766_v62, %v8766_v62 }
 0x764   :  { %v3356_v26 = vsel %vm815_vm5, %v3330_v35, 0.0 }
 0x765   :  { %v3341_v39 = vsel %vm815_vm5, %v3325_v58, 0.0 }
 0x767   :  { %3354 = vadd.xlane.f32.xlu0 %v3353_v48  ;;  %v3202_v48 = vsel %vm815_vm5, %v8780_v50, 0.0 }
 0x76b   :  { %3197 = vadd.xlane.f32.xlu0 %v3196_v21  ;;  %v3332_v21 = vmul.f32 %v8780_v50, %v8780_v50 }
 0x76d   :  { %v3362_v35 = vsel %vm815_vm5, %v3332_v21, 0.0 }
 0x76f   :  { %3357 = vadd.xlane.f32.xlu0 %v3356_v26 }
 0x772   :  { %3133 = vrot.lane.b32.xlu1 %v7671_v51, %s7821_s19 }
 0x797   :  { %v3138_v31 = vpop.permute.xlu1 %3137 }
 0x798   :  { %v8715_v27 = vmul.f32 %v3138_v31, %v2999_v46 }
 0x79a   :  { %v3211_v43 = vsel %vm815_vm5, %v8715_v27, 0.0  ;;  %v3335_v12 = vmul.f32 %v8715_v27, %v8715_v27 }
 0x79b   :  { %3212 = vadd.xlane.f32.xlu1 %v3211_v43  ;;  %v3140_v32 = vpop.permute.xlu1 %3139 }
 0x79c   :  { %v8724_v60 = vmul.f32 %v3140_v32, %v3000_v55  ;;  %v3371_v4 = vsel %vm815_vm5, %v3335_v12, 0.0  ;;  %v7454_v55 = vld [vmem:[%s8792_s15 + $0x30] sm:$0xff]  }
 0x79d   :  { %3372 = vadd.xlane.f32.xlu0 %v3371_v4  ;;  %3844 = vmatpush1.bf16.msra.mxu1 %v7454_v55 }
 0x79e   :  { %v3214_v36 = vsel %vm815_vm5, %v8724_v60, 0.0  ;;  %v3336_v52 = vmul.f32 %v8724_v60, %v8724_v60  ;;  %3845 = vmatprep.subr.bf16.mxu1 %v7830_v29 }
 0x79f   :  { %v3146_v13 = vpop.permute.xlu0 %3145  ;;  %v3136_v30 = vpop.permute.xlu1 %3135 }
 0x7a0   :  { %v8731_v11 = vmul.f32 %v3146_v13, %v8619_v28  ;;  %v8733_v61 = vmul.f32 %v3136_v30, %v2998_v14  ;;  %v6447_v28 = vmul.f32 -1.442695, %v8626_v15  ;;  %v3374_v37 = vsel %vm815_vm5, %v3336_v52, 0.0  ;;  %v7455_v13 = vld [vmem:[%s8792_s15 + $0x28] sm:$0xff]  }
 0x7a1   :  { %3215 = vadd.xlane.f32.xlu0 %v3214_v36  ;;  %v3001_v15 = vadd.f32 %v2985_v22, %v8622_v57  ;;  %3846 = vmatpush1.bf16.msra.mxu1 %v7455_v13 }
 0x7a2   :  { %v3223_v33 = vsel %vm815_vm5, %v8731_v11, 0.0  ;;  %v3208_v41 = vsel %vm815_vm5, %v8733_v61, 0.0  ;;  %v3334_v25 = vmul.f32 %v8733_v61, %v8733_v61  ;;  %7672 = vpow2.f32 %v6447_v28  ;;  %3847 = vmatprep.subr.bf16.mxu1 %v7830_v29 }
 0x7a3   :  { %3224 = vadd.xlane.f32.xlu1 %v3223_v33  ;;  %v3142_v16 = vpop.permute.xlu1 %3141 }
 0x7a4   :  { %v8762_v56 = vmul.f32 %v3142_v16, %v3001_v15  ;;  %v3368_v2 = vsel %vm815_vm5, %v3334_v25, 0.0  ;;  %v3339_v16 = vmul.f32 %v8731_v11, %v8731_v11 }
 0x7a5   :  { %3209 = vadd.xlane.f32.xlu0 %v3208_v41 }
 0x7a6   :  { %v3217_v45 = vsel %vm815_vm5, %v8762_v56, 0.0  ;;  %v3337_v63 = vmul.f32 %v8762_v56, %v8762_v56 }
 0x7a7   :  { %v3144_v24 = vpop.permute.xlu1 %3143 }
 0x7a8   :  { %v8747_v54 = vmul.f32 %v3144_v24, %v3002_v53  ;;  %v3377_v19 = vsel %vm815_vm5, %v3337_v63, 0.0  ;;  %v7456_v53 = vld [vmem:[%s8792_s15 + $0x20] sm:$0xff]   ;;  %v7457_v63 = vld [vmem:[%s8792_s15 + $0x18] sm:$0xff]  }
 0x7a9   :  { %3375 = vadd.xlane.f32.xlu0 %v3374_v37  ;;  %3848 = vmatpush1.bf16.msra.mxu1 %v7456_v53 }
 0x7aa   :  { %v3220_v38 = vsel %vm815_vm5, %v8747_v54, 0.0  ;;  %v3338_v40 = vmul.f32 %v8747_v54, %v8747_v54  ;;  %3849 = vmatprep.subr.bf16.mxu1 %v7830_v29 }
 0x7ab   :  { %3221 = vadd.xlane.f32.xlu1 %v3220_v38  ;;  %v3383_v38 = vsel %vm815_vm5, %v3339_v16, 0.0 }
 0x7ac   :  { %v3380_v57 = vsel %vm815_vm5, %v3338_v40, 0.0 }
 0x7ad   :  { %3369 = vadd.xlane.f32.xlu0 %v3368_v2  ;;  %3850 = vmatpush1.bf16.msra.mxu1 %v7457_v63 }
 0x7ae   :  { %3851 = vmatprep.subr.bf16.mxu1 %v7830_v29 }
 0x7af   :  { %3381 = vadd.xlane.f32.xlu1 %v3380_v57  ;;  %v7673_v23 = vpop.eup %7672 }
 0x7b0   :  { %v3068_v18 = vadd.f32 1.0, %v7673_v23 }
 0x7b1   :  { %3218 = vadd.xlane.f32.xlu0 %v3217_v45 }
 0x7b2   :  { %7674 = vrcp.f32 %v3068_v18 }
 0x7b3   :  { %3182 = vadd.xlane.f32.xlu1 %v3181_v44 }
 0x7b5   :  { %3378 = vadd.xlane.f32.xlu0 %v3377_v19 }
 0x7b7   :  { %3342 = vadd.xlane.f32.xlu1 %v3341_v39 }
 0x7bb   :  { %3203 = vadd.xlane.f32.xlu1 %v3202_v48 }
 0x7bf   :  { %3363 = vadd.xlane.f32.xlu1 %v3362_v35  ;;  %v7675_v26 = vpop.eup %7674 }
 0x7cb   :  { %3147 = vrot.lane.b32.xlu0 %v7675_v26, %s7821_s19 }
 0x7d5   :  { %v3349_v20 = vpop.xlane.xlu0 %3348 }
 0x7d6   :  { %v3401_v42 = vrot.slane %v3349_v20, 4 }
 0x7d8   :  { %v3402_v46 = vadd.f32 %v3401_v42, %v3349_v20  ;;  %v7458_v20 = vld [vmem:[%s8792_s15 + $0x10] sm:$0xff]   ;;  %v2981_v42 = vsel %vm2778_vm7, %v8426_v47, 0.0 }
 0x7d9   :  { %3852 = vmatpush1.bf16.msra.mxu1 %v7458_v20 }
 0x7da   :  { %v3403_v32 = vrot.slane %v3402_v46, 2  ;;  %3853 = vmatprep.subr.bf16.mxu1 %v7830_v29 }
 0x7dc   :  { %v3186_v51 = vpop.xlane.xlu0 %3185  ;;  %v3404_v41 = vadd.f32 %v3403_v32, %v3402_v46 }
 0x7dd   :  { %v3235_v31 = vrot.slane %v3186_v51, 4 }
 0x7de   :  { %v3405_v40 = vrot.slane %v3404_v41, 1 }
 0x7df   :  { %v3236_v43 = vadd.f32 %v3235_v31, %v3186_v51  ;;  %v2997_v31 = vadd.f32 %v2981_v42, %v8653_v6 }
 0x7e0   :  { %v3346_v12 = vpop.xlane.xlu0 %3345  ;;  %v3406_v39 = vadd.f32 %v3405_v40, %v3404_v41  ;;  %v7460_v41 = vld [vmem:[%s8792_s15] sm:$0xff]   ;;  %v7462_v40 = vld [vmem:[%s8792_s15 + $0x50] sm:$0xff]  }
 0x7e1   :  { %v3237_v4 = vrot.slane %v3236_v43, 2  ;;  %v3395_v7 = vrot.slane %v3346_v12, 4 }
 0x7e2   :  { %v3189_v14 = vpop.xlane.xlu1 %3188 }
 0x7e3   :  { %v3238_v30 = vadd.f32 %v3237_v4, %v3236_v43  ;;  %v3396_v36 = vadd.f32 %v3395_v7, %v3346_v12  ;;  %v3241_v33 = vrot.slane %v3189_v14, 4  ;;  %v3504_v12 = vmul.f32 0.001953125, %v3406_v39  ;;  %v7464_v39 = vld [vmem:[%s8792_s15 + $0x40] sm:$0xff]  }
 0x7e5   :  { %v3239_v52 = vrot.slane %v3238_v30, 1  ;;  %v3397_v28 = vrot.slane %v3396_v36, 2  ;;  %v3242_v8 = vadd.f32 %v3241_v33, %v3189_v14 }
 0x7e6   :  { %v3192_v24 = vpop.xlane.xlu1 %3191 }
 0x7e7   :  { %v3240_v37 = vadd.f32 %v3239_v52, %v3238_v30  ;;  %v3398_v25 = vadd.f32 %v3397_v28, %v3396_v36  ;;  %v3243_v22 = vrot.slane %v3242_v8, 2  ;;  %v3247_v15 = vrot.slane %v3192_v24, 4  ;;  %v7459_v30 = vld [vmem:[%s8792_s15 + $0x8] sm:$0xff]  }
 0x7e8   :  { %3854 = vmatpush1.bf16.msra.mxu1 %v7459_v30 }
 0x7e9   :  { %v8805_v59 = vmul.f32 0.001953125, %v3240_v37  ;;  %v3399_v5 = vrot.slane %v3398_v25, 1  ;;  %v3244_v2 = vadd.f32 %v3243_v22, %v3242_v8  ;;  %v3248_v57 = vadd.f32 %v3247_v15, %v3192_v24  ;;  %3855 = vmatprep.subr.bf16.mxu1 %v7830_v29 }
 0x7ea   :  { %3384 = vadd.xlane.f32.xlu0 %v3383_v38  ;;  %v3352_v45 = vpop.xlane.xlu1 %3351 }
 0x7eb   :  { %v3400_v44 = vadd.f32 %v3399_v5, %v3398_v25  ;;  %v3245_v58 = vrot.slane %v3244_v2, 1  ;;  %v3249_v19 = vrot.slane %v3248_v57, 2  ;;  %v3407_v23 = vrot.slane %v3352_v45, 4  ;;  %v7461_v25 = vld [vmem:[%s8792_s15 + $0x58] sm:$0xff]   ;;  %v3201_v5 = vpop.xlane.xlu0 %3200 }
 0x7ec   :  { %v3519_v18 = vmul.f32 %v8805_v59, %v8805_v59  ;;  %3856 = vmatpush1.bf16.msra.mxu1 %v7460_v41  ;;  %v3551_v15 = vsub.f32 %v8662_v49, %v8805_v59  ;;  %v8845_v59 = vld [vmem:[%s6332_s25] sm:$0xff]  ;;  %s6346_s25 = sld [smem:[%s9595_s0 + %s7848_s21]]  }
 0x7ed   :  { %v3503_v48 = vmul.f32 0.001953125, %v3400_v44  ;;  %v3246_v21 = vadd.f32 %v3245_v58, %v3244_v2  ;;  %v3250_v35 = vadd.f32 %v3249_v19, %v3248_v57  ;;  %v3408_v26 = vadd.f32 %v3407_v23, %v3352_v45  ;;  %3865 = vmatprep.subr.bf16.mxu1 %v7830_v29  ;;  %v8839_v57 = vld [vmem:[%s6331_s20] sm:$0xff]  ;;  %v7463_v44 = vld [vmem:[%s8792_s15 + $0x48] sm:$0xff]   ;;  %s6338_s15 = sld [smem:[%s9595_s0 + %s7826_s3]]  }
 0x7ee   :  { %v3134_v46 = vpop.permute.xlu1 %3133  ;;  %s6339_s20 = sld [smem:[%s9595_s0 + %s7837_s16]]  }
 0x7ef   :  { %v3535_v51 = vsub.f32 %v3503_v48, %v3519_v18  ;;  %v3488_v1 = vmul.f32 0.001953125, %v3246_v21  ;;  %v3251_v55 = vrot.slane %v3250_v35, 1  ;;  %v3409_v43 = vrot.slane %v3408_v26, 2  ;;  %v3195_v23 = vpop.xlane.xlu0 %3194 }
 0x7f0   :  { %v8816_v13 = vmul.f32 %v3134_v46, %v2997_v31  ;;  %3866 = vmatpush2.bf16.msra.mxu1 %v7461_v25  ;;  %v3253_v46 = vrot.slane %v3195_v23, 4 }
 0x7f1   :  { %v3567_v32 = vadd.f32 1e-05, %v3535_v51  ;;  %v3520_v4 = vmul.f32 %v3488_v1, %v3488_v1  ;;  %v3252_v7 = vadd.f32 %v3251_v55, %v3250_v35  ;;  %v3410_v14 = vadd.f32 %v3409_v43, %v3408_v26  ;;  %3867 = vmatprep.subr.bf16.mxu1 %v7830_v29 }
 0x7f2   :  { %v3205_v6 = vsel %vm815_vm5, %v8816_v13, 0.0  ;;  %v3333_v28 = vmul.f32 %v8816_v13, %v8816_v13  ;;  %v3552_v45 = vsub.f32 %v8647_v17, %v3488_v1 }
 0x7f3   :  { %7676 = vrsqrt.f32 %v3567_v32  ;;  %v3536_v47 = vsub.f32 %v3504_v12, %v3520_v4  ;;  %v3489_v33 = vmul.f32 0.001953125, %v3252_v7  ;;  %v3411_v16 = vrot.slane %v3410_v14, 1  ;;  %3206 = vadd.xlane.f32.xlu1 %v3205_v6  ;;  %v3361_v26 = vpop.xlane.xlu0 %3360 }
 0x7f4   :  { %v3365_v24 = vsel %vm815_vm5, %v3333_v28, 0.0  ;;  %3868 = vmatpush2.bf16.msra.mxu1 %v7462_v40  ;;  %v3254_v12 = vadd.f32 %v3253_v46, %v3195_v23  ;;  %v3265_v32 = vrot.slane %v3201_v5, 4  ;;  %v3425_v4 = vrot.slane %v3361_v26, 4 }
 0x7f5   :  { %v3568_v36 = vadd.f32 1e-05, %v3536_v47  ;;  %v3412_v52 = vadd.f32 %v3411_v16, %v3410_v14  ;;  %v3521_v8 = vmul.f32 %v3489_v33, %v3489_v33  ;;  %3869 = vmatprep.subr.bf16.mxu1 %v7830_v29  ;;  %v3553_v48 = vsub.f32 %v8678_v9, %v3489_v33 }
 0x7f6   :  { %v3266_v16 = vadd.f32 %v3265_v32, %v3201_v5  ;;  %v3426_v6 = vadd.f32 %v3425_v4, %v3361_v26 }
 0x7f7   :  { %7678 = vrsqrt.f32 %v3568_v36  ;;  %v3505_v53 = vmul.f32 0.001953125, %v3412_v52  ;;  %3366 = vadd.xlane.f32.xlu1 %v3365_v24  ;;  %v3355_v51 = vpop.xlane.xlu0 %3354  ;;  %v3255_v36 = vrot.slane %v3254_v12, 2 }
 0x7f8   :  { %3870 = vmatpush2.bf16.msra.mxu1 %v7463_v44  ;;  %v3413_v31 = vrot.slane %v3355_v51, 4 }
 0x7f9   :  { %v3537_v37 = vsub.f32 %v3505_v53, %v3521_v8  ;;  %3871 = vmatprep.subr.bf16.mxu1 %v7830_v29 }
 0x7fa   :  { %v3414_v7 = vadd.f32 %v3413_v31, %v3355_v51 }
 0x7fb   :  { %v3569_v22 = vadd.f32 1e-05, %v3537_v37  ;;  %v3198_v9 = vpop.xlane.xlu0 %3197  ;;  %v3256_v37 = vadd.f32 %v3255_v36, %v3254_v12 }
 0x7fc   :  { %3872 = vmatpush2.bf16.msra.mxu1 %v7464_v39  ;;  %v3259_v55 = vrot.slane %v3198_v9, 4  ;;  %v3415_v41 = vrot.slane %v3414_v7, 2 }
 0x7fd   :  { %7680 = vrsqrt.f32 %v3569_v22  ;;  %v3257_v5 = vrot.slane %v3256_v37, 1 }
 0x7fe   :  { %v3260_v30 = vadd.f32 %v3259_v55, %v3198_v9  ;;  %v3416_v40 = vadd.f32 %v3415_v41, %v3414_v7 }
 0x7ff   :  { %v3358_v43 = vpop.xlane.xlu0 %3357  ;;  %v3258_v55 = vadd.f32 %v3257_v5, %v3256_v37 }
 0x800   :  { %v7677_v38 = vpop.eup %7676  ;;  %v3419_v14 = vrot.slane %v3358_v43, 4  ;;  %v3261_v8 = vrot.slane %v3260_v30, 2  ;;  %v3417_v26 = vrot.slane %v3416_v40, 1 }
 0x801   :  { %v3599_v2 = vmul.f32 %v7677_v38, %v3551_v15  ;;  %v3267_v15 = vrot.slane %v3266_v16, 2  ;;  %v3427_v38 = vrot.slane %v3426_v6, 2 }
 0x802   :  { %v3420_v52 = vadd.f32 %v3419_v14, %v3358_v43  ;;  %v3418_v14 = vadd.f32 %v3417_v26, %v3416_v40 }
 0x803   :  { %v3616_v49 = vmul.f32 %v8839_v57, %v3599_v2 }
 0x804   :  { %v7679_v63 = vpop.eup %7678  ;;  %v3421_v2 = vrot.slane %v3420_v52, 2 }
 0x805   :  { %v3600_v58 = vmul.f32 %v7679_v63, %v3552_v45  ;;  %v8851_v18 = vadd.f32 %v8845_v59, %v3616_v49  ;;  %v3262_v63 = vadd.f32 %v3261_v8, %v3260_v30 }
 0x807   :  { %v3617_v19 = vmul.f32 %v8839_v57, %v3600_v58 }
 0x809   :  { %v8854_v17 = vadd.f32 %v8845_v59, %v3617_v19 }
 0x80a   :  { %v7681_v35 = vpop.eup %7680 }
 0x80b   :  { %v7263_v21 = vpack.i.bf16 %v8854_v17, %v8851_v18  ;;  %v3601_v20 = vmul.f32 %v7681_v35, %v3553_v48  ;;  %v3268_v48 = vadd.f32 %v3267_v15, %v3266_v16 }
 0x80d   :  { %7264 = vrot.lane.b32.xlu0 %v7263_v21, %s7821_s19  ;;  %v3618_v29 = vmul.f32 %v8839_v57, %v3601_v20  ;;  %v3428_v21 = vadd.f32 %v3427_v38, %v3426_v6  ;;  %v3263_v20 = vrot.slane %v3262_v63, 1  ;;  %v3269_v12 = vrot.slane %v3268_v48, 1 }
 0x80f   :  { %v8862_v42 = vadd.f32 %v8845_v59, %v3618_v29  ;;  %v3422_v29 = vadd.f32 %v3421_v2, %v3420_v52  ;;  %v3429_v7 = vrot.slane %v3428_v21, 1  ;;  %v3264_v30 = vadd.f32 %v3263_v20, %v3262_v63 }
 0x810   :  { %v8873_v52 = vmul.f32 0.001953125, %v3258_v55  ;;  %v3270_v8 = vadd.f32 %v3269_v12, %v3268_v48 }
 0x811   :  { %v3709_v1 = vpack.c.bf16 %v8862_v42, %v8854_v17  ;;  %v8875_v40 = vmul.f32 0.001953125, %v3264_v30 }
 0x813   :  { %6461 = vmatprep.mubr.msk.bf16.mxu1 %vm815_vm5, %v3709_v1 }
 0x824   :  { %v3213_v47 = vpop.xlane.xlu1 %3212 }
 0x825   :  { %v3289_v33 = vrot.slane %v3213_v47, 4 }
 0x826   :  { %v3373_v28 = vpop.xlane.xlu0 %3372 }
 0x827   :  { %v3290_v53 = vadd.f32 %v3289_v33, %v3213_v47  ;;  %v3449_v24 = vrot.slane %v3373_v28, 4  ;;  %v3423_v47 = vrot.slane %v3422_v29, 1 }
 0x829   :  { %v3291_v25 = vrot.slane %v3290_v53, 2  ;;  %v3450_v22 = vadd.f32 %v3449_v24, %v3373_v28  ;;  %v3424_v15 = vadd.f32 %v3423_v47, %v3422_v29  ;;  %v3523_v29 = vmul.f32 %v8875_v40, %v8875_v40 }
 0x82a   :  { %v3216_v45 = vpop.xlane.xlu0 %3215 }
 0x82b   :  { %v3292_v44 = vadd.f32 %v3291_v25, %v3290_v53  ;;  %v3451_v58 = vrot.slane %v3450_v22, 2  ;;  %v3295_v49 = vrot.slane %v3216_v45, 4  ;;  %v3430_v25 = vadd.f32 %v3429_v7, %v3428_v21 }
 0x82c   :  { %v8867_v46 = vpop.xlane.xlu1 %3224 }
 0x82d   :  { %v3293_v19 = vrot.slane %v3292_v44, 1  ;;  %v3452_v23 = vadd.f32 %v3451_v58, %v3450_v22  ;;  %v3296_v39 = vadd.f32 %v3295_v49, %v3216_v45  ;;  %v3506_v22 = vmul.f32 0.001953125, %v3418_v14 }
 0x82e   :  { %v3210_v35 = vpop.xlane.xlu0 %3209  ;;  %v3522_v58 = vmul.f32 %v8873_v52, %v8873_v52  ;;  %v3508_v20 = vmul.f32 0.001953125, %v3430_v25 }
 0x82f   :  { %v3297_v51 = vrot.slane %v3296_v39, 2  ;;  %v3294_v1 = vadd.f32 %v3293_v19, %v3292_v44  ;;  %v3453_v9 = vrot.slane %v3452_v23, 1  ;;  %v3283_v31 = vrot.slane %v3210_v35, 4 }
 0x830   :  { %v8883_v19 = vmul.f32 0.001953125, %v3270_v8  ;;  %v3538_v21 = vsub.f32 %v3506_v22, %v3522_v58 }
 0x831   :  { %v3298_v43 = vadd.f32 %v3297_v51, %v3296_v39  ;;  %v3284_v32 = vadd.f32 %v3283_v31, %v3210_v35  ;;  %v8869_v36 = vmul.f32 0.001953125, %v3294_v1  ;;  %v3454_v33 = vadd.f32 %v3453_v9, %v3452_v23 }
 0x832   :  { %v3376_v4 = vpop.xlane.xlu0 %3375  ;;  %v3507_v35 = vmul.f32 0.001953125, %v3424_v15  ;;  %v3570_v14 = vadd.f32 1e-05, %v3538_v21 }
 0x833   :  { %v3285_v16 = vrot.slane %v3284_v32, 2  ;;  %v3455_v6 = vrot.slane %v3376_v4, 4  ;;  %v3299_v28 = vrot.slane %v3298_v43, 1  ;;  %v3528_v2 = vmul.f32 %v8869_v36, %v8869_v36 }
 0x834   :  { %v8871_v41 = vpop.xlane.xlu1 %3221  ;;  %v3512_v45 = vmul.f32 0.001953125, %v3454_v33  ;;  %v3539_v30 = vsub.f32 %v3507_v35, %v3523_v29  ;;  %7682 = vrsqrt.f32 %v3570_v14 }
 0x835   :  { %v3286_v53 = vadd.f32 %v3285_v16, %v3284_v32  ;;  %v3456_v24 = vadd.f32 %v3455_v6, %v3376_v4  ;;  %v3300_v49 = vadd.f32 %v3299_v28, %v3298_v43  ;;  %v3524_v32 = vmul.f32 %v8883_v19, %v8883_v19 }
 0x836   :  { %v3370_v37 = vpop.xlane.xlu0 %3369  ;;  %v3544_v51 = vsub.f32 %v3512_v45, %v3528_v2  ;;  %v3571_v45 = vadd.f32 1e-05, %v3539_v30 }
 0x837   :  { %v3443_v38 = vrot.slane %v3370_v37, 4  ;;  %v3457_v63 = vrot.slane %v3456_v24, 2  ;;  %v3287_v5 = vrot.slane %v3286_v53, 1  ;;  %v8887_v31 = vmul.f32 0.001953125, %v3300_v49 }
 0x838   :  { %v8879_v44 = vpop.xlane.xlu1 %3381  ;;  %v3540_v16 = vsub.f32 %v3508_v20, %v3524_v32  ;;  %v3576_v6 = vadd.f32 1e-05, %v3544_v51 }
 0x839   :  { %v3458_v23 = vadd.f32 %v3457_v63, %v3456_v24  ;;  %v3444_v39 = vadd.f32 %v3443_v38, %v3370_v37  ;;  %v3288_v55 = vadd.f32 %v3287_v5, %v3286_v53  ;;  %v3529_v24 = vmul.f32 %v8887_v31, %v8887_v31 }
 0x83a   :  { %v3219_v48 = vpop.xlane.xlu0 %3218  ;;  %v3572_v49 = vadd.f32 1e-05, %v3540_v16  ;;  %7684 = vrsqrt.f32 %v3576_v6 }
 0x83b   :  { %v3301_v26 = vrot.slane %v3219_v48, 4  ;;  %v3459_v1 = vrot.slane %v3458_v23, 1  ;;  %v3445_v43 = vrot.slane %v3444_v39, 2  ;;  %v8893_v37 = vmul.f32 0.001953125, %v3288_v55 }
 0x83c   :  { %v3183_v9 = vpop.xlane.xlu1 %3182  ;;  %7686 = vrsqrt.f32 %v3571_v45 }
 0x83d   :  { %v3302_v12 = vadd.f32 %v3301_v26, %v3219_v48  ;;  %v3460_v4 = vadd.f32 %v3459_v1, %v3458_v23  ;;  %v3446_v47 = vadd.f32 %v3445_v43, %v3444_v39  ;;  %v3229_v15 = vrot.slane %v3183_v9, 4 }
 0x83e   :  { %v3379_v7 = vpop.xlane.xlu0 %3378  ;;  %v3527_v48 = vmul.f32 %v8893_v37, %v8893_v37  ;;  %7688 = vrsqrt.f32 %v3572_v49 }
 0x83f   :  { %v3303_v33 = vrot.slane %v3302_v12, 2  ;;  %v3513_v28 = vmul.f32 0.001953125, %v3460_v4  ;;  %v3461_v8 = vrot.slane %v3379_v7, 4  ;;  %v3447_v53 = vrot.slane %v3446_v47, 1 }
 0x840   :  { %v3343_v22 = vpop.xlane.xlu1 %3342  ;;  %v3230_v20 = vadd.f32 %v3229_v15, %v3183_v9  ;;  %v3560_v15 = vsub.f32 %v8715_v27, %v8869_v36 }
 0x841   :  { %v3304_v25 = vadd.f32 %v3303_v33, %v3302_v12  ;;  %v3462_v38 = vadd.f32 %v3461_v8, %v3379_v7  ;;  %v3545_v63 = vsub.f32 %v3513_v28, %v3529_v24  ;;  %v3448_v58 = vadd.f32 %v3447_v53, %v3446_v47  ;;  %v7683_v28 = vpop.eup %7682 }
 0x842   :  { %v3148_v2 = vpop.permute.xlu0 %3147  ;;  %v3389_v39 = vrot.slane %v3343_v22, 4  ;;  %v3231_v7 = vrot.slane %v3230_v20, 2  ;;  %v3554_v53 = vsub.f32 %v8682_v34, %v8873_v52  ;;  %v3559_v34 = vsub.f32 %v8733_v61, %v8893_v37 }
 0x843   :  { %v3305_v5 = vrot.slane %v3304_v25, 1  ;;  %v3463_v23 = vrot.slane %v3462_v38, 2  ;;  %v3511_v21 = vmul.f32 0.001953125, %v3448_v58  ;;  %v8898_v35 = vmul.f32 %v3148_v2, %v8635_v3 }
 0x844   :  { %v3577_v51 = vadd.f32 1e-05, %v3545_v63  ;;  %v3390_v12 = vadd.f32 %v3389_v39, %v3343_v22  ;;  %v3232_v33 = vadd.f32 %v3231_v7, %v3230_v20  ;;  %v3555_v63 = vsub.f32 %v8703_v10, %v8875_v40 }
 0x845   :  { %v3306_v26 = vadd.f32 %v3305_v5, %v3304_v25  ;;  %v3464_v29 = vadd.f32 %v3463_v23, %v3462_v38  ;;  %v3543_v1 = vsub.f32 %v3511_v21, %v3527_v48  ;;  %v3226_v32 = vsel %vm815_vm5, %v8898_v35, 0.0 }
 0x846   :  { %3227 = vadd.xlane.f32.xlu1 %v3226_v32  ;;  %v3391_v30 = vrot.slane %v3390_v12, 2  ;;  %v3340_v47 = vmul.f32 %v8898_v35, %v8898_v35  ;;  %v3233_v22 = vrot.slane %v3232_v33, 1  ;;  %v3602_v38 = vmul.f32 %v7683_v28, %v3554_v53 }
 0x847   :  { %v8900_v55 = vmul.f32 0.001953125, %v3306_v26  ;;  %v3465_v43 = vrot.slane %v3464_v29, 1  ;;  %v3575_v4 = vadd.f32 1e-05, %v3543_v1  ;;  %v7685_v25 = vpop.eup %7684  ;;  %v3556_v23 = vsub.f32 %v8672_v0, %v8883_v19 }
 0x848   :  { %v3386_v6 = vsel %vm815_vm5, %v3340_v47, 0.0  ;;  %v3392_v24 = vadd.f32 %v3391_v30, %v3390_v12  ;;  %v3608_v58 = vmul.f32 %v7685_v25, %v3560_v15  ;;  %v3234_v5 = vadd.f32 %v3233_v22, %v3232_v33 }
 0x849   :  { %v3466_v14 = vadd.f32 %v3465_v43, %v3464_v29  ;;  %7690 = vrsqrt.f32 %v3575_v4  ;;  %v3530_v3 = vmul.f32 %v8900_v55, %v8900_v55  ;;  %v7687_v2 = vpop.eup %7686  ;;  %v3619_v52 = vmul.f32 %v8839_v57, %v3602_v38 }
 0x84a   :  { %7692 = vrsqrt.f32 %v3577_v51  ;;  %3387 = vadd.xlane.f32.xlu1 %v3386_v6  ;;  %v3393_v45 = vrot.slane %v3392_v24, 1  ;;  %v3603_v39 = vmul.f32 %v7687_v2, %v3555_v63  ;;  %v3307_v21 = vrot.slane %v8871_v41, 4 }
 0x84b   :  { %v3514_v9 = vmul.f32 0.001953125, %v3466_v14  ;;  %v7689_v49 = vpop.eup %7688  ;;  %v3625_v10 = vmul.f32 %v8839_v57, %v3608_v58  ;;  %v3561_v20 = vsub.f32 %v8724_v60, %v8887_v31  ;;  %v3486_v29 = vmul.f32 0.001953125, %v3234_v5 }
 0x84c   :  { %v3394_v27 = vadd.f32 %v3393_v45, %v3392_v24  ;;  %v3604_v40 = vmul.f32 %v7689_v49, %v3556_v23  ;;  %v3467_v0 = vrot.slane %v8879_v44, 4  ;;  %v8926_v61 = vadd.f32 %v8845_v59, %v3619_v52 }
 0x84d   :  { %v3546_v16 = vsub.f32 %v3514_v9, %v3530_v3  ;;  %v3620_v37 = vmul.f32 %v8839_v57, %v3603_v39  ;;  %v3308_v43 = vadd.f32 %v3307_v21, %v8871_v41  ;;  %v8935_v32 = vadd.f32 %v8845_v59, %v3625_v10 }
 0x84e   :  { %v3502_v51 = vmul.f32 0.001953125, %v3394_v27  ;;  %v3621_v60 = vmul.f32 %v8839_v57, %v3604_v40  ;;  %v3562_v31 = vsub.f32 %v8762_v56, %v8900_v55  ;;  %v3518_v4 = vmul.f32 %v3486_v29, %v3486_v29 }
 0x84f   :  { %v3578_v8 = vadd.f32 1e-05, %v3546_v16  ;;  %v3468_v14 = vadd.f32 %v3467_v0, %v8879_v44  ;;  %v7268_v3 = vpack.i.bf16 %v8926_v61, %v8862_v42  ;;  %v8946_v9 = vadd.f32 %v8845_v59, %v3620_v37 }
 0x850   :  { %v3534_v30 = vsub.f32 %v3502_v51, %v3518_v4  ;;  %v3309_v16 = vrot.slane %v3308_v43, 2  ;;  %v8952_v56 = vadd.f32 %v8845_v59, %v3621_v60  ;;  %v3313_v55 = vrot.slane %v8867_v46, 4 }
 0x851   :  { %7694 = vrsqrt.f32 %v3578_v8  ;;  %v3469_v6 = vrot.slane %v3468_v14, 2  ;;  %v3550_v21 = vsub.f32 %v8766_v62, %v3486_v29 }
 0x852   :  { %v7273_v28 = vpack.i.bf16 %v8952_v56, %v8946_v9  ;;  %v3566_v8 = vadd.f32 1e-05, %v3534_v30  ;;  %v3310_v25 = vadd.f32 %v3309_v16, %v3308_v43  ;;  %v3314_v15 = vadd.f32 %v3313_v55, %v8867_v46 }
 0x853   :  { %v3470_v38 = vadd.f32 %v3469_v6, %v3468_v14 }
 0x854   :  { %7696 = vrsqrt.f32 %v3566_v8  ;;  %v3311_v2 = vrot.slane %v3310_v25, 1  ;;  %v3315_v45 = vrot.slane %v3314_v15, 2 }
 0x855   :  { %v3471_v63 = vrot.slane %v3470_v38, 1 }
 0x856   :  { %v7691_v48 = vpop.eup %7690  ;;  %v3312_v58 = vadd.f32 %v3311_v2, %v3310_v25  ;;  %v3316_v49 = vadd.f32 %v3315_v45, %v3314_v15 }
 0x857   :  { %v7693_v36 = vpop.eup %7692  ;;  %v3607_v26 = vmul.f32 %v7691_v48, %v3559_v34  ;;  %v3472_v5 = vadd.f32 %v3471_v63, %v3470_v38 }
 0x858   :  { %v3609_v1 = vmul.f32 %v7693_v36, %v3561_v20  ;;  %v3499_v23 = vmul.f32 0.001953125, %v3312_v58  ;;  %v3317_v34 = vrot.slane %v3316_v49, 1 }
 0x859   :  { %v3624_v19 = vmul.f32 %v8839_v57, %v3607_v26  ;;  %v3515_v52 = vmul.f32 0.001953125, %v3472_v5 }
 0x85a   :  { %v3626_v33 = vmul.f32 %v8839_v57, %v3609_v1  ;;  %v3531_v36 = vmul.f32 %v3499_v23, %v3499_v23  ;;  %v3318_v26 = vadd.f32 %v3317_v34, %v3316_v49 }
 0x85b   :  { %v8932_v12 = vadd.f32 %v8845_v59, %v3624_v19  ;;  %7269 = vrot.lane.b32.xlu1 %v7268_v3, %s7821_s19 }
 0x85c   :  { %v8959_v24 = vadd.f32 %v8845_v59, %v3626_v33  ;;  %v3547_v10 = vsub.f32 %v3515_v52, %v3531_v36  ;;  %v3500_v19 = vmul.f32 0.001953125, %v3318_v26  ;;  %v3711_v33 = vpack.c.bf16 %v8946_v9, %v8926_v61 }
 0x85d   :  { %v7278_v41 = vpack.i.bf16 %v8935_v32, %v8932_v12 }
 0x85e   :  { %v7695_v7 = vpop.eup %7694  ;;  %v3579_v37 = vadd.f32 1e-05, %v3547_v10  ;;  %v3532_v60 = vmul.f32 %v3500_v19, %v3500_v19  ;;  %v3564_v6 = vsub.f32 %v8731_v11, %v3500_v19 }
 0x85f   :  { %v3610_v47 = vmul.f32 %v7695_v7, %v3562_v31  ;;  %7279 = vrot.lane.b32.xlu0 %v7278_v41, %s7821_s19  ;;  %7274 = vrot.lane.b32.xlu1 %v7273_v28, %s7821_s19 }
 0x860   :  { %7698 = vrsqrt.f32 %v3579_v37 }
 0x861   :  { %v3627_v44 = vmul.f32 %v8839_v57, %v3610_v47  ;;  %v7697_v27 = vpop.eup %7696 }
 0x862   :  { %v3598_v20 = vmul.f32 %v7697_v27, %v3550_v21 }
 0x863   :  { %v8962_v53 = vadd.f32 %v8845_v59, %v3627_v44  ;;  %v3563_v44 = vsub.f32 %v8747_v54, %v3499_v23 }
 0x864   :  { %v3615_v1 = vmul.f32 %v8839_v57, %v3598_v20 }
 0x865   :  { %v7283_v22 = vpack.i.bf16 %v8962_v53, %v8959_v24 }
 0x866   :  { %v3632_v62 = vadd.f32 %v8845_v59, %v3615_v1 }
 0x867   :  { %7284 = vrot.lane.b32.xlu1 %v7283_v22, %s7821_s19  ;;  %v3204_v22 = vpop.xlane.xlu1 %3203 }
 0x868   :  { %v3271_v11 = vrot.slane %v3204_v22, 4 }
 0x86a   :  { %v3272_v63 = vadd.f32 %v3271_v11, %v3204_v22 }
 0x86b   :  { %v3364_v54 = vpop.xlane.xlu1 %3363 }
 0x86c   :  { %v3431_v45 = vrot.slane %v3364_v54, 4  ;;  %v3273_v49 = vrot.slane %v3272_v63, 2 }
 0x86d   :  { %v7699_v16 = vpop.eup %7698 }
 0x86e   :  { %v3611_v55 = vmul.f32 %v7699_v16, %v3563_v44  ;;  %v3432_v58 = vadd.f32 %v3431_v45, %v3364_v54  ;;  %v3274_v34 = vadd.f32 %v3273_v49, %v3272_v63 }
 0x870   :  { %v3433_v23 = vrot.slane %v3432_v58, 2  ;;  %v3275_v27 = vrot.slane %v3274_v34, 1 }
 0x872   :  { %v3434_v52 = vadd.f32 %v3433_v23, %v3432_v58  ;;  %v3276_v26 = vadd.f32 %v3275_v27, %v3274_v34 }
 0x873   :  { %v3385_v39 = vpop.xlane.xlu0 %3384 }
 0x874   :  { %v3473_v48 = vrot.slane %v3385_v39, 4  ;;  %v3435_v21 = vrot.slane %v3434_v52, 1 }
 0x876   :  { %v3474_v46 = vadd.f32 %v3473_v48, %v3385_v39 }
 0x878   :  { %v3475_v40 = vrot.slane %v3474_v46, 2 }
 0x87a   :  { %v3476_v0 = vadd.f32 %v3475_v40, %v3474_v46  ;;  %v3436_v40 = vadd.f32 %v3435_v21, %v3434_v52 }
 0x87c   :  { %v3477_v51 = vrot.slane %v3476_v0, 1  ;;  %v3207_v5 = vpop.xlane.xlu1 %3206  ;;  %v3509_v37 = vmul.f32 0.001953125, %v3436_v40 }
 0x87d   :  { %v3277_v48 = vrot.slane %v3207_v5, 4 }
 0x87e   :  { %v3478_v43 = vadd.f32 %v3477_v51, %v3476_v0  ;;  %v3493_v0 = vmul.f32 0.001953125, %v3276_v26 }
 0x87f   :  { %v7265_v31 = vpop.permute.xlu0 %7264  ;;  %v3278_v46 = vadd.f32 %v3277_v48, %v3207_v5 }
 0x880   :  { %v3516_v4 = vmul.f32 0.001953125, %v3478_v43  ;;  %v7267_v7 = vunpack.i.h.bf16 %v7265_v31  ;;  %v7266_v14 = vunpack.i.l.bf16 %v7265_v31  ;;  %v3367_v39 = vpop.xlane.xlu1 %3366  ;;  %v3525_v1 = vmul.f32 %v3493_v0, %v3493_v0 }
 0x881   :  { %v3437_v36 = vrot.slane %v3367_v39, 4  ;;  %v3279_v20 = vrot.slane %v3278_v46, 2  ;;  %v3557_v44 = vsub.f32 %v8780_v50, %v3493_v0 }
 0x882   :  { %v3548_v29 = vsub.f32 %v3516_v4, %v3532_v60  ;;  %v3697_v3 = vsel %vm815_vm5, %v8851_v18, %v7267_v7  ;;  %v3696_v41 = vsel %vm815_vm5, %v3632_v62, %v7266_v14  ;;  %v3628_v18 = vmul.f32 %v8839_v57, %v3611_v55 }
 0x883   :  { %v3708_v30 = vpack.c.bf16 %v3697_v3, %v3696_v41  ;;  %v3438_v10 = vadd.f32 %v3437_v36, %v3367_v39  ;;  %v3280_v51 = vadd.f32 %v3279_v20, %v3278_v46  ;;  %v3541_v60 = vsub.f32 %v3509_v37, %v3525_v1 }
 0x884   :  { %v3580_v47 = vadd.f32 1e-05, %v3548_v29  ;;  %v8983_v15 = vadd.f32 %v8845_v59, %v3628_v18 }
 0x885   :  { %3874 = vmatmul.mubr.bf16.vlgmr.msra.gmra.mxu1 %v3708_v30  ;;  %v3439_v19 = vrot.slane %v3438_v10, 2  ;;  %v3281_v31 = vrot.slane %v3280_v51, 1  ;;  %v3573_v7 = vadd.f32 1e-05, %v3541_v60 }
 0x886   :  { %7700 = vrsqrt.f32 %v3580_v47  ;;  %6462 = vmatprep.mubr.msk.bf16.mxu1 %vm815_vm5, %v3711_v33 }
 0x887   :  { %v3440_v43 = vadd.f32 %v3439_v19, %v3438_v10  ;;  %v3282_v14 = vadd.f32 %v3281_v31, %v3280_v51  ;;  %7702 = vrsqrt.f32 %v3573_v7 }
 0x889   :  { %v3441_v4 = vrot.slane %v3440_v43, 1  ;;  %v3494_v29 = vmul.f32 0.001953125, %v3282_v14 }
 0x88b   :  { %v3442_v62 = vadd.f32 %v3441_v4, %v3440_v43  ;;  %v3526_v41 = vmul.f32 %v3494_v29, %v3494_v29  ;;  %v3558_v48 = vsub.f32 %v8816_v13, %v3494_v29 }
 0x88d   :  { %v3510_v3 = vmul.f32 0.001953125, %v3442_v62  ;;  %v3715_v62 = vpack.c.bf16 %v8959_v24, %v8935_v32 }
 0x88f   :  { %v3542_v30 = vsub.f32 %v3510_v3, %v3526_v41 }
 0x891   :  { %v3574_v47 = vadd.f32 1e-05, %v3542_v30 }
 0x893   :  { %v7701_v28 = vpop.eup %7700  ;;  %7704 = vrsqrt.f32 %v3574_v47 }
 0x894   :  { %v3612_v8 = vmul.f32 %v7701_v28, %v3564_v6  ;;  %v7703_v33 = vpop.eup %7702 }
 0x895   :  { %v3605_v28 = vmul.f32 %v7703_v33, %v3557_v44  ;;  %v3717_v44 = vpack.c.bf16 %v8983_v15, %v8962_v53 }
 0x896   :  { %v3629_v25 = vmul.f32 %v8839_v57, %v3612_v8 }
 0x897   :  { %v3622_v22 = vmul.f32 %v8839_v57, %v3605_v28 }
 0x898   :  { %v8986_v38 = vadd.f32 %v8845_v59, %v3629_v25 }
 0x899   :  { %v8994_v63 = vadd.f32 %v8845_v59, %v3622_v22 }
 0x89a   :  { %v7288_v2 = vpack.i.bf16 %v8986_v38, %v8983_v15 }
 0x89b   :  { %v3713_v21 = vpack.c.bf16 %v8994_v63, %v8952_v56 }
 0x89c   :  { %7289 = vrot.lane.b32.xlu0 %v7288_v2, %s7821_s19 }
 0x8a0   :  { %v7705_v39 = vpop.eup %7704 }
 0x8a1   :  { %v3606_v0 = vmul.f32 %v7705_v39, %v3558_v48 }
 0x8a3   :  { %v3623_v60 = vmul.f32 %v8839_v57, %v3606_v0  ;;  %v7467_v0 = vld [vmem:[%s9053_s5 + $0x8] sm:$0xff]  }
 0x8a5   :  { %v3640_v29 = vadd.f32 %v8845_v59, %v3623_v60 }
 0x8cf   :  { %v3228_v16 = vpop.xlane.xlu1 %3227 }
 0x8d0   :  { %v3319_v55 = vrot.slane %v3228_v16, 4 }
 0x8d1   :  { %v7280_v1 = vpop.permute.xlu0 %7279 }
 0x8d2   :  { %v3320_v6 = vadd.f32 %v3319_v55, %v3228_v16  ;;  %v7282_v4 = vunpack.i.h.bf16 %v7280_v1  ;;  %v7281_v7 = vunpack.i.l.bf16 %v7280_v1 }
 0x8d3   :  { %v3388_v25 = vpop.xlane.xlu1 %3387 }
 0x8d4   :  { %v3321_v8 = vrot.slane %v3320_v6, 2  ;;  %v3479_v2 = vrot.slane %v3388_v25, 4  ;;  %v3702_v3 = vsel %vm815_vm5, %v3640_v29, %v7281_v7  ;;  %v3703_v41 = vsel %vm815_vm5, %v8932_v12, %v7282_v4 }
 0x8d5   :  { %v3714_v47 = vpack.c.bf16 %v3703_v41, %v3702_v3 }
 0x8d6   :  { %v3322_v18 = vadd.f32 %v3321_v8, %v3320_v6  ;;  %v3480_v11 = vadd.f32 %v3479_v2, %v3388_v25 }
 0x8d7   :  { %v7270_v45 = vpop.permute.xlu1 %7269 }
 0x8d8   :  { %v3323_v54 = vrot.slane %v3322_v18, 1  ;;  %v3481_v49 = vrot.slane %v3480_v11, 2  ;;  %v7272_v5 = vunpack.i.h.bf16 %v7270_v45  ;;  %v7271_v50 = vunpack.i.l.bf16 %v7270_v45 }
 0x8da   :  { %v3324_v58 = vadd.f32 %v3323_v54, %v3322_v18  ;;  %v3482_v23 = vadd.f32 %v3481_v49, %v3480_v11  ;;  %v3698_v34 = vsel %vm815_vm5, %v8854_v17, %v7271_v50  ;;  %v3699_v52 = vsel %vm815_vm5, %v8862_v42, %v7272_v5 }
 0x8db   :  { %v7275_v27 = vpop.permute.xlu1 %7274  ;;  %v3710_v36 = vpack.c.bf16 %v3699_v52, %v3698_v34 }
 0x8dc   :  { %v3501_v46 = vmul.f32 0.001953125, %v3324_v58  ;;  %v3483_v26 = vrot.slane %v3482_v23, 1  ;;  %v7277_v10 = vunpack.i.h.bf16 %v7275_v27  ;;  %v7276_v40 = vunpack.i.l.bf16 %v7275_v27 }
 0x8dd   :  { %3882 = vmatmul.mubr.bf16.gmra.mxu1 %v3710_v36 }
 0x8de   :  { %v3484_v20 = vadd.f32 %v3483_v26, %v3482_v23  ;;  %6463 = vmatprep.mubr.msk.bf16.mxu1 %vm815_vm5, %v3713_v21  ;;  %v3533_v19 = vmul.f32 %v3501_v46, %v3501_v46  ;;  %v3700_v51 = vsel %vm815_vm5, %v8926_v61, %v7276_v40  ;;  %v3701_v13 = vsel %vm815_vm5, %v8946_v9, %v7277_v10  ;;  %v7465_v40 = vld [vmem:[%s9053_s5 + $0x18] sm:$0xff]  }
 0x8df   :  { %v3712_v31 = vpack.c.bf16 %v3701_v13, %v3700_v51  ;;  %v7285_v30 = vpop.permute.xlu1 %7284  ;;  %v3565_v28 = vsub.f32 %v8898_v35, %v3501_v46  ;;  %6783 = vmatprep.subr.bf16.mxu0 %v7465_v40 }
 0x8e0   :  { %v3517_v37 = vmul.f32 0.001953125, %v3484_v20  ;;  %v7287_v33 = vunpack.i.h.bf16 %v7285_v30  ;;  %v7286_v16 = vunpack.i.l.bf16 %v7285_v30  ;;  %v7466_v20 = vld [vmem:[%s9053_s5 + $0x10] sm:$0xff]   ;;  %6784 = vmatpush3.bf16.msra.mxu0 %v7465_v40 }
 0x8e1   :  { %6785 = vmatprep.subr.bf16.mxu0 %v7466_v20 }
 0x8e2   :  { %v3549_v43 = vsub.f32 %v3517_v37, %v3533_v19  ;;  %v3704_v55 = vsel %vm815_vm5, %v8935_v32, %v7286_v16  ;;  %v3705_v6 = vsel %vm815_vm5, %v8959_v24, %v7287_v33 }
 0x8e3   :  { %v3716_v12 = vpack.c.bf16 %v3705_v6, %v3704_v55 }
 0x8e4   :  { %v3581_v14 = vadd.f32 1e-05, %v3549_v43  ;;  %6786 = vmatpush3.bf16.msra.mxu0 %v7466_v20 }
 0x8e5   :  { %3890 = vmatmul.mubr.bf16.gmra.mxu1 %v3712_v31  ;;  %6787 = vmatprep.subr.bf16.mxu0 %v7467_v0 }
 0x8e6   :  { %7706 = vrsqrt.f32 %v3581_v14  ;;  %6464 = vmatprep.mubr.msk.bf16.mxu1 %vm815_vm5, %v3715_v62 }
 0x8e8   :  { %6788 = vmatpush3.bf16.msra.mxu0 %v7467_v0 }
 0x8ed   :  { %3898 = vmatmul.mubr.bf16.gmra.mxu1 %v3714_v47 }
 0x8ee   :  { %6465 = vmatprep.mubr.msk.bf16.mxu1 %vm815_vm5, %v3717_v44 }
 0x8f3   :  { %v7707_v8 = vpop.eup %7706 }
 0x8f4   :  { %v3613_v18 = vmul.f32 %v7707_v8, %v3565_v28 }
 0x8f5   :  { %3906 = vmatmul.mubr.bf16.gmra.mxu1 %v3716_v12 }
 0x8f6   :  { %v3630_v25 = vmul.f32 %v8839_v57, %v3613_v18  ;;  %v9038_v57 = vld [vmem:[%s6334_s29] ss:$0 sm:$0xff]  ;;  %s6348_s29 = sld [smem:[%s9595_s0 + %s7849_s26]]  }
 0x8f8   :  { %v9026_v22 = vadd.f32 %v8845_v59, %v3630_v25 }
 0x8fa   :  { %v3719_v2 = vpack.c.bf16 %v9026_v22, %v8986_v38 }
 0x8fc   :  { %6466 = vmatprep.mubr.msk.bf16.mxu1 %vm815_vm5, %v3719_v2 }
 0x90e   :  { %v7290_v54 = vpop.permute.xlu0 %7289 }
 0x90f   :  { %v7292_v11 = vunpack.i.h.bf16 %v7290_v54  ;;  %v7291_v45 = vunpack.i.l.bf16 %v7290_v54 }
 0x911   :  { %v3706_v35 = vsel %vm815_vm5, %v8962_v53, %v7291_v45  ;;  %v3707_v58 = vsel %vm815_vm5, %v8983_v15, %v7292_v11 }
 0x912   :  { %v3718_v49 = vpack.c.bf16 %v3707_v58, %v3706_v35  ;;  %v7468_v58 = vld [vmem:[%s9053_s5] sm:$0xff]   ;;  %s6350_s5 = sld [smem:[%s9595_s0 + %s7850_s30]]  }
 0x913   :  { %6789 = vmatprep.subr.bf16.mxu0 %v7468_v58 }
 0x914   :  { %3914 = vmatmul.mubr.bf16.gmra.mxu1 %v3718_v49  ;;  %6790 = vmatpush3.bf16.msra.mxu0 %v7468_v58 }
 0x945   :  { %v3875_v59 = vpop.f32.mrf.mxu1 }
 0x946   :  { %v9041_v5 = vadd.f32 %v9038_v57, %v3875_v59 }
 0x947   :  { %v3877_v50 = vpop.f32.mrf.mxu1 }
 0x948   :  { %v6467_v23 = vmul.f32 -1.442695, %v9041_v5 }
 0x949   :  { %v3878_v34 = vpop.f32.mrf.mxu1 }
 0x94a   :  { %7708 = vpow2.f32 %v6467_v23  ;;  %v9045_v52 = vadd.f32 %v9038_v57, %v3878_v34 }
 0x94b   :  { %v3880_v39 = vpop.f32.mrf.mxu1 }
 0x94c   :  { %v6468_v48 = vmul.f32 -1.442695, %v9045_v52 }
 0x94e   :  { %7710 = vpow2.f32 %v6468_v48 }
 0x957   :  { %v7709_v27 = vpop.eup %7708 }
 0x958   :  { %v3970_v36 = vadd.f32 1.0, %v7709_v27 }
 0x95a   :  { %7712 = vrcp.f32 %v3970_v36 }
 0x95b   :  { %v7711_v21 = vpop.eup %7710 }
 0x95c   :  { %v3971_v46 = vadd.f32 1.0, %v7711_v21 }
 0x95e   :  { %7714 = vrcp.f32 %v3971_v46 }
 0x967   :  { %v7713_v26 = vpop.eup %7712 }
 0x968   :  { %4018 = vrot.lane.b32.xlu1 %v7713_v26, %s7821_s19 }
 0x96b   :  { %v7715_v10 = vpop.eup %7714 }
 0x96c   :  { %4020 = vrot.lane.b32.xlu0 %v7715_v10, %s7821_s19 }
 0x99d   :  { %v3883_v19 = vpop.f32.mrf.mxu1 }
 0x99e   :  { %v9059_v37 = vadd.f32 %v9038_v57, %v3883_v19 }
 0x99f   :  { %v3885_v51 = vpop.f32.mrf.mxu1 }
 0x9a0   :  { %v6469_v13 = vmul.f32 -1.442695, %v9059_v37  ;;  %v3924_v58 = vadd.f32 %v9059_v37, %v8926_v61 }
 0x9a1   :  { %v3886_v1 = vpop.f32.mrf.mxu1 }
 0x9a2   :  { %7716 = vpow2.f32 %v6469_v13  ;;  %v9063_v43 = vadd.f32 %v9038_v57, %v3886_v1 }
 0x9a3   :  { %v3888_v60 = vpop.f32.mrf.mxu1 }
 0x9a4   :  { %v6470_v31 = vmul.f32 -1.442695, %v9063_v43 }
 0x9a5   :  { %v3891_v4 = vpop.f32.mrf.mxu1 }
 0x9a6   :  { %7718 = vpow2.f32 %v6470_v31  ;;  %v9067_v7 = vadd.f32 %v9038_v57, %v3891_v4 }
 0x9a7   :  { %v3893_v14 = vpop.f32.mrf.mxu1 }
 0x9a8   :  { %v6471_v62 = vmul.f32 -1.442695, %v9067_v7 }
 0x9a9   :  { %v3894_v29 = vpop.f32.mrf.mxu1 }
 0x9aa   :  { %7720 = vpow2.f32 %v6471_v62  ;;  %v9071_v3 = vadd.f32 %v9038_v57, %v3894_v29 }
 0x9ab   :  { %v3896_v41 = vpop.f32.mrf.mxu1 }
 0x9ac   :  { %v6472_v30 = vmul.f32 -1.442695, %v9071_v3 }
 0x9ad   :  { %v3899_v47 = vpop.f32.mrf.mxu1 }
 0x9ae   :  { %7722 = vpow2.f32 %v6472_v30  ;;  %v9075_v33 = vadd.f32 %v9038_v57, %v3899_v47 }
 0x9af   :  { %v7717_v16 = vpop.eup %7716  ;;  %v3901_v44 = vpop.f32.mrf.mxu1 }
 0x9b0   :  { %v3972_v55 = vadd.f32 1.0, %v7717_v16  ;;  %v6473_v6 = vmul.f32 -1.442695, %v9075_v33  ;;  %v3928_v37 = vadd.f32 %v9075_v33, %v8935_v32 }
 0x9b1   :  { %v3902_v28 = vpop.f32.mrf.mxu1 }
 0x9b2   :  { %7724 = vrcp.f32 %v3972_v55  ;;  %v9079_v8 = vadd.f32 %v9038_v57, %v3902_v28  ;;  %v3922_v55 = vadd.f32 %v9041_v5, %v8854_v17 }
 0x9b3   :  { %v7719_v12 = vpop.eup %7718  ;;  %7726 = vpow2.f32 %v6473_v6  ;;  %v3904_v18 = vpop.f32.mrf.mxu1  ;;  %v3923_v6 = vadd.f32 %v9045_v52, %v8862_v42 }
 0x9b4   :  { %v3973_v25 = vadd.f32 1.0, %v7719_v12  ;;  %v6474_v2 = vmul.f32 -1.442695, %v9079_v8 }
 0x9b5   :  { %v3907_v54 = vpop.f32.mrf.mxu1 }
 0x9b6   :  { %7728 = vrcp.f32 %v3973_v25  ;;  %v9083_v11 = vadd.f32 %v9038_v57, %v3907_v54 }
 0x9b7   :  { %v7721_v45 = vpop.eup %7720  ;;  %7730 = vpow2.f32 %v6474_v2  ;;  %v3909_v35 = vpop.f32.mrf.mxu1 }
 0x9b8   :  { %v3974_v49 = vadd.f32 1.0, %v7721_v45  ;;  %v6475_v59 = vmul.f32 -1.442695, %v9083_v11 }
 0x9b9   :  { %v3910_v50 = vpop.f32.mrf.mxu1 }
 0x9ba   :  { %7732 = vrcp.f32 %v3974_v49  ;;  %v9088_v23 = vadd.f32 %v9038_v57, %v3910_v50  ;;  %v3925_v49 = vadd.f32 %v9063_v43, %v8946_v9  ;;  %v3929_v43 = vadd.f32 %v9079_v8, %v8959_v24 }
 0x9bb   :  { %v7723_v34 = vpop.eup %7722  ;;  %7734 = vpow2.f32 %v6475_v59  ;;  %v3912_v39 = vpop.f32.mrf.mxu1 }
 0x9bc   :  { %v3975_v48 = vadd.f32 1.0, %v7723_v34  ;;  %v6476_v27 = vmul.f32 -1.442695, %v9088_v23 }
 0x9be   :  { %7736 = vrcp.f32 %v3975_v48 }
 0x9bf   :  { %v7725_v36 = vpop.eup %7724  ;;  %7738 = vpow2.f32 %v6476_v27  ;;  %v3926_v27 = vadd.f32 %v9067_v7, %v8952_v56  ;;  %v3930_v7 = vadd.f32 %v9083_v11, %v8962_v53 }
 0x9c0   :  { %v7727_v21 = vpop.eup %7726  ;;  %4022 = vrot.lane.b32.xlu1 %v7725_v36, %s7821_s19  ;;  %v3927_v36 = vadd.f32 %v9071_v3, %v8994_v63  ;;  %v3931_v3 = vadd.f32 %v9088_v23, %v8983_v15  ;;  %v6479_v15 = vld [vmem:[%s6336_s9] ss:$0 sm:$0xff] }
 0x9c1   :  { %v3976_v46 = vadd.f32 1.0, %v7727_v21 }
 0x9c3   :  { %v7729_v26 = vpop.eup %7728  ;;  %7740 = vrcp.f32 %v3976_v46 }
 0x9c4   :  { %v7731_v10 = vpop.eup %7730  ;;  %4024 = vrot.lane.b32.xlu0 %v7729_v26, %s7821_s19 }
 0x9c5   :  { %v3977_v40 = vadd.f32 1.0, %v7731_v10 }
 0x9c7   :  { %v7733_v20 = vpop.eup %7732  ;;  %7742 = vrcp.f32 %v3977_v40 }
 0x9c8   :  { %v7735_v0 = vpop.eup %7734  ;;  %4026 = vrot.lane.b32.xlu1 %v7733_v20, %s7821_s19 }
 0x9c9   :  { %v3978_v19 = vadd.f32 1.0, %v7735_v0 }
 0x9cb   :  { %v7737_v51 = vpop.eup %7736  ;;  %7744 = vrcp.f32 %v3978_v19 }
 0x9cc   :  { %v7739_v13 = vpop.eup %7738  ;;  %4028 = vrot.lane.b32.xlu0 %v7737_v51, %s7821_s19 }
 0x9cd   :  { %v3979_v1 = vadd.f32 1.0, %v7739_v13 }
 0x9cf   :  { %7746 = vrcp.f32 %v3979_v1 }
 0x9d0   :  { %v7741_v4 = vpop.eup %7740 }
 0x9d1   :  { %4030 = vrot.lane.b32.xlu1 %v7741_v4, %s7821_s19 }
 0x9d4   :  { %v3915_v60 = vpop.f32.mrf.mxu1  ;;  %v7743_v30 = vpop.eup %7742 }
 0x9d5   :  { %v9096_v31 = vadd.f32 %v9038_v57, %v3915_v60  ;;  %4032 = vrot.lane.b32.xlu0 %v7743_v30, %s7821_s19 }
 0x9d6   :  { %v3917_v14 = vpop.f32.mrf.mxu1 }
 0x9d7   :  { %v6477_v62 = vmul.f32 -1.442695, %v9096_v31  ;;  %v3932_v33 = vadd.f32 %v9096_v31, %v8986_v38 }
 0x9d8   :  { %v3918_v29 = vpop.f32.mrf.mxu1  ;;  %v7745_v28 = vpop.eup %7744 }
 0x9d9   :  { %7748 = vpow2.f32 %v6477_v62  ;;  %v3919_v41 = vadd.f32 %v9038_v57, %v3918_v29  ;;  %4034 = vrot.lane.b32.xlu1 %v7745_v28, %s7821_s19 }
 0x9da   :  { %v3920_v47 = vpop.f32.mrf.mxu1  ;;  %v4019_v44 = vpop.permute.xlu1 %4018 }
 0x9db   :  { %v6478_v16 = vmul.f32 -1.442695, %v3919_v41  ;;  %v4054_v18 = vmul.f32 %v4019_v44, %v3922_v55  ;;  %v3933_v8 = vadd.f32 %v3919_v41, %v9026_v22 }
 0x9dc   :  { %v7747_v2 = vpop.eup %7746 }
 0x9dd   :  { %7750 = vpow2.f32 %v6478_v16  ;;  %4036 = vrot.lane.b32.xlu0 %v7747_v2, %s7821_s19 }
 0x9de   :  { %v4021_v12 = vpop.permute.xlu0 %4020 }
 0x9df   :  { %v4055_v25 = vmul.f32 %v4021_v12, %v3923_v6 }
 0x9e1   :  { %v4066_v57 = vpack.c.bf16 %v4055_v25, %v4054_v18 }
 0x9e3   :  { %6791 = vmatprep.mubr.msk.bf16.mxu0 %vm815_vm5, %v4066_v57 }
 0x9e6   :  { %v7749_v54 = vpop.eup %7748 }
 0x9e7   :  { %v3980_v45 = vadd.f32 1.0, %v7749_v54 }
 0x9e9   :  { %7752 = vrcp.f32 %v3980_v45 }
 0x9ea   :  { %v7751_v35 = vpop.eup %7750 }
 0x9eb   :  { %v3981_v17 = vadd.f32 1.0, %v7751_v35 }
 0x9ed   :  { %7754 = vrcp.f32 %v3981_v17 }
 0x9f6   :  { %v7753_v5 = vpop.eup %7752 }
 0x9f7   :  { %4038 = vrot.lane.b32.xlu1 %v7753_v5, %s7821_s19 }
 0x9fa   :  { %v7755_v42 = vpop.eup %7754 }
 0x9fb   :  { %4040 = vrot.lane.b32.xlu0 %v7755_v42, %s7821_s19 }
 0xa32   :  { %v4023_v52 = vpop.permute.xlu1 %4022 }
 0xa33   :  { %v4056_v50 = vmul.f32 %v4023_v52, %v3924_v58 }
 0xa36   :  { %v4025_v59 = vpop.permute.xlu0 %4024 }
 0xa37   :  { %v4057_v34 = vmul.f32 %v4025_v59, %v3925_v49 }
 0xa39   :  { %v4067_v39 = vpack.c.bf16 %v4057_v34, %v4056_v50  ;;  %v4654_v50 = vld [vmem:[%s6337_s13] sm:$0xf] }
 0xa3a   :  { %v4027_v48 = vpop.permute.xlu1 %4026  ;;  %6876 = vmatprep.subr.msk.bf16.mxu0 %vm386_vm0, %v4654_v50  ;;  %v4692_v34 = vsel %vm386_vm0, %v4654_v50, 0 }
 0xa3b   :  { %6792 = vmatmul.mubr.msk.bf16.vlgmr.msra.gmra.mxu0 %vm815_vm5, %v4067_v39  ;;  %v4058_v46 = vmul.f32 %v4027_v48, %v3926_v27 }
 0xa3c   :  { %6804 = vmatpush3.bf16.msra.mxu0 %v4692_v34 }
 0xa3e   :  { %v4029_v21 = vpop.permute.xlu0 %4028 }
 0xa3f   :  { %v4059_v26 = vmul.f32 %v4029_v21, %v3927_v36 }
 0xa41   :  { %v4068_v61 = vpack.c.bf16 %v4059_v26, %v4058_v46 }
 0xa43   :  { %6795 = vmatprep.mubr.msk.bf16.mxu0 %vm815_vm5, %v4068_v61  ;;  %v4031_v9 = vpop.permute.xlu1 %4030 }
 0xa44   :  { %v4060_v40 = vmul.f32 %v4031_v9, %v3928_v37 }
 0xa47   :  { %v4033_v10 = vpop.permute.xlu0 %4032 }
 0xa48   :  { %v4061_v20 = vmul.f32 %v4033_v10, %v3929_v43 }
 0xa4a   :  { %v4069_v56 = vpack.c.bf16 %v4061_v20, %v4060_v40 }
 0xa4b   :  { %v4035_v63 = vpop.permute.xlu1 %4034 }
 0xa4c   :  { %6796 = vmatmul.mubr.msk.bf16.gmra.mxu0 %vm815_vm5, %v4069_v56  ;;  %v4062_v19 = vmul.f32 %v4035_v63, %v3930_v7 }
 0xa4f   :  { %v4037_v0 = vpop.permute.xlu0 %4036 }
 0xa50   :  { %v4063_v51 = vmul.f32 %v4037_v0, %v3931_v3 }
 0xa52   :  { %v4070_v32 = vpack.c.bf16 %v4063_v51, %v4062_v19 }
 0xa54   :  { %6799 = vmatprep.mubr.msk.bf16.mxu0 %vm815_vm5, %v4070_v32 }
 0xa69   :  { %v4039_v24 = vpop.permute.xlu1 %4038 }
 0xa6a   :  { %v4064_v1 = vmul.f32 %v4039_v24, %v3932_v33 }
 0xa6d   :  { %v4041_v13 = vpop.permute.xlu0 %4040 }
 0xa6e   :  { %v4065_v60 = vmul.f32 %v4041_v13, %v3933_v8 }
 0xa70   :  { %v4071_v4 = vpack.c.bf16 %v4065_v60, %v4064_v1 }
 0xa72   :  { %6800 = vmatmul.mubr.msk.bf16.gmra.mxu0 %vm815_vm5, %v4071_v4 }
 0xafb   :  { %v6793_v53 = vpop.f32.mrf.mxu0 }
 0xafc   :  { %v9138_v14 = vadd.f32 %v6793_v53, %v6479_v15 }
 0xafd   :  { %v4163_v11 = vpop.f32.mrf.mxu0 }
 0xafe   :  { %v9142_v31 = vadd.f32 %v6479_v15, %v4163_v11 }
 0xaff   :  { %v6794_v23 = vpop.f32.mrf.mxu0 }
 0xb00   :  { %v9140_v38 = vadd.f32 %v6794_v23, %v6479_v15 }
 0xb01   :  { %v4166_v22 = vpop.f32.mrf.mxu0 }
 0xb02   :  { %v7298_v62 = vpack.i.bf16 %v9140_v38, %v9138_v14  ;;  %v9146_v29 = vadd.f32 %v6479_v15, %v4166_v22 }
 0xb04   :  { %v7293_v41 = vpack.i.bf16 %v9146_v29, %v9142_v31  ;;  %7299 = vrot.lane.b32.xlu0 %v7298_v62, %s7823_s24 }
 0xb06   :  { %7294 = vrot.lane.b32.xlu1 %v7293_v41, %s7823_s24 }
 0xb0c   :  { %v6797_v30 = vpop.f32.mrf.mxu0 }
 0xb0d   :  { %v9152_v44 = vadd.f32 %v6797_v30, %v6479_v15 }
 0xb0e   :  { %v4179_v47 = vpop.f32.mrf.mxu0 }
 0xb0f   :  { %v9156_v28 = vadd.f32 %v6479_v15, %v4179_v47 }
 0xb10   :  { %v6798_v16 = vpop.f32.mrf.mxu0 }
 0xb11   :  { %v9154_v55 = vadd.f32 %v6798_v16, %v6479_v15 }
 0xb12   :  { %v4182_v6 = vpop.f32.mrf.mxu0 }
 0xb13   :  { %v7303_v12 = vpack.i.bf16 %v9154_v55, %v9152_v44  ;;  %v9160_v18 = vadd.f32 %v6479_v15, %v4182_v6 }
 0xb15   :  { %v7308_v25 = vpack.i.bf16 %v9160_v18, %v9156_v28  ;;  %7304 = vrot.lane.b32.xlu0 %v7303_v12, %s7823_s24 }
 0xb17   :  { %7309 = vrot.lane.b32.xlu1 %v7308_v25, %s7823_s24 }
 0xb32   :  { %v6801_v57 = vpop.f32.mrf.mxu0 }
 0xb33   :  { %v9166_v45 = vadd.f32 %v6801_v57, %v6479_v15 }
 0xb34   :  { %v4195_v2 = vpop.f32.mrf.mxu0 }
 0xb35   :  { %v9170_v5 = vadd.f32 %v6479_v15, %v4195_v2 }
 0xb36   :  { %v6802_v54 = vpop.f32.mrf.mxu0 }
 0xb37   :  { %v9168_v35 = vadd.f32 %v6802_v54, %v6479_v15 }
 0xb38   :  { %v4198_v17 = vpop.f32.mrf.mxu0 }
 0xb39   :  { %v7313_v42 = vpack.i.bf16 %v9168_v35, %v9166_v45  ;;  %v9174_v52 = vadd.f32 %v6479_v15, %v4198_v17 }
 0xb3b   :  { %v7318_v58 = vpack.i.bf16 %v9174_v52, %v9170_v5  ;;  %7314 = vrot.lane.b32.xlu0 %v7313_v42, %s7823_s24 }
 0xb3d   :  { %7319 = vrot.lane.b32.xlu1 %v7318_v58, %s7823_s24  ;;  %s6347_s24 = sld [smem:[%s9595_s0 + %s7843_s11]]  }
 0xb76   :  { %v7300_v49 = vpop.permute.xlu0 %7299 }
 0xb77   :  { %7336 = vxpose.xlu0.b32.start.end [1/1] (short) (narrow) %v7300_v49, 16 }
 0xb78   :  { %v7295_v59 = vpop.permute.xlu1 %7294 }
 0xb79   :  { %7324 = vxpose.xlu1.b32.start.end [1/1] (short) (narrow) %v7295_v59, 16 }
 0xb87   :  { %v7305_v48 = vpop.permute.xlu0 %7304 }
 0xb89   :  { %v7310_v39 = vpop.permute.xlu1 %7309 }
 0xb8a   :  { %7348 = vxpose.xlu0.b32.start.end [1/1] (short) (narrow) %v7310_v39, 16 }
 0xb8f   :  { %7360 = vxpose.xlu0.b32.start.end [1/1] (short) (narrow) %v7305_v48, 16 }
 0xbad   :  { %v7315_v27 = vpop.permute.xlu0 %7314 }
 0xbae   :  { %7384 = vxpose.xlu0.b32.start.end [1/1] (short) (narrow) %v7315_v27, 16 }
 0xbaf   :  { %v7320_v36 = vpop.permute.xlu1 %7319 }
 0xbb0   :  { %7372 = vxpose.xlu1.b32.start.end [1/1] (short) (narrow) %v7320_v36, 16 }
 0xbf3   :  { %v7337_v21 = vpop.trf.xlu0 }
 0xbf4   :  { %v7338_v61 = vunpack.i.l.bf16 %v7337_v21  ;;  %v7341_v3 = vunpack.i.h.bf16 %v7337_v21 }
 0xbf5   :  { %v7325_v46 = vpop.trf.xlu1 }
 0xbf6   :  { %v7329_v26 = vunpack.i.h.bf16 %v7325_v46  ;;  %v7326_v37 = vunpack.i.l.bf16 %v7325_v46 }
 0xbf7   :  { %v7342_v9 = vpop.trf.xlu0 }
 0xbf8   :  { %v7343_v43 = vunpack.i.l.bf16 %v7342_v9  ;;  %v7346_v0 = vunpack.i.h.bf16 %v7342_v9 }
 0xbf9   :  { %v7330_v10 = vpop.trf.xlu1 }
 0xbfa   :  { %v7334_v40 = vunpack.i.h.bf16 %v7330_v10  ;;  %v7331_v20 = vunpack.i.l.bf16 %v7330_v10  ;;  %v4644_v7 = vpack.c.bf16 %v7343_v43, %v7338_v61  ;;  %v4645_v19 = vpack.c.bf16 %v7346_v0, %v7341_v3 }
 0xbfc   :  { %v4643_v56 = vpack.c.bf16 %v7334_v40, %v7329_v26  ;;  %v4642_v63 = vpack.c.bf16 %v7331_v20, %v7326_v37 }
 0xbfe   :  { %6805 = vmatprep.mubr.msk.bf16.mxu0 %vm1700_vm6, %v4642_v63 }
 0xbff   :  { %6806 = vmatmul.mubr.msk.bf16.vlgmr.msra.gmra.mxu0 %vm1700_vm6, %v4643_v56 }
 0xc00   :  { %6809 = vmatprep.mubr.msk.bf16.mxu0 %vm1700_vm6, %v4644_v7 }
 0xc06   :  { %v7349_v51 = vpop.trf.xlu0 }
 0xc07   :  { %6810 = vmatmul.mubr.msk.bf16.gmra.mxu0 %vm1700_vm6, %v4645_v19  ;;  %v7353_v32 = vunpack.i.h.bf16 %v7349_v51  ;;  %v7350_v24 = vunpack.i.l.bf16 %v7349_v51 }
 0xc0a   :  { %v7354_v33 = vpop.trf.xlu0 }
 0xc0b   :  { %v7358_v8 = vunpack.i.h.bf16 %v7354_v33  ;;  %v7355_v13 = vunpack.i.l.bf16 %v7354_v33 }
 0xc0d   :  { %v4646_v1 = vpack.c.bf16 %v7355_v13, %v7350_v24  ;;  %v4647_v60 = vpack.c.bf16 %v7358_v8, %v7353_v32  ;;  %v9209_v8 = vld [vmem:[%s6338_s15] ss:$0 sm:$0xff] }
 0xc0e   :  { %v7361_v4 = vpop.trf.xlu0 }
 0xc0f   :  { %6813 = vmatprep.mubr.msk.bf16.mxu0 %vm1700_vm6, %v4646_v1  ;;  %v7365_v53 = vunpack.i.h.bf16 %v7361_v4  ;;  %v7362_v15 = vunpack.i.l.bf16 %v7361_v4 }
 0xc10   :  { %6814 = vmatmul.mubr.msk.bf16.gmra.mxu0 %vm1700_vm6, %v4647_v60 }
 0xc12   :  { %v7366_v11 = vpop.trf.xlu0 }
 0xc13   :  { %v7370_v23 = vunpack.i.h.bf16 %v7366_v11  ;;  %v7367_v22 = vunpack.i.l.bf16 %v7366_v11 }
 0xc15   :  { %v4648_v62 = vpack.c.bf16 %v7367_v22, %v7362_v15  ;;  %v4649_v41 = vpack.c.bf16 %v7370_v23, %v7365_v53 }
 0xc17   :  { %6817 = vmatprep.mubr.msk.bf16.mxu0 %vm1700_vm6, %v4648_v62 }
 0xc18   :  { %6818 = vmatmul.mubr.msk.bf16.gmra.mxu0 %vm1700_vm6, %v4649_v41 }
 0xc2a   :  { %v7385_v30 = vpop.trf.xlu0 }
 0xc2b   :  { %v7386_v6 = vunpack.i.l.bf16 %v7385_v30  ;;  %v7389_v59 = vunpack.i.h.bf16 %v7385_v30 }
 0xc2c   :  { %v7373_v47 = vpop.trf.xlu1 }
 0xc2d   :  { %v7377_v25 = vunpack.i.h.bf16 %v7373_v47  ;;  %v7374_v57 = vunpack.i.l.bf16 %v7373_v47 }
 0xc2e   :  { %v7390_v16 = vpop.trf.xlu0 }
 0xc2f   :  { %v7391_v12 = vunpack.i.l.bf16 %v7390_v16  ;;  %v7394_v50 = vunpack.i.h.bf16 %v7390_v16 }
 0xc30   :  { %v7378_v2 = vpop.trf.xlu1 }
 0xc31   :  { %v7382_v54 = vunpack.i.h.bf16 %v7378_v2  ;;  %v7379_v17 = vunpack.i.l.bf16 %v7378_v2  ;;  %v4652_v49 = vpack.c.bf16 %v7391_v12, %v7386_v6  ;;  %v4653_v34 = vpack.c.bf16 %v7394_v50, %v7389_v59 }
 0xc33   :  { %v4650_v42 = vpack.c.bf16 %v7379_v17, %v7374_v57  ;;  %v4651_v58 = vpack.c.bf16 %v7382_v54, %v7377_v25 }
 0xc35   :  { %6821 = vmatprep.mubr.msk.bf16.mxu0 %vm1700_vm6, %v4650_v42 }
 0xc36   :  { %6822 = vmatmul.mubr.msk.bf16.gmra.mxu0 %vm1700_vm6, %v4651_v58 }
 0xc37   :  { %6825 = vmatprep.mubr.msk.bf16.mxu0 %vm1700_vm6, %v4652_v49 }
 0xc3e   :  { %6826 = vmatmul.mubr.msk.bf16.gmra.mxu0 %vm1700_vm6, %v4653_v34 }
 0xcbf   :  { %v6807_v39 = vpop.f32.mrf.mxu0 }
 0xcc0   :  { %4855 = vxpose.xlu1.b32.start [1/2] (short) (narrow) %v6807_v39, 8 }
 0xcc1   :  { %v9197_v48 = vpop.f32.mrf.mxu0 }
 0xcc3   :  { %v6808_v27 = vpop.f32.mrf.mxu0 }
 0xcc4   :  { %4856 = vxpose.xlu1.b32.end [2/2] (short) (narrow) %v6808_v27, 8 }
 0xcc5   :  { %v9199_v36 = vpop.f32.mrf.mxu0 }
 0xcc7   :  { %v6811_v21 = vpop.f32.mrf.mxu0 }
 0xcc8   :  { %4919 = vxpose.xlu1.b32.start [1/2] (short) (narrow) %v6811_v21, 8 }
 0xcc9   :  { %v4744_v46 = vpop.f32.mrf.mxu0 }
 0xcca   :  { %4887 = vxpose.xlu0.b32.start [1/2] (short) (narrow) %v4744_v46, 8 }
 0xccb   :  { %v6812_v26 = vpop.f32.mrf.mxu0 }
 0xccc   :  { %4920 = vxpose.xlu1.b32.end [2/2] (short) (narrow) %v6812_v26, 8 }
 0xccd   :  { %v4747_v61 = vpop.f32.mrf.mxu0 }
 0xcce   :  { %4888 = vxpose.xlu0.b32.end [2/2] (short) (narrow) %v4747_v61, 8 }
 0xcd0   :  { %v6815_v9 = vpop.f32.mrf.mxu0 }
 0xcd1   :  { %4983 = vxpose.xlu1.b32.start [1/2] (short) (narrow) %v6815_v9, 8 }
 0xcd2   :  { %v4760_v37 = vpop.f32.mrf.mxu0 }
 0xcd3   :  { %4951 = vxpose.xlu0.b32.start [1/2] (short) (narrow) %v4760_v37, 8 }
 0xcd4   :  { %v6816_v43 = vpop.f32.mrf.mxu0 }
 0xcd5   :  { %4984 = vxpose.xlu1.b32.end [2/2] (short) (narrow) %v6816_v43, 8 }
 0xcd6   :  { %v4763_v10 = vpop.f32.mrf.mxu0 }
 0xcd7   :  { %4952 = vxpose.xlu0.b32.end [2/2] (short) (narrow) %v4763_v10, 8 }
 0xcd8   :  { %v6819_v40 = vpop.f32.mrf.mxu0 }
 0xcda   :  { %v9201_v20 = vpop.f32.mrf.mxu0 }
 0xcdb   :  { %5047 = vxpose.xlu0.b32.start [1/2] (short) (narrow) %v6819_v40, 8 }
 0xcdc   :  { %v6820_v56 = vpop.f32.mrf.mxu0 }
 0xcde   :  { %v9203_v63 = vpop.f32.mrf.mxu0 }
 0xcdf   :  { %5048 = vxpose.xlu0.b32.end [2/2] (short) (narrow) %v6820_v56, 8 }
 0xcf6   :  { %v6823_v7 = vpop.f32.mrf.mxu0 }
 0xcf7   :  { %5111 = vxpose.xlu0.b32.start [1/2] (short) (narrow) %v6823_v7, 8  ;;  %v7469_v7 = vld [vmem:[%s6339_s20 + $0x10] sm:$0xff]  }
 0xcf8   :  { %v4792_v3 = vpop.f32.mrf.mxu0  ;;  %6829 = vmatprep.subr.bf16.mxu1 %v7469_v7 }
 0xcf9   :  { %5079 = vxpose.xlu1.b32.start [1/2] (short) (narrow) %v4792_v3, 8  ;;  %v7470_v3 = vld [vmem:[%s6339_s20 + $0x8] sm:$0xff]   ;;  %6830 = vmatpush3.bf16.msra.mxu1 %v7469_v7 }
 0xcfa   :  { %v6824_v0 = vpop.f32.mrf.mxu0  ;;  %6831 = vmatprep.subr.bf16.mxu1 %v7470_v3 }
 0xcfb   :  { %5112 = vxpose.xlu0.b32.end [2/2] (short) (narrow) %v6824_v0, 8 }
 0xcfc   :  { %v4795_v19 = vpop.f32.mrf.mxu0 }
 0xcfd   :  { %5080 = vxpose.xlu1.b32.end [2/2] (short) (narrow) %v4795_v19, 8  ;;  %6832 = vmatpush3.bf16.msra.mxu1 %v7470_v3 }
 0xcfe   :  { %v6827_v51 = vpop.f32.mrf.mxu0 }
 0xcff   :  { %5175 = vxpose.xlu0.b32.start [1/2] (short) (narrow) %v6827_v51, 8 }
 0xd00   :  { %v4808_v32 = vpop.f32.mrf.mxu0 }
 0xd01   :  { %5143 = vxpose.xlu1.b32.start [1/2] (short) (narrow) %v4808_v32, 8 }
 0xd02   :  { %v6828_v24 = vpop.f32.mrf.mxu0 }
 0xd03   :  { %5176 = vxpose.xlu0.b32.end [2/2] (short) (narrow) %v6828_v24, 8 }
 0xd04   :  { %v4811_v33 = vpop.f32.mrf.mxu0 }
 0xd05   :  { %5144 = vxpose.xlu1.b32.end [2/2] (short) (narrow) %v4811_v33, 8 }
 0xd3c   :  { %v4871_v13 = vpop.trf.xlu1 }
 0xd3d   :  { %v5215_v1 = vadd.f32 %v9209_v8, %v4871_v13 }
 0xd3f   :  { %v9213_v53 = vadd.f32 %v5215_v1, %v9146_v29 }
 0xd41   :  { %v5239_v22 = vmax.f32 %v9213_v53, 0.0 }
 0xd44   :  { %v4935_v60 = vpop.trf.xlu1 }
 0xd45   :  { %v5217_v15 = vadd.f32 %v9209_v8, %v4935_v60 }
 0xd46   :  { %v4903_v4 = vpop.trf.xlu0 }
 0xd47   :  { %v5216_v11 = vadd.f32 %v9209_v8, %v4903_v4  ;;  %v5229_v62 = vadd.f32 %v5217_v15, %v9140_v38 }
 0xd49   :  { %v5228_v23 = vadd.f32 %v5216_v11, %v9138_v14  ;;  %v9226_v16 = vmax.f32 %v5229_v62, 0.0 }
 0xd4b   :  { %v9220_v41 = vmax.f32 %v5228_v23, 0.0 }
 0xd4d   :  { %v4999_v30 = vpop.trf.xlu1  ;;  %v7395_v47 = vpack.i.bf16 %v9220_v41, %v5239_v22  ;;  %v7400_v38 = vpack.i.bf16 %v9226_v16, %v9220_v41 }
 0xd4e   :  { %v5219_v29 = vadd.f32 %v9209_v8, %v4999_v30 }
 0xd4f   :  { %v4967_v6 = vpop.trf.xlu0  ;;  %7396 = vrot.lane.b32.xlu1 %v7395_v47, %s7826_s3 }
 0xd50   :  { %v9230_v14 = vadd.f32 %v5219_v29, %v9160_v18  ;;  %v5218_v12 = vadd.f32 %v9209_v8, %v4967_v6 }
 0xd52   :  { %v5230_v25 = vadd.f32 %v5218_v12, %v9156_v28  ;;  %v5243_v57 = vmax.f32 %v9230_v14, 0.0 }
 0xd53   :  { %7401 = vrot.lane.b32.xlu1 %v7400_v38, %s7825_s2 }
 0xd54   :  { %v9238_v2 = vmax.f32 %v5230_v25, 0.0 }
 0xd56   :  { %v7405_v54 = vpack.i.bf16 %v9238_v2, %v9226_v16  ;;  %v7410_v18 = vpack.i.bf16 %v5243_v57, %v9238_v2 }
 0xd57   :  { %v5063_v17 = vpop.trf.xlu0 }
 0xd58   :  { %7406 = vrot.lane.b32.xlu0 %v7405_v54, %s7826_s3  ;;  %7411 = vrot.lane.b32.xlu1 %v7410_v18, %s7825_s2  ;;  %v5221_v28 = vadd.f32 %v9209_v8, %v5063_v17 }
 0xd5a   :  { %v9250_v59 = vadd.f32 %v5221_v28, %v9154_v55 }
 0xd5c   :  { %v5245_v27 = vmax.f32 %v9250_v59, 0.0 }
 0xd73   :  { %v5127_v42 = vpop.trf.xlu0 }
 0xd74   :  { %v5223_v58 = vadd.f32 %v9209_v8, %v5127_v42 }
 0xd75   :  { %v5095_v49 = vpop.trf.xlu1 }
 0xd76   :  { %v5235_v50 = vadd.f32 %v5223_v58, %v9174_v52  ;;  %v5222_v34 = vadd.f32 %v9209_v8, %v5095_v49 }
 0xd78   :  { %v5234_v39 = vadd.f32 %v5222_v34, %v9170_v5  ;;  %v9256_v21 = vmax.f32 %v5235_v50, 0.0 }
 0xd7a   :  { %v9258_v46 = vmax.f32 %v5234_v39, 0.0 }
 0xd7b   :  { %v5191_v26 = vpop.trf.xlu0 }
 0xd7c   :  { %v7420_v61 = vpack.i.bf16 %v9256_v21, %v9258_v46  ;;  %v7415_v55 = vpack.i.bf16 %v9258_v46, %v5245_v27  ;;  %v5225_v52 = vadd.f32 %v9209_v8, %v5191_v26 }
 0xd7d   :  { %v5159_v9 = vpop.trf.xlu1 }
 0xd7e   :  { %v5224_v37 = vadd.f32 %v9209_v8, %v5159_v9  ;;  %7421 = vrot.lane.b32.xlu0 %v7420_v61, %s7825_s2  ;;  %7416 = vrot.lane.b32.xlu1 %v7415_v55, %s7826_s3  ;;  %v9274_v43 = vadd.f32 %v5225_v52, %v9168_v35  ;;  %v7471_v35 = vld [vmem:[%s6339_s20] sm:$0xff]  }
 0xd7f   :  { %6833 = vmatprep.subr.bf16.mxu1 %v7471_v35 }
 0xd80   :  { %v5236_v5 = vadd.f32 %v5224_v37, %v9166_v45  ;;  %v5249_v56 = vmax.f32 %v9274_v43, 0.0  ;;  %6834 = vmatpush3.bf16.msra.mxu1 %v7471_v35 }
 0xd82   :  { %v9276_v10 = vmax.f32 %v5236_v5, 0.0 }
 0xd84   :  { %v7425_v40 = vpack.i.bf16 %v9276_v10, %v9256_v21  ;;  %v7430_v45 = vpack.i.bf16 %v5249_v56, %v9276_v10 }
 0xd86   :  { %7426 = vrot.lane.b32.xlu1 %v7425_v40, %s7826_s3  ;;  %s6345_s3 = sld [smem:[%s9595_s0 + %s7847_s18]]  }
 0xd8a   :  { %7431 = vrot.lane.b32.xlu1 %v7430_v45, %s7825_s2  ;;  %s7838_s2 = smov 18  }
 0xd8b   :  { %s6340_s22 = sld [smem:[%s9595_s0 + %s7838_s2]]  }
 0xd91   :  { %v6503_v3 = vld [vmem:[%s6340_s22] ss:$0 sm:$0xff] }
 0xd9c   :  { %4823 = vxpose.xlu0.b32.start [1/2] (short) (narrow) %v9197_v48, 8 }
 0xda0   :  { %4824 = vxpose.xlu0.b32.end [2/2] (short) (narrow) %v9199_v36, 8 }
 0xdb3   :  { %5015 = vxpose.xlu1.b32.start [1/2] (short) (narrow) %v9201_v20, 8 }
 0xdb7   :  { %5016 = vxpose.xlu1.b32.end [2/2] (short) (narrow) %v9203_v63, 8 }
 0xdc1   :  { %v7397_v0 = vpop.permute.xlu1 %7396 }
 0xdc2   :  { %v7399_v48 = vunpack.i.h.bf16 %v7397_v0  ;;  %v7398_v23 = vunpack.i.l.bf16 %v7397_v0 }
 0xdc4   :  { %v5309_v47 = vsel %vm2778_vm7, %v5239_v22, %v7399_v48 }
 0xdc5   :  { %v7402_v51 = vpop.permute.xlu1 %7401 }
 0xdc6   :  { %v7404_v11 = vunpack.i.h.bf16 %v7402_v51  ;;  %v7403_v30 = vunpack.i.l.bf16 %v7402_v51  ;;  %v5438_v51 = vsel %vm2778_vm7, %v9238_v2, 0.0 }
 0xdc8   :  { %v5317_v12 = vsel %vm2795_vm8, %v5309_v47, %v7404_v11  ;;  %v5442_v47 = vsel %vm2778_vm7, %v9276_v10, 0.0 }
 0xdca   :  { %v7407_v19 = vpop.permute.xlu0 %7406  ;;  %v7412_v13 = vpop.permute.xlu1 %7411 }
 0xdcb   :  { %v7409_v24 = vunpack.i.h.bf16 %v7407_v19  ;;  %v7408_v33 = vunpack.i.l.bf16 %v7407_v19  ;;  %v7414_v4 = vunpack.i.h.bf16 %v7412_v13  ;;  %v7413_v15 = vunpack.i.l.bf16 %v7412_v13 }
 0xdcd   :  { %v5311_v20 = vsel %vm2778_vm7, %v9226_v16, %v7409_v24  ;;  %v5310_v63 = vsel %vm2778_vm7, %v9220_v41, %v7408_v33 }
 0xdce   :  { %v5319_v29 = vsel %vm2795_vm8, %v5311_v20, %v7414_v4  ;;  %v5318_v6 = vsel %vm2795_vm8, %v5310_v63, %v7413_v15 }
 0xdcf   :  { %v5325_v18 = vpack.c.bf16 %v5319_v29, %v5318_v6 }
 0xdf0   :  { %v7422_v32 = vpop.permute.xlu0 %7421  ;;  %v7417_v25 = vpop.permute.xlu1 %7416 }
 0xdf1   :  { %v7419_v28 = vunpack.i.h.bf16 %v7417_v25  ;;  %v7424_v26 = vunpack.i.h.bf16 %v7422_v32  ;;  %v7418_v55 = vunpack.i.l.bf16 %v7417_v25  ;;  %v7423_v52 = vunpack.i.l.bf16 %v7422_v32 }
 0xdf3   :  { %v5313_v61 = vsel %vm2778_vm7, %v5245_v27, %v7419_v28 }
 0xdf4   :  { %v5321_v59 = vsel %vm2795_vm8, %v5313_v61, %v7424_v26 }
 0xdf8   :  { %v7427_v53 = vpop.permute.xlu1 %7426 }
 0xdf9   :  { %v7429_v58 = vunpack.i.h.bf16 %v7427_v53  ;;  %v7428_v49 = vunpack.i.l.bf16 %v7427_v53 }
 0xdfb   :  { %v5315_v37 = vsel %vm2778_vm7, %v9256_v21, %v7429_v58 }
 0xdfc   :  { %v7432_v17 = vpop.permute.xlu1 %7431 }
 0xdfd   :  { %v7434_v50 = vunpack.i.h.bf16 %v7432_v17  ;;  %v7433_v34 = vunpack.i.l.bf16 %v7432_v17 }
 0xdff   :  { %v5323_v40 = vsel %vm2795_vm8, %v5315_v37, %v7434_v50 }
 0xe18   :  { %v4839_v1 = vpop.trf.xlu0 }
 0xe19   :  { %v5214_v60 = vadd.f32 %v9209_v8, %v4839_v1  ;;  %v5439_v1 = vsel %vm2778_vm7, %v5243_v57, 0.0 }
 0xe1b   :  { %v5226_v36 = vadd.f32 %v5214_v60, %v9142_v31 }
 0xe1d   :  { %v5238_v62 = vmax.f32 %v5226_v36, 0.0 }
 0xe1f   :  { %v5308_v31 = vsel %vm2778_vm7, %v5238_v62, %v7398_v23 }
 0xe20   :  { %v5316_v38 = vsel %vm2795_vm8, %v5308_v31, %v7403_v30 }
 0xe21   :  { %v5324_v54 = vpack.c.bf16 %v5317_v12, %v5316_v38 }
 0xe23   :  { %6835 = vmatprep.mubr.msk.bf16.mxu1 %vm2851_vm9, %v5324_v54  ;;  %v5443_v54 = vsel %vm2778_vm7, %v5249_v56, 0.0 }
 0xe24   :  { %6836 = vmatmul.mubr.msk.bf16.vlgmr.msra.gmra.mxu1 %vm2851_vm9, %v5325_v18 }
 0xe2f   :  { %v5031_v22 = vpop.trf.xlu1 }
 0xe30   :  { %v5220_v42 = vadd.f32 %v9209_v8, %v5031_v22  ;;  %v5314_v8 = vsel %vm2778_vm7, %v9258_v46, %v7428_v49 }
 0xe31   :  { %v5322_v5 = vsel %vm2795_vm8, %v5314_v8, %v7433_v34 }
 0xe32   :  { %v5232_v39 = vadd.f32 %v5220_v42, %v9152_v44  ;;  %v5327_v45 = vpack.c.bf16 %v5323_v40, %v5322_v5 }
 0xe34   :  { %v5244_v9 = vmax.f32 %v5232_v39, 0.0 }
 0xe36   :  { %v5312_v44 = vsel %vm2778_vm7, %v5244_v9, %v7418_v55 }
 0xe37   :  { %v5320_v7 = vsel %vm2795_vm8, %v5312_v44, %v7423_v52 }
 0xe38   :  { %v5326_v27 = vpack.c.bf16 %v5321_v59, %v5320_v7 }
 0xe3a   :  { %6839 = vmatprep.mubr.msk.bf16.mxu1 %vm2851_vm9, %v5326_v27 }
 0xe3b   :  { %6840 = vmatmul.mubr.msk.bf16.gmra.mxu1 %vm2851_vm9, %v5327_v45  ;;  %v5437_v45 = vsel %vm2778_vm7, %v9226_v16, 0.0 }
 0xee4   :  { %v6837_v35 = vpop.f32.mrf.mxu1 }
 0xee5   :  { %v5414_v0 = vadd.f32 %v6837_v35, %v6503_v3 }
 0xee6   :  { %v5405_v19 = vpop.f32.mrf.mxu1 }
 0xee7   :  { %v9327_v32 = vadd.f32 %v5438_v51, %v5414_v0  ;;  %v6513_v15 = vmul.f32 -1.442695, %v5414_v0  ;;  %v9336_v36 = vadd.f32 %v6503_v3, %v5405_v19 }
 0xee8   :  { %v6838_v24 = vpop.f32.mrf.mxu1 }
 0xee9   :  { %v5417_v33 = vadd.f32 %v6838_v24, %v6503_v3  ;;  %v6511_v11 = vmul.f32 -1.442695, %v9336_v36 }
 0xeea   :  { %v5408_v13 = vpop.f32.mrf.mxu1 }
 0xeeb   :  { %v6514_v60 = vmul.f32 -1.442695, %v5417_v33  ;;  %v9332_v48 = vadd.f32 %v6503_v3, %v5408_v13  ;;  %v9334_v4 = vadd.f32 %v5439_v1, %v5417_v33 }
 0xeed   :  { %7756 = vpow2.f32 %v6514_v60  ;;  %v6512_v2 = vmul.f32 -1.442695, %v9332_v48  ;;  %v5441_v60 = vsel %vm2778_vm7, %v9256_v21, 0.0 }
 0xeef   :  { %7758 = vpow2.f32 %v6512_v2 }
 0xef0   :  { %7760 = vpow2.f32 %v6513_v15 }
 0xef1   :  { %7762 = vpow2.f32 %v6511_v11 }
 0xefa   :  { %v7757_v20 = vpop.eup %7756 }
 0xefb   :  { %v5479_v14 = vadd.f32 1.0, %v7757_v20  ;;  %v6841_v63 = vpop.f32.mrf.mxu1 }
 0xefc   :  { %v7759_v57 = vpop.eup %7758  ;;  %v5430_v23 = vadd.f32 %v6841_v63, %v6503_v3 }
 0xefd   :  { %7764 = vrcp.f32 %v5479_v14  ;;  %v5477_v62 = vadd.f32 1.0, %v7759_v57  ;;  %v5421_v30 = vpop.f32.mrf.mxu1  ;;  %v7761_v29 = vpop.eup %7760  ;;  %v5436_v57 = vsel %vm2778_vm7, %v9220_v41, 0.0 }
 0xefe   :  { %v9342_v6 = vadd.f32 %v5442_v47, %v5430_v23  ;;  %v5478_v38 = vadd.f32 1.0, %v7761_v29  ;;  %v7763_v18 = vpop.eup %7762  ;;  %v6517_v28 = vmul.f32 -1.442695, %v5430_v23  ;;  %v9347_v42 = vadd.f32 %v6503_v3, %v5421_v30 }
 0xeff   :  { %v6842_v31 = vpop.f32.mrf.mxu1  ;;  %7766 = vrcp.f32 %v5477_v62  ;;  %v5476_v58 = vadd.f32 1.0, %v7763_v18  ;;  %v5444_v62 = vadd.f32 %v5436_v57, %v9336_v36 }
 0xf00   :  { %v5433_v12 = vadd.f32 %v6842_v31, %v6503_v3  ;;  %v6515_v49 = vmul.f32 -1.442695, %v9347_v42 }
 0xf01   :  { %v5424_v25 = vpop.f32.mrf.mxu1 }
 0xf02   :  { %v6518_v53 = vmul.f32 -1.442695, %v5433_v12  ;;  %v5425_v17 = vadd.f32 %v6503_v3, %v5424_v25  ;;  %v5451_v22 = vadd.f32 %v5443_v54, %v5433_v12  ;;  %v5445_v3 = vadd.f32 %v5437_v45, %v9332_v48  ;;  %v7496_v45 = vld [vmem:[%s9431_s27 + $0xf0] ss:$8 sps:$4 sm:$0xff]  }
 0xf03   :  { %v5440_v25 = vsel %vm2778_vm7, %v9258_v46, 0.0 }
 0xf04   :  { %7768 = vpow2.f32 %v6518_v53  ;;  %v6516_v10 = vmul.f32 -1.442695, %v5425_v17  ;;  %v5449_v48 = vadd.f32 %v5441_v60, %v5425_v17  ;;  %v5448_v18 = vadd.f32 %v5440_v25, %v9347_v42  ;;  %v7510_v60 = vld [vmem:[%s9431_s27 + $0xb4] ss:$8 sps:$4 sm:$0xff]  }
 0xf05   :  { %7770 = vrcp.f32 %v5478_v38 }
 0xf06   :  { %7772 = vpow2.f32 %v6516_v10 }
 0xf07   :  { %7774 = vpow2.f32 %v6517_v28 }
 0xf08   :  { %7776 = vrcp.f32 %v5476_v58 }
 0xf09   :  { %7778 = vpow2.f32 %v6515_v49 }
 0xf0a   :  { %v7765_v50 = vpop.eup %7764 }
 0xf0b   :  { %5514 = vrot.lane.b32.xlu0 %v7765_v50, %s7821_s19  ;;  %v7472_v50 = vld [vmem:[%s9431_s27 + $0x70] ss:$8 sps:$4 sm:$0xff]  }
 0xf0c   :  { %v7767_v43 = vpop.eup %7766 }
 0xf0f   :  { %5510 = vrot.lane.b32.xlu0 %v7767_v43, %s7821_s19  ;;  %v7474_v43 = vld [vmem:[%s9431_s27 + $0x74] ss:$8 sps:$4 sm:$0xff]  }
 0xf10   :  { %6000 = vmatprep.subr.bf16.mxu0 %v7474_v43 }
 0xf11   :  { %v7769_v56 = vpop.eup %7768  ;;  %6001 = vmatpush1.bf16.msra.mxu0 %v7472_v50 }
 0xf12   :  { %v7771_v34 = vpop.eup %7770  ;;  %v5483_v39 = vadd.f32 1.0, %v7769_v56  ;;  %v7477_v56 = vld [vmem:[%s9431_s27 + $0x64] ss:$8 sps:$4 sm:$0xff]  }
 0xf13   :  { %v7773_v26 = vpop.eup %7772  ;;  %5512 = vrot.lane.b32.xlu0 %v7771_v34, %s7821_s19  ;;  %v7475_v34 = vld [vmem:[%s9431_s27 + $0x60] ss:$8 sps:$4 sm:$0xff]   ;;  %6002 = vmatprep.subr.bf16.mxu0 %v7477_v56 }
 0xf14   :  { %7780 = vrcp.f32 %v5483_v39  ;;  %v5481_v61 = vadd.f32 1.0, %v7773_v26  ;;  %v7775_v55 = vpop.eup %7774  ;;  %v7480_v39 = vld [vmem:[%s9431_s27 + $0x54] ss:$8 sps:$4 sm:$0xff]   ;;  %v7478_v26 = vld [vmem:[%s9431_s27 + $0x50] ss:$8 sps:$4 sm:$0xff]  }
 0xf15   :  { %v7777_v9 = vpop.eup %7776  ;;  %v5482_v52 = vadd.f32 1.0, %v7775_v55  ;;  %6003 = vmatpush1.bf16.msra.mxu0 %v7475_v34  ;;  %v7481_v55 = vld [vmem:[%s9431_s27 + $0x40] ss:$8 sps:$4 sm:$0xff]  }
 0xf16   :  { %7782 = vrcp.f32 %v5481_v61  ;;  %v7779_v37 = vpop.eup %7778  ;;  %6004 = vmatprep.subr.bf16.mxu0 %v7480_v39  ;;  %v7483_v61 = vld [vmem:[%s9431_s27 + $0x44] ss:$8 sps:$4 sm:$0xff]  }
 0xf17   :  { %5508 = vrot.lane.b32.xlu0 %v7777_v9, %s7821_s19  ;;  %7784 = vrcp.f32 %v5482_v52  ;;  %v5480_v8 = vadd.f32 1.0, %v7779_v37  ;;  %v7486_v9 = vld [vmem:[%s9431_s27 + $0x34] ss:$8 sps:$4 sm:$0xff]   ;;  %v7484_v52 = vld [vmem:[%s9431_s27 + $0x30] ss:$8 sps:$4 sm:$0xff]  }
 0xf18   :  { %v7489_v37 = vld [vmem:[%s9431_s27 + $0x24] ss:$8 sps:$4 sm:$0xff]  }
 0xf19   :  { %7786 = vrcp.f32 %v5480_v8  ;;  %6005 = vmatpush1.bf16.msra.mxu0 %v7478_v26  ;;  %v7487_v8 = vld [vmem:[%s9431_s27 + $0x20] ss:$8 sps:$4 sm:$0xff]  }
 0xf1a   :  { %6006 = vmatprep.subr.bf16.mxu0 %v7483_v61 }
 0xf1d   :  { %6007 = vmatpush1.bf16.msra.mxu0 %v7481_v55 }
 0xf1e   :  { %6008 = vmatprep.subr.bf16.mxu0 %v7486_v9 }
 0xf21   :  { %v7781_v5 = vpop.eup %7780  ;;  %6009 = vmatpush1.bf16.msra.mxu0 %v7484_v52 }
 0xf22   :  { %5522 = vrot.lane.b32.xlu1 %v7781_v5, %s7821_s19  ;;  %6010 = vmatprep.subr.bf16.mxu0 %v7489_v37  ;;  %v7492_v5 = vld [vmem:[%s9431_s27 + $0x14] ss:$8 sps:$4 sm:$0xff]  }
 0xf23   :  { %v7783_v40 = vpop.eup %7782 }
 0xf24   :  { %v7785_v44 = vpop.eup %7784 }
 0xf25   :  { %6011 = vmatpush1.bf16.msra.mxu0 %v7487_v8 }
 0xf26   :  { %5518 = vrot.lane.b32.xlu1 %v7783_v40, %s7821_s19  ;;  %v7787_v7 = vpop.eup %7786  ;;  %v7490_v40 = vld [vmem:[%s9431_s27 + $0x10] ss:$8 sps:$4 sm:$0xff]   ;;  %6012 = vmatprep.subr.bf16.mxu0 %v7492_v5 }
 0xf29   :  { %6013 = vmatpush1.bf16.msra.mxu0 %v7490_v40 }
 0xf2a   :  { %5520 = vrot.lane.b32.xlu1 %v7785_v44, %s7821_s19  ;;  %v7495_v44 = vld [vmem:[%s9431_s27 + $0x4] ss:$8 sps:$4 sm:$0xff]  }
 0xf2b   :  { %6014 = vmatprep.subr.bf16.mxu0 %v7495_v44 }
 0xf2e   :  { %5516 = vrot.lane.b32.xlu1 %v7787_v7, %s7821_s19  ;;  %v7493_v7 = vld [vmem:[%s9431_s27] ss:$8 sps:$4 sm:$0xff]  }
 0xf2f   :  { %6015 = vmatpush1.bf16.msra.mxu0 %v7493_v7 }
 0xf7d   :  { %v5515_v59 = vpop.permute.xlu0 %5514 }
 0xf7e   :  { %v9359_v27 = vmul.f32 %v5515_v59, %v9334_v4  ;;  %v7498_v59 = vld [vmem:[%s9431_s27 + $0xf4] ss:$8 sps:$4 sm:$0xff]  }
 0xf7f   :  { %6016 = vmatprep.subr.bf16.mxu0 %v7498_v59 }
 0xf80   :  { %v5549_v35 = vsel %vm815_vm5, %v9359_v27, 0.0  ;;  %v5615_v0 = vmul.f32 %v9359_v27, %v9359_v27  ;;  %6017 = vmatpush2.bf16.msra.mxu0 %v7496_v45 }
 0xf81   :  { %v5511_v19 = vpop.permute.xlu0 %5510  ;;  %5550 = vadd.xlane.f32.xlu0 %v5549_v35  ;;  %v7499_v35 = vld [vmem:[%s9431_s27 + $0xe0] ss:$8 sps:$4 sm:$0xff]  }
 0xf82   :  { %v9368_v51 = vmul.f32 %v5511_v19, %v5445_v3  ;;  %v5629_v24 = vsel %vm815_vm5, %v5615_v0, 0.0  ;;  %v7501_v3 = vld [vmem:[%s9431_s27 + $0xe4] ss:$8 sps:$4 sm:$0xff]   ;;  %v7504_v0 = vld [vmem:[%s9431_s27 + $0xd4] ss:$8 sps:$4 sm:$0xff]  }
 0xf83   :  { %5630 = vadd.xlane.f32.xlu1 %v5629_v24  ;;  %6018 = vmatprep.subr.bf16.mxu0 %v7501_v3  ;;  %v7502_v19 = vld [vmem:[%s9431_s27 + $0xd0] ss:$8 sps:$4 sm:$0xff]   ;;  %v7507_v24 = vld [vmem:[%s9431_s27 + $0xc4] ss:$8 sps:$4 sm:$0xff]  }
 0xf84   :  { %v5543_v33 = vsel %vm815_vm5, %v9368_v51, 0.0  ;;  %v5613_v15 = vmul.f32 %v9368_v51, %v9368_v51  ;;  %6019 = vmatpush2.bf16.msra.mxu0 %v7499_v35 }
 0xf85   :  { %5544 = vadd.xlane.f32.xlu0 %v5543_v33  ;;  %v5513_v1 = vpop.permute.xlu0 %5512  ;;  %6020 = vmatprep.subr.bf16.mxu0 %v7504_v0 }
 0xf86   :  { %v9384_v20 = vmul.f32 %v5513_v1, %v9327_v32  ;;  %v5623_v14 = vsel %vm815_vm5, %v5613_v15, 0.0 }
 0xf88   :  { %v5546_v32 = vsel %vm815_vm5, %v9384_v20, 0.0  ;;  %v5614_v38 = vmul.f32 %v9384_v20, %v9384_v20  ;;  %6021 = vmatpush2.bf16.msra.mxu0 %v7502_v19 }
 0xf89   :  { %v5509_v23 = vpop.permute.xlu0 %5508  ;;  %6022 = vmatprep.subr.bf16.mxu0 %v7507_v24 }
 0xf8a   :  { %v9394_v47 = vmul.f32 %v5509_v23, %v5444_v62  ;;  %v5626_v17 = vsel %vm815_vm5, %v5614_v38, 0.0 }
 0xf8c   :  { %v5540_v36 = vsel %vm815_vm5, %v9394_v47, 0.0 }
 0xf94   :  { %v5523_v16 = vpop.permute.xlu1 %5522 }
 0xf95   :  { %v9373_v13 = vmul.f32 %v5523_v16, %v5451_v22  ;;  %v5612_v22 = vmul.f32 %v9394_v47, %v9394_v47  ;;  %v7505_v16 = vld [vmem:[%s9431_s27 + $0xc0] ss:$8 sps:$4 sm:$0xff]  }
 0xf96   :  { %6023 = vmatpush2.bf16.msra.mxu0 %v7505_v16 }
 0xf97   :  { %v5561_v4 = vsel %vm815_vm5, %v9373_v13, 0.0  ;;  %v5619_v21 = vmul.f32 %v9373_v13, %v9373_v13  ;;  %v5620_v28 = vsel %vm815_vm5, %v5612_v22, 0.0  ;;  %6024 = vmatprep.subr.bf16.mxu0 %v7510_v60 }
 0xf98   :  { %v5519_v2 = vpop.permute.xlu1 %5518  ;;  %5562 = vadd.xlane.f32.xlu1 %v5561_v4  ;;  %v7508_v4 = vld [vmem:[%s9431_s27 + $0xb0] ss:$8 sps:$4 sm:$0xff]  }
 0xf99   :  { %v9381_v11 = vmul.f32 %v5519_v2, %v5449_v48  ;;  %v5641_v29 = vsel %vm815_vm5, %v5619_v21, 0.0  ;;  %v7513_v2 = vld [vmem:[%s9431_s27 + $0xa4] ss:$8 sps:$4 sm:$0xff]  }
 0xf9a   :  { %6025 = vmatpush2.bf16.msra.mxu0 %v7508_v4 }
 0xf9b   :  { %v5555_v63 = vsel %vm815_vm5, %v9381_v11, 0.0  ;;  %v5617_v31 = vmul.f32 %v9381_v11, %v9381_v11  ;;  %6026 = vmatprep.subr.bf16.mxu0 %v7513_v2 }
 0xf9c   :  { %5624 = vadd.xlane.f32.xlu1 %v5623_v14  ;;  %5556 = vadd.xlane.f32.xlu0 %v5555_v63  ;;  %v5521_v30 = vpop.permute.xlu1 %5520  ;;  %v7511_v63 = vld [vmem:[%s9431_s27 + $0xa0] ss:$8 sps:$4 sm:$0xff]  }
 0xf9d   :  { %v9402_v41 = vmul.f32 %v5521_v30, %v9342_v6  ;;  %v5635_v12 = vsel %vm815_vm5, %v5617_v31, 0.0 }
 0xf9e   :  { %6027 = vmatpush2.bf16.msra.mxu0 %v7511_v63 }
 0xf9f   :  { %v5558_v6 = vsel %vm815_vm5, %v9402_v41, 0.0  ;;  %v5618_v42 = vmul.f32 %v9402_v41, %v9402_v41 }
 0xfa0   :  { %5547 = vadd.xlane.f32.xlu1 %v5546_v32  ;;  %5642 = vadd.xlane.f32.xlu0 %v5641_v29  ;;  %v5517_v54 = vpop.permute.xlu1 %5516 }
 0xfa1   :  { %v9412_v53 = vmul.f32 %v5517_v54, %v5448_v18  ;;  %v5638_v10 = vsel %vm815_vm5, %v5618_v42, 0.0 }
 0xfa3   :  { %v5552_v46 = vsel %vm815_vm5, %v9412_v53, 0.0  ;;  %v5616_v58 = vmul.f32 %v9412_v53, %v9412_v53 }
 0xfa4   :  { %5636 = vadd.xlane.f32.xlu0 %v5635_v12  ;;  %5541 = vadd.xlane.f32.xlu1 %v5540_v36 }
 0xfa5   :  { %v5632_v49 = vsel %vm815_vm5, %v5616_v58, 0.0 }
 0xfa8   :  { %5559 = vadd.xlane.f32.xlu0 %v5558_v6  ;;  %5627 = vadd.xlane.f32.xlu1 %v5626_v17 }
 0xfac   :  { %5553 = vadd.xlane.f32.xlu0 %v5552_v46  ;;  %5621 = vadd.xlane.f32.xlu1 %v5620_v28 }
 0xfb0   :  { %5639 = vadd.xlane.f32.xlu0 %v5638_v10 }
 0xfb4   :  { %5633 = vadd.xlane.f32.xlu0 %v5632_v49 }
0x100a   :  { %v5551_v33 = vpop.xlane.xlu0 %5550 }
0x100b   :  { %v5582_v1 = vrot.slane %v5551_v33, 4 }
0x100c   :  { %v5631_v48 = vpop.xlane.xlu1 %5630 }
0x100d   :  { %v5583_v15 = vadd.f32 %v5582_v1, %v5551_v33  ;;  %v5662_v14 = vrot.slane %v5631_v48, 4 }
0x100e   :  { %v5545_v57 = vpop.xlane.xlu0 %5544 }
0x100f   :  { %v5584_v21 = vrot.slane %v5583_v15, 2  ;;  %v5663_v23 = vadd.f32 %v5662_v14, %v5631_v48  ;;  %v5570_v62 = vrot.slane %v5545_v57, 4 }
0x1011   :  { %v5585_v30 = vadd.f32 %v5584_v21, %v5583_v15  ;;  %v5664_v32 = vrot.slane %v5663_v23, 2  ;;  %v5571_v29 = vadd.f32 %v5570_v62, %v5545_v57 }
0x1013   :  { %v5586_v31 = vrot.slane %v5585_v30, 1  ;;  %v5665_v12 = vadd.f32 %v5664_v32, %v5663_v23  ;;  %v5572_v36 = vrot.slane %v5571_v29, 2 }
0x1015   :  { %v5587_v38 = vadd.f32 %v5586_v31, %v5585_v30  ;;  %v5666_v25 = vrot.slane %v5665_v12, 1  ;;  %v5573_v18 = vadd.f32 %v5572_v36, %v5571_v29 }
0x1017   :  { %v9461_v17 = vmul.f32 0.001953125, %v5587_v38  ;;  %v5667_v22 = vadd.f32 %v5666_v25, %v5665_v12  ;;  %v5574_v10 = vrot.slane %v5573_v18, 1 }
0x1019   :  { %v5711_v43 = vmul.f32 %v9461_v17, %v9461_v17  ;;  %v5703_v56 = vmul.f32 0.001953125, %v5667_v22  ;;  %v5575_v9 = vadd.f32 %v5574_v10, %v5573_v18 }
0x101b   :  { %v5719_v44 = vsub.f32 %v5703_v56, %v5711_v43  ;;  %v9465_v19 = vmul.f32 0.001953125, %v5575_v9 }
0x101d   :  { %v5735_v15 = vadd.f32 1e-05, %v5719_v44  ;;  %v5709_v32 = vmul.f32 %v9465_v19, %v9465_v19 }
0x101f   :  { %7788 = vrsqrt.f32 %v5735_v15 }
0x1021   :  { %v5563_v54 = vpop.xlane.xlu1 %5562 }
0x1022   :  { %v5606_v6 = vrot.slane %v5563_v54, 4 }
0x1024   :  { %v5607_v46 = vadd.f32 %v5606_v6, %v5563_v54 }
0x1025   :  { %v5625_v28 = vpop.xlane.xlu1 %5624  ;;  %v5557_v42 = vpop.xlane.xlu0 %5556 }
0x1026   :  { %v5608_v58 = vrot.slane %v5607_v46, 2  ;;  %v5650_v49 = vrot.slane %v5625_v28, 4  ;;  %v5594_v50 = vrot.slane %v5557_v42, 4 }
0x1028   :  { %v5609_v34 = vadd.f32 %v5608_v58, %v5607_v46  ;;  %v5651_v39 = vadd.f32 %v5650_v49, %v5625_v28  ;;  %v5595_v26 = vadd.f32 %v5594_v50, %v5557_v42 }
0x1029   :  { %v5548_v61 = vpop.xlane.xlu1 %5547  ;;  %v5643_v55 = vpop.xlane.xlu0 %5642 }
0x102a   :  { %v5652_v52 = vrot.slane %v5651_v39, 2  ;;  %v5596_v37 = vrot.slane %v5595_v26, 2  ;;  %v5576_v8 = vrot.slane %v5548_v61, 4  ;;  %v5610_v5 = vrot.slane %v5609_v34, 1 }
0x102b   :  { %v5686_v40 = vrot.slane %v5643_v55, 4 }
0x102c   :  { %v5653_v7 = vadd.f32 %v5652_v52, %v5651_v39  ;;  %v5597_v59 = vadd.f32 %v5596_v37, %v5595_v26  ;;  %v5577_v45 = vadd.f32 %v5576_v8, %v5548_v61  ;;  %v5611_v1 = vadd.f32 %v5610_v5, %v5609_v34 }
0x102d   :  { %v5687_v3 = vadd.f32 %v5686_v40, %v5643_v55  ;;  %v5637_v35 = vpop.xlane.xlu0 %5636  ;;  %v5542_v0 = vpop.xlane.xlu1 %5541 }
0x102e   :  { %v5654_v24 = vrot.slane %v5653_v7, 1  ;;  %v5598_v33 = vrot.slane %v5597_v59, 1  ;;  %v5578_v16 = vrot.slane %v5577_v45, 2  ;;  %v5674_v48 = vrot.slane %v5637_v35, 4 }
0x102f   :  { %v5688_v60 = vrot.slane %v5687_v3, 2  ;;  %v5564_v4 = vrot.slane %v5542_v0, 4  ;;  %v9469_v36 = vmul.f32 0.001953125, %v5611_v1 }
0x1030   :  { %v5655_v2 = vadd.f32 %v5654_v24, %v5653_v7  ;;  %v5599_v14 = vadd.f32 %v5598_v33, %v5597_v59  ;;  %v5579_v63 = vadd.f32 %v5578_v16, %v5577_v45  ;;  %v5675_v57 = vadd.f32 %v5674_v48, %v5637_v35 }
0x1031   :  { %v5689_v21 = vadd.f32 %v5688_v60, %v5687_v3  ;;  %v5565_v23 = vadd.f32 %v5564_v4, %v5542_v0  ;;  %v5560_v62 = vpop.xlane.xlu0 %5559  ;;  %v5628_v30 = vpop.xlane.xlu1 %5627  ;;  %v5715_v34 = vmul.f32 %v9469_v36, %v9469_v36 }
0x1032   :  { %v5701_v29 = vmul.f32 0.001953125, %v5655_v2  ;;  %v5600_v31 = vrot.slane %v5560_v62, 4  ;;  %v5656_v12 = vrot.slane %v5628_v30, 4  ;;  %v5676_v25 = vrot.slane %v5675_v57, 2 }
0x1033   :  { %v5690_v38 = vrot.slane %v5689_v21, 1  ;;  %v5566_v54 = vrot.slane %v5565_v23, 2  ;;  %v5580_v6 = vrot.slane %v5579_v63, 1  ;;  %v9471_v46 = vmul.f32 0.001953125, %v5599_v14 }
0x1034   :  { %v5717_v18 = vsub.f32 %v5701_v29, %v5709_v32  ;;  %v5601_v22 = vadd.f32 %v5600_v31, %v5560_v62  ;;  %v5677_v42 = vadd.f32 %v5676_v25, %v5675_v57  ;;  %v5657_v43 = vadd.f32 %v5656_v12, %v5628_v30  ;;  %v7789_v12 = vpop.eup %7788 }
0x1035   :  { %v5691_v28 = vadd.f32 %v5690_v38, %v5689_v21  ;;  %v5567_v10 = vadd.f32 %v5566_v54, %v5565_v23  ;;  %v5554_v58 = vpop.xlane.xlu0 %5553  ;;  %v5581_v61 = vadd.f32 %v5580_v6, %v5579_v63  ;;  %v5622_v37 = vpop.xlane.xlu1 %5621  ;;  %v5713_v8 = vmul.f32 %v9471_v46, %v9471_v46 }
0x1036   :  { %v5733_v49 = vadd.f32 1e-05, %v5717_v18  ;;  %v5602_v50 = vrot.slane %v5601_v22, 2  ;;  %v5588_v56 = vrot.slane %v5554_v58, 4  ;;  %v5678_v26 = vrot.slane %v5677_v42, 1 }
0x1037   :  { %v5707_v39 = vmul.f32 0.001953125, %v5691_v28  ;;  %v5658_v9 = vrot.slane %v5657_v43, 2  ;;  %v5568_v44 = vrot.slane %v5567_v10, 1  ;;  %v5644_v24 = vrot.slane %v5622_v37, 4 }
0x1038   :  { %v5603_v55 = vadd.f32 %v5602_v50, %v5601_v22  ;;  %v5589_v52 = vadd.f32 %v5588_v56, %v5554_v58  ;;  %v5679_v40 = vadd.f32 %v5678_v26, %v5677_v42  ;;  %7790 = vrsqrt.f32 %v5733_v49  ;;  %v7514_v26 = vld [vmem:[%s9431_s27 + $0x90] ss:$8 sps:$4 sm:$0xff]  }
0x1039   :  { %v5723_v5 = vsub.f32 %v5707_v39, %v5715_v34  ;;  %v5640_v7 = vpop.xlane.xlu0 %5639  ;;  %v5659_v45 = vadd.f32 %v5658_v9, %v5657_v43  ;;  %v9477_v16 = vmul.f32 0.001953125, %v5581_v61  ;;  %v5645_v4 = vadd.f32 %v5644_v24, %v5622_v37  ;;  %v7516_v61 = vld [vmem:[%s9431_s27 + $0x94] ss:$8 sps:$4 sm:$0xff]   ;;  %v5756_v37 = vld [vmem:[%s9482_s1] sm:$0xff] }
0x103a   :  { %v5604_v59 = vrot.slane %v5603_v55, 1  ;;  %v5590_v3 = vrot.slane %v5589_v52, 2  ;;  %v5705_v0 = vmul.f32 0.001953125, %v5679_v40  ;;  %v5680_v33 = vrot.slane %v5640_v7, 4  ;;  %6028 = vmatprep.subr.bf16.mxu0 %v7516_v61 }
0x103b   :  { %v5739_v35 = vadd.f32 1e-05, %v5723_v5  ;;  %v5660_v1 = vrot.slane %v5659_v45, 1  ;;  %v5569_v14 = vadd.f32 %v5568_v44, %v5567_v10  ;;  %v5646_v23 = vrot.slane %v5645_v4, 2  ;;  %6029 = vmatpush2.bf16.msra.mxu0 %v7514_v26 }
0x103c   :  { %v5591_v60 = vadd.f32 %v5590_v3, %v5589_v52  ;;  %v5721_v48 = vsub.f32 %v5705_v0, %v5713_v8  ;;  %v5681_v15 = vadd.f32 %v5680_v33, %v5640_v7  ;;  %v5605_v57 = vadd.f32 %v5604_v59, %v5603_v55 }
0x103d   :  { %7792 = vrsqrt.f32 %v5739_v35  ;;  %v5634_v2 = vpop.xlane.xlu0 %5633  ;;  %v5661_v63 = vadd.f32 %v5660_v1, %v5659_v45  ;;  %v5710_v30 = vmul.f32 %v9477_v16, %v9477_v16  ;;  %v5647_v38 = vadd.f32 %v5646_v23, %v5645_v4  ;;  %v5765_v4 = vld [vmem:[%s9495_s7] sm:$0xff] }
0x103e   :  { %v5737_v21 = vadd.f32 1e-05, %v5721_v48  ;;  %v5682_v62 = vrot.slane %v5681_v15, 2  ;;  %v5592_v29 = vrot.slane %v5591_v60, 1  ;;  %v5668_v31 = vrot.slane %v5634_v2, 4 }
0x103f   :  { %v5702_v32 = vmul.f32 0.001953125, %v5661_v63  ;;  %v9486_v6 = vmul.f32 0.001953125, %v5569_v14  ;;  %v9488_v22 = vmul.f32 0.001953125, %v5605_v57  ;;  %v5648_v28 = vrot.slane %v5647_v38, 1 }
0x1040   :  { %7794 = vrsqrt.f32 %v5737_v21  ;;  %v5683_v25 = vadd.f32 %v5682_v62, %v5681_v15  ;;  %v5669_v18 = vadd.f32 %v5668_v31, %v5634_v2  ;;  %v5727_v10 = vsub.f32 %v9359_v27, %v9461_v17 }
0x1041   :  { %v5718_v54 = vsub.f32 %v5702_v32, %v5710_v30  ;;  %v5593_v49 = vadd.f32 %v5592_v29, %v5591_v60  ;;  %v5649_v43 = vadd.f32 %v5648_v28, %v5647_v38  ;;  %v5708_v27 = vmul.f32 %v9486_v6, %v9486_v6 }
0x1042   :  { %v5684_v42 = vrot.slane %v5683_v25, 1  ;;  %v5670_v50 = vrot.slane %v5669_v18, 2  ;;  %v5751_v39 = vmul.f32 %v7789_v12, %v5727_v10  ;;  %v5714_v17 = vmul.f32 %v9488_v22, %v9488_v22 }
0x1043   :  { %v5734_v58 = vadd.f32 1e-05, %v5718_v54  ;;  %v5700_v9 = vmul.f32 0.001953125, %v5649_v43  ;;  %v5696_v8 = vmul.f32 0.001953125, %v5593_v49  ;;  %v5725_v40 = vsub.f32 %v9368_v51, %v9465_v19  ;;  %v7517_v19 = vld [vmem:[%s9431_s27 + $0x80] ss:$8 sps:$4 sm:$0xff]  }
0x1044   :  { %v5685_v56 = vadd.f32 %v5684_v42, %v5683_v25  ;;  %v5671_v34 = vadd.f32 %v5670_v50, %v5669_v18  ;;  %v5731_v44 = vsub.f32 %v9373_v13, %v9469_v36  ;;  %v5760_v35 = vmul.f32 %v5756_v37, %v5751_v39  ;;  %v7519_v36 = vld [vmem:[%s9431_s27 + $0x84] ss:$8 sps:$4 sm:$0xff]  }
0x1045   :  { %7796 = vrsqrt.f32 %v5734_v58  ;;  %v7791_v55 = vpop.eup %7790  ;;  %v5716_v7 = vsub.f32 %v5700_v9, %v5708_v27  ;;  %v5712_v60 = vmul.f32 %v5696_v8, %v5696_v8  ;;  %v5729_v51 = vsub.f32 %v9381_v11, %v9471_v46  ;;  %6030 = vmatprep.subr.bf16.mxu0 %v7519_v36 }
0x1046   :  { %v5706_v52 = vmul.f32 0.001953125, %v5685_v56  ;;  %v5672_v5 = vrot.slane %v5671_v34, 1  ;;  %v5749_v1 = vmul.f32 %v7791_v55, %v5725_v40  ;;  %v9513_v14 = vadd.f32 %v5765_v4, %v5760_v35  ;;  %6031 = vmatpush2.bf16.msra.mxu0 %v7517_v19 }
0x1047   :  { %v5732_v0 = vadd.f32 1e-05, %v5716_v7  ;;  %v5726_v46 = vsub.f32 %v9384_v20, %v9477_v16  ;;  %v5724_v54 = vsub.f32 %v9394_v47, %v9486_v6  ;;  %v5730_v28 = vsub.f32 %v9402_v41, %v9488_v22 }
0x1048   :  { %v5722_v59 = vsub.f32 %v5706_v52, %v5714_v17  ;;  %v5673_v3 = vadd.f32 %v5672_v5, %v5671_v34  ;;  %v5758_v57 = vmul.f32 %v5756_v37, %v5749_v1  ;;  %v5728_v58 = vsub.f32 %v9412_v53, %v5696_v8 }
0x1049   :  { %7798 = vrsqrt.f32 %v5732_v0 }
0x104a   :  { %v7793_v45 = vpop.eup %7792  ;;  %v5738_v24 = vadd.f32 1e-05, %v5722_v59  ;;  %v5704_v48 = vmul.f32 0.001953125, %v5673_v3  ;;  %v5767_v32 = vadd.f32 %v5765_v4, %v5758_v57 }
0x104b   :  { %v5755_v33 = vmul.f32 %v7793_v45, %v5731_v44 }
0x104c   :  { %7800 = vrsqrt.f32 %v5738_v24  ;;  %v5720_v2 = vsub.f32 %v5704_v48, %v5712_v60 }
0x104d   :  { %v5764_v13 = vmul.f32 %v5756_v37, %v5755_v33  ;;  %v7795_v15 = vpop.eup %7794 }
0x104e   :  { %v5753_v21 = vmul.f32 %v7795_v15, %v5729_v51  ;;  %v5736_v23 = vadd.f32 1e-05, %v5720_v2  ;;  %v6043_v15 = vsel %vm815_vm5, %v9513_v14, 0.0 }
0x104f   :  { %v9515_v63 = vadd.f32 %v5765_v4, %v5764_v13 }
0x1050   :  { %v5762_v11 = vmul.f32 %v5756_v37, %v5753_v21  ;;  %7802 = vrsqrt.f32 %v5736_v23 }
0x1051   :  { %v7435_v62 = vpack.i.bf16 %v9515_v63, %v9513_v14 }
0x1052   :  { %v7797_v30 = vpop.eup %7796  ;;  %v5771_v29 = vadd.f32 %v5765_v4, %v5762_v11 }
0x1053   :  { %7436 = vrot.lane.b32.xlu1 %v7435_v62, %s7821_s19  ;;  %v5750_v31 = vmul.f32 %v7797_v30, %v5726_v46  ;;  %v6044_v62 = vsel %vm815_vm5, %v9515_v63, 0.0  ;;  %v7844_v63 = vmov 0.0  }
0x1054   :  { %v7440_v12 = vpack.i.bf16 %v5771_v29, %v5767_v32  ;;  %6843 = vmatprep.subr.bf16.mxu1 %v7844_v63  ;;  %6859 = vmatprep.mubr.msk.bf16.mxu1 %vm7845_vm10, %v7844_v63  ;;  %v7520_v29 = vld [vmem:[%s6347_s24 + $0x38] sm:$0xff]  }
0x1055   :  { %v5759_v38 = vmul.f32 %v5756_v37, %v5750_v31  ;;  %6844 = vmatpush3.bf16.msra.mxu1 %v7520_v29  ;;  %v7521_v31 = vld [vmem:[%s6347_s24 + $0x30] sm:$0xff]   ;;  %v6553_v29 = vld [vmem:[%s6348_s29] ss:$0 sm:$0xff] }
0x1056   :  { %7441 = vrot.lane.b32.xlu0 %v7440_v12, %s7821_s19  ;;  %v7799_v18 = vpop.eup %7798  ;;  %s7842_s19 = smov 22   ;;  %6845 = vmatprep.subr.bf16.mxu1 %v7844_v63  ;;  %v7522_v12 = vld [vmem:[%s6347_s24 + $0x28] sm:$0xff]  }
0x1057   :  { %v5768_v25 = vadd.f32 %v5765_v4, %v5759_v38  ;;  %v5748_v16 = vmul.f32 %v7799_v18, %v5724_v54  ;;  %s6344_s10 = sld [smem:[%s9595_s0 + %s7842_s19]]   ;;  %v7523_v38 = vld [vmem:[%s6347_s24 + $0x20] sm:$0xff]   ;;  %v7525_v54 = vld [vmem:[%s6347_s24 + $0x10] sm:$0xff]   ;;  %v7526_v18 = vld [vmem:[%s6347_s24 + $0x8] sm:$0xff]  }
0x1059   :  { %v7801_v20 = vpop.eup %7800  ;;  %v5757_v10 = vmul.f32 %v5756_v37, %v5748_v16  ;;  %6846 = vmatpush3.bf16.msra.mxu1 %v7521_v31 }
0x105a   :  { %v5754_v42 = vmul.f32 %v7801_v20, %v5730_v28  ;;  %6847 = vmatprep.subr.bf16.mxu1 %v7844_v63  ;;  %v7527_v28 = vld [vmem:[%s6347_s24] sm:$0xff]  }
0x105b   :  { %v5766_v43 = vadd.f32 %v5765_v4, %v5757_v10 }
0x105c   :  { %v5763_v49 = vmul.f32 %v5756_v37, %v5754_v42 }
0x105d   :  { %v7803_v50 = vpop.eup %7802  ;;  %v5828_v44 = vld [vmem:[%s6344_s10] sm:$0x3]  ;;  %6848 = vmatpush3.bf16.msra.mxu1 %v7522_v12 }
0x105e   :  { %v5752_v56 = vmul.f32 %v7803_v50, %v5728_v58  ;;  %v5772_v34 = vadd.f32 %v5765_v4, %v5763_v49  ;;  %6849 = vmatprep.subr.bf16.mxu1 %v7844_v63 }
0x1060   :  { %v5761_v39 = vmul.f32 %v5756_v37, %v5752_v56  ;;  %v5830_v37 = vlaneseq }
0x1061   :  { %6850 = vmatpush3.bf16.msra.mxu1 %v7523_v38 }
0x1062   :  { %v5770_v26 = vadd.f32 %v5765_v4, %v5761_v39  ;;  %v5831_v5 = vshrl.u32 %v5830_v37, 7  ;;  %6851 = vmatprep.subr.bf16.mxu1 %v7844_v63 }
0x1064   :  { %v5836_v40 = vsub.s32 1, %v5831_v5  ;;  %v5832_v4 = vsub.s32 0, %v5831_v5 }
0x1066   :  { %v5837_v7 = vrot.slane %v5828_v44, %v5836_v40  ;;  %v5833_v19 = vrot.slane %v5828_v44, %v5832_v4 }
0x10c5   :  { %v7437_v61 = vpop.permute.xlu1 %7436 }
0x10c6   :  { %v7439_v55 = vunpack.i.h.bf16 %v7437_v61  ;;  %v7438_v47 = vunpack.i.l.bf16 %v7437_v61 }
0x10c8   :  { %v5792_v6 = vsel %vm815_vm5, %v5768_v25, %v7438_v47  ;;  %v5793_v41 = vsel %vm815_vm5, %v5772_v34, %v7439_v55  ;;  %v7442_v22 = vpop.permute.xlu0 %7441  ;;  %v7524_v25 = vld [vmem:[%s6347_s24 + $0x18] sm:$0xff]  }
0x10c9   :  { %v5795_v27 = vpack.c.bf16 %v5793_v41, %v5792_v6  ;;  %v7444_v17 = vunpack.i.h.bf16 %v7442_v22  ;;  %v7443_v9 = vunpack.i.l.bf16 %v7442_v22  ;;  %6852 = vmatpush3.bf16.msra.mxu1 %v7524_v25 }
0x10ca   :  { %6853 = vmatprep.subr.bf16.mxu1 %v7844_v63 }
0x10cb   :  { %6032 = vmatprep.mubr.bf16.mxu0 %v5795_v27  ;;  %v5791_v53 = vsel %vm815_vm5, %v5770_v26, %v7444_v17  ;;  %v5790_v52 = vsel %vm815_vm5, %v5766_v43, %v7443_v9 }
0x10cc   :  { %v5794_v8 = vpack.c.bf16 %v5791_v53, %v5790_v52 }
0x10cd   :  { %6854 = vmatpush3.bf16.msra.mxu1 %v7525_v54 }
0x10ce   :  { %6033 = vmatmul.mubr.bf16.vlgmr.msra.gmra.mxu0 %v5794_v8  ;;  %6855 = vmatprep.subr.bf16.mxu1 %v7844_v63 }
0x10d1   :  { %6856 = vmatpush3.bf16.msra.mxu1 %v7526_v18 }
0x10d2   :  { %6857 = vmatprep.subr.bf16.mxu1 %v7844_v63 }
0x10d5   :  { %6858 = vmatpush3.bf16.msra.mxu1 %v7527_v28 }
0x10d6   :  { %6863 = vmatprep.subr.bf16.mxu1 %v7844_v63 }
0x118e   :  { %v6034_v59 = vpop.f32.mrf.mxu0 }
0x118f   :  { %v6035_v36 = vadd.f32 %v6034_v59, %v5833_v19 }
0x1190   :  { %v6036_v45 = vpop.f32.mrf.mxu0 }
0x1191   :  { %v6037_v3 = vadd.f32 %v6036_v45, %v5837_v7  ;;  %v6045_v2 = vadd.f32 %v6043_v15, %v6035_v36 }
0x1192   :  { %v6038_v35 = vpop.f32.mrf.mxu0 }
0x1193   :  { %v6551_v0 = vmul.f32 -1.442695, %v6037_v3  ;;  %v6039_v21 = vadd.f32 %v6038_v35, %v5833_v19 }
0x1194   :  { %v6040_v24 = vpop.f32.mrf.mxu0 }
0x1195   :  { %7804 = vpow2.f32 %v6551_v0  ;;  %v6041_v33 = vadd.f32 %v6040_v24, %v5837_v7  ;;  %v6046_v11 = vadd.f32 %v6044_v62, %v6039_v21  ;;  %v6115_v21 = vld [vmem:[%s6346_s25] sm:$0xff] }
0x1197   :  { %v6552_v1 = vmul.f32 -1.442695, %v6041_v33 }
0x1199   :  { %7806 = vpow2.f32 %v6552_v1 }
0x11a2   :  { %v7805_v60 = vpop.eup %7804 }
0x11a3   :  { %v6053_v48 = vadd.f32 1.0, %v7805_v60 }
0x11a5   :  { %7808 = vrcp.f32 %v6053_v48 }
0x11a6   :  { %v7807_v51 = vpop.eup %7806 }
0x11a7   :  { %v6054_v13 = vadd.f32 1.0, %v7807_v51 }
0x11a9   :  { %7810 = vrcp.f32 %v6054_v13  ;;  %v6112_v13 = vld [vmem:[%s6345_s3] sm:$0xff] }
0x11b2   :  { %v7809_v57 = vpop.eup %7808 }
0x11b3   :  { %v9537_v23 = vmul.f32 %v7809_v57, %v6045_v2 }
0x11b5   :  { %6061 = vadd.xlane.f32.xlu1 %v9537_v23  ;;  %v6077_v32 = vmul.f32 %v9537_v23, %v9537_v23 }
0x11b6   :  { %v7811_v46 = vpop.eup %7810 }
0x11b7   :  { %v9542_v30 = vmul.f32 %v7811_v46, %v6046_v11  ;;  %v7528_v46 = vld [vmem:[%s9563_s17 + $0x18] sm:$0xff]  }
0x11b9   :  { %6063 = vadd.xlane.f32.xlu0 %v9542_v30  ;;  %6079 = vadd.xlane.f32.xlu1 %v6077_v32  ;;  %v6078_v14 = vmul.f32 %v9542_v30, %v9542_v30 }
0x11bd   :  { %6081 = vadd.xlane.f32.xlu0 %v6078_v14  ;;  %v7531_v14 = vld [vmem:[%s9563_s17] sm:$0xff]  }
0x123e   :  { %v6062_v20 = vpop.xlane.xlu1 %6061 }
0x123f   :  { %v6065_v16 = vrot.slane %v6062_v20, 4 }
0x1241   :  { %v6066_v42 = vadd.f32 %v6065_v16, %v6062_v20 }
0x1242   :  { %v6064_v10 = vpop.xlane.xlu0 %6063  ;;  %v6080_v58 = vpop.xlane.xlu1 %6079 }
0x1243   :  { %v6067_v49 = vrot.slane %v6066_v42, 2  ;;  %v6071_v50 = vrot.slane %v6064_v10, 4  ;;  %v6083_v43 = vrot.slane %v6080_v58, 4 }
0x1245   :  { %v6068_v56 = vadd.f32 %v6067_v49, %v6066_v42  ;;  %v6072_v34 = vadd.f32 %v6071_v50, %v6064_v10  ;;  %v6084_v39 = vadd.f32 %v6083_v43, %v6080_v58 }
0x1246   :  { %v6082_v26 = vpop.xlane.xlu0 %6081 }
0x1247   :  { %v6069_v61 = vrot.slane %v6068_v56, 1  ;;  %v6073_v55 = vrot.slane %v6072_v34, 2  ;;  %v6085_v47 = vrot.slane %v6084_v39, 2  ;;  %v6089_v6 = vrot.slane %v6082_v26, 4 }
0x1249   :  { %v6070_v41 = vadd.f32 %v6069_v61, %v6068_v56  ;;  %v6074_v22 = vadd.f32 %v6073_v55, %v6072_v34  ;;  %v6086_v27 = vadd.f32 %v6085_v47, %v6084_v39  ;;  %v6090_v17 = vadd.f32 %v6089_v6, %v6082_v26 }
0x124b   :  { %v6096_v9 = vmul.f32 0.0009765625, %v6070_v41  ;;  %v6075_v53 = vrot.slane %v6074_v22, 1  ;;  %v6087_v52 = vrot.slane %v6086_v27, 1  ;;  %v6091_v8 = vrot.slane %v6090_v17, 2 }
0x124d   :  { %v6076_v37 = vadd.f32 %v6075_v53, %v6074_v22  ;;  %v6088_v5 = vadd.f32 %v6087_v52, %v6086_v27  ;;  %v6092_v40 = vadd.f32 %v6091_v8, %v6090_v17  ;;  %v6100_v44 = vmul.f32 %v6096_v9, %v6096_v9 }
0x124e   :  { %v6104_v4 = vsub.f32 %v9537_v23, %v6096_v9  ;;  %v7529_v23 = vld [vmem:[%s9563_s17 + $0x10] sm:$0xff]  }
0x124f   :  { %v6098_v7 = vmul.f32 0.0009765625, %v6088_v5  ;;  %v6097_v59 = vmul.f32 0.0009765625, %v6076_v37  ;;  %v6093_v45 = vrot.slane %v6092_v40, 1 }
0x1251   :  { %v6102_v3 = vsub.f32 %v6098_v7, %v6100_v44  ;;  %v6094_v35 = vadd.f32 %v6093_v45, %v6092_v40  ;;  %v6101_v24 = vmul.f32 %v6097_v59, %v6097_v59  ;;  %v6105_v19 = vsub.f32 %v9542_v30, %v6097_v59  ;;  %v7530_v30 = vld [vmem:[%s9563_s17 + $0x8] sm:$0xff]  }
0x1253   :  { %v6106_v0 = vadd.f32 1e-05, %v6102_v3  ;;  %v6099_v33 = vmul.f32 0.0009765625, %v6094_v35 }
0x1255   :  { %7812 = vrsqrt.f32 %v6106_v0  ;;  %v6103_v1 = vsub.f32 %v6099_v33, %v6101_v24 }
0x1257   :  { %v6107_v60 = vadd.f32 1e-05, %v6103_v1 }
0x1259   :  { %7814 = vrsqrt.f32 %v6107_v60 }
0x1262   :  { %v7813_v48 = vpop.eup %7812 }
0x1263   :  { %v6110_v51 = vmul.f32 %v7813_v48, %v6104_v4 }
0x1265   :  { %v6113_v2 = vmul.f32 %v6112_v13, %v6110_v51 }
0x1266   :  { %v7815_v36 = vpop.eup %7814 }
0x1267   :  { %v6111_v15 = vmul.f32 %v7815_v36, %v6105_v19  ;;  %v6116_v62 = vadd.f32 %v6115_v21, %v6113_v2 }
0x1269   :  { %v6114_v57 = vmul.f32 %v6112_v13, %v6111_v15 }
0x126b   :  { %v6117_v11 = vadd.f32 %v6115_v21, %v6114_v57 }
0x126d   :  { %v6118_v32 = vpack.c.bf16 %v6117_v11, %v6116_v62 }
0x126f   :  { %6860 = vmatmul.mubr.bf16.vlgmr.msra.gmra.mxu1 %v6118_v32 }
0x1270   :  { %6864 = vmatpush3.bf16.msra.mxu1 %v7528_v46  ;;  %6871 = vmatprep.mubr.msk.bf16.mxu1 %vm7845_vm10, %v7844_v63 }
0x1271   :  { %6865 = vmatprep.subr.bf16.mxu1 %v7844_v63 }
0x1274   :  { %6866 = vmatpush3.bf16.msra.mxu1 %v7529_v23 }
0x1275   :  { %6867 = vmatprep.subr.bf16.mxu1 %v7844_v63 }
0x1278   :  { %6868 = vmatpush3.bf16.msra.mxu1 %v7530_v30 }
0x1279   :  { %6869 = vmatprep.subr.bf16.mxu1 %v7844_v63  ;;  %v6562_v63 = vld [vmem:[%s6350_s5] ss:$0 sm:$0xff] }
0x127c   :  { %6870 = vmatpush3.bf16.msra.mxu1 %v7531_v14 }
0x132f   :  { %v6224_v31 = vpop.f32.mrf.mxu1 }
0x1330   :  { %v6225_v38 = vadd.f32 %v6553_v29, %v6224_v31 }
0x1331   :  { %v6861_v12 = vpop.f32.mrf.mxu1 }
0x1332   :  { %v6231_v28 = vmax.f32 %v6225_v38, 0.0 }
0x1333   :  { %v6227_v25 = vpop.f32.mrf.mxu1 }
0x1334   :  { %v6228_v54 = vadd.f32 %v6553_v29, %v6227_v25 }
0x1335   :  { %v6862_v18 = vpop.f32.mrf.mxu1 }
0x1336   :  { %v6232_v20 = vmax.f32 %v6228_v54, 0.0 }
0x1338   :  { %v6233_v16 = vpack.c.bf16 %v6232_v20, %v6231_v28 }
0x133a   :  { %6872 = vmatmul.mubr.msk.bf16.vlgmr.msra.gmra.mxu1 %vm815_vm5, %v6233_v16 }
0x13fa   :  { %v6310_v42 = vpop.f32.mrf.mxu1 }
0x13fb   :  { %v6311_v10 = vadd.f32 %v6562_v63, %v6310_v42 }
0x13fc   :  { %v6873_v58 = vpop.f32.mrf.mxu1 }
0x13fd   :  { %6317 = vst [vmem:[%s6351_s8] sm:$0xff] %v6311_v10 }
0x13fe   :  { %v6313_v49 = vpop.f32.mrf.mxu1 }
0x13ff   :  { %v6314_v50 = vadd.f32 %v6562_v63, %v6313_v49 }
0x1400   :  { %v6874_v43 = vpop.f32.mrf.mxu1 }
0x1401   :  { %6318 = vst [vmem:[%s6351_s8 + $0x8] sm:$0xff] %v6314_v50 }

</bundles_post_ra>
